<compile_context>
chip_gen: v6e
topology: v6e:2x2x1
jax: 0.10.0
libtpu: 0.0.40
codegen_flags: <defaults>
</compile_context>

<pallas_src>
import functools
import math

import jax
import jax.numpy as jnp
from jax import lax
from jax.experimental import pallas as pl
from jax.experimental.pallas import tpu as pltpu


# Indices into the stacked parameter slabs (order fixed by pack_params).
(_SELF_ENT, _CROSS_ENT, _SELF_SO, _CROSS_SUB, _CROSS_SUB_ENT,
 _CROSS_OBJ, _CROSS_OBJ_ENT) = range(7)
_FFN_ENT, _FFN_SUB, _FFN_OBJ = range(3)


# ----------------------------------------------------------------------------
# The fused whole-layer kernel (one grid step == one batch element)
# ----------------------------------------------------------------------------

def _decoder_layer_kernel(ent_ref, epos_ref, trip_ref, tpos_ref, sopos_ref,
                          mem_ref, pos_ref,
                          mha_w_in_ref, mha_w_out_ref, mha_vec_ref,
                          ffn_w1_ref, ffn_w2_ref, ffn_vec_ref,
                          out_ent_ref, out_trip_ref, sub_maps_ref, obj_maps_ref,
                          *, nhead, eps):
    f32 = jnp.float32
    E = mha_w_out_ref.shape[-1]
    H = nhead
    Dh = E // H
    scale = 1.0 / math.sqrt(Dh)

    # ---- trace-time cached head masks / head-combine matrices (iota only) ----
    cache = {}

    def masks(Lq):
        if Lq not in cache:
            c_idx = lax.broadcasted_iota(jnp.int32, (Lq, E), 1)
            # hm[h*Lq + i, c] = 1  iff  column c belongs to head h
            hm = jnp.concatenate(
                [((c_idx >= h * Dh) & (c_idx < (h + 1) * Dh)).astype(f32)
                 for h in range(H)], axis=0)                         # (H*Lq, E)
            ri = lax.broadcasted_iota(jnp.int32, (Lq, Lq), 0)
            ci = lax.broadcasted_iota(jnp.int32, (Lq, Lq), 1)
            eye = (ri == ci).astype(f32)
            G = jnp.concatenate([eye] * H, axis=1)                   # (Lq, H*Lq)
            cache[Lq] = (hm, G)
        return cache[Lq]

    def layer_norm(z, g, b):
        mu = jnp.mean(z, axis=-1, keepdims=True)
        d = z - mu
        var = jnp.mean(d * d, axis=-1, keepdims=True)
        return d * lax.rsqrt(var + eps) * g + b

    def attention(q, k, v, need_maps):
        # q: (Lq, E), k/v: (S, E).  All heads handled by two wide matmuls on a
        # row-stacked, head-masked Q; G re-combines the head row blocks.
        Lq = q.shape[0]
        hm, G = masks(Lq)
        qs = jnp.concatenate([q] * H, axis=0) * hm                   # (H*Lq, E)
        s = lax.dot_general(qs, k, (((1,), (1,)), ((), ())),
                            preferred_element_type=f32) * scale      # (H*Lq, S)
        s = s - jnp.max(s, axis=-1, keepdims=True)
        e = jnp.exp(s)
        p = e * pl.reciprocal(jnp.sum(e, axis=-1, keepdims=True), approx=True)
        o = jnp.dot(p, v, preferred_element_type=f32) * hm           # (H*Lq, E)
        attn = jnp.dot(G, o, preferred_element_type=f32)             # (Lq, E) head concat
        maps = None
        if need_maps:
            # PyTorch default: attention weights averaged over heads.
            maps = jnp.dot(G, p, preferred_element_type=f32) * (1.0 / H)
        return attn, maps

    def mha(idx, q_in, k_in, v_in, res, q_is_k=False, k_is_v=False,
            need_maps=False):
        w_in = mha_w_in_ref[idx]                  # (E, 3E)  columns [q | k | v]
        w_o = mha_w_out_ref[idx]                  # (E, E)
        vec = mha_vec_ref[idx]                    # (6, E): bq, bk, bv, bo, ln_g, ln_b
        if q_is_k:
            qk = jnp.dot(q_in, w_in[:, :2 * E], preferred_element_type=f32)
            q = qk[:, :E] + vec[0:1]
            k = qk[:, E:2 * E] + vec[1:2]
            v = jnp.dot(v_in, w_in[:, 2 * E:], preferred_element_type=f32) + vec[2:3]
        elif k_is_v:
            q = jnp.dot(q_in, w_in[:, :E], preferred_element_type=f32) + vec[0:1]
            kv = jnp.dot(k_in, w_in[:, E:], preferred_element_type=f32)
            k = kv[:, :E] + vec[1:2]
            v = kv[:, E:] + vec[2:3]
        else:
            q = jnp.dot(q_in, w_in[:, :E], preferred_element_type=f32) + vec[0:1]
            k = jnp.dot(k_in, w_in[:, E:2 * E], preferred_element_type=f32) + vec[1:2]
            v = jnp.dot(v_in, w_in[:, 2 * E:], preferred_element_type=f32) + vec[2:3]
        attn, maps = attention(q, k, v, need_maps)
        proj = jnp.dot(attn, w_o, preferred_element_type=f32) + vec[3:4]
        return layer_norm(res + proj, vec[4:5], vec[5:6]), maps

    def ffn(idx, x):
        w1 = ffn_w1_ref[idx]                      # (E, F)
        w2 = ffn_w2_ref[idx]                      # (F, E)
        vec = ffn_vec_ref[idx]                    # (4, F): b1, b2|pad, ln_g|pad, ln_b|pad
        h = jnp.maximum(jnp.dot(x, w1, preferred_element_type=f32) + vec[0:1], 0.0)
        y = jnp.dot(h, w2, preferred_element_type=f32) + vec[1:2, :E]
        return layer_norm(x + y, vec[2:3, :E], vec[3:4, :E])

    # ---------------- this batch element's activations ----------------
    ent = ent_ref[0].astype(f32)                  # (Le, E)
    epos = epos_ref[0].astype(f32)                # (Le, E)
    trip = trip_ref[0].astype(f32)                # (T, 2E)
    tpos = tpos_ref[0].astype(f32)                # (T, E)
    sopos = sopos_ref[...].astype(f32)            # (2, E)
    mem = mem_ref[0].astype(f32)                  # (S, E)
    memk = mem + pos_ref[0].astype(f32)           # memory + pos (reused by 3 cross-attns)
    T = tpos.shape[0]

    # ---------------- entity branch ----------------
    q_ent = ent + epos
    ent1, _ = mha(_SELF_ENT, q_ent, q_ent, ent, ent, q_is_k=True)
    ent2, _ = mha(_CROSS_ENT, ent1 + epos, memk, mem, ent1)
    ent3 = ffn(_FFN_ENT, ent2)

    # ---------------- triplet (subject / object) branch ----------------
    sub = trip[:, :E]
    obj = trip[:, E:]
    q_so = jnp.concatenate([sub + tpos + sopos[0:1],
                            obj + tpos + sopos[1:2]], axis=0)        # (2T, E)
    t_so = jnp.concatenate([sub, obj], axis=0)
    so1, _ = mha(_SELF_SO, q_so, q_so, t_so, t_so, q_is_k=True)
    sub1 = so1[:T]
    obj1 = so1[T:]

    sub2, sub_maps = mha(_CROSS_SUB, sub1 + tpos, memk, mem, sub1, need_maps=True)
    sub3, _ = mha(_CROSS_SUB_ENT, sub2 + tpos, ent3, ent3, sub2, k_is_v=True)
    sub4 = ffn(_FFN_SUB, sub3)

    obj2, obj_maps = mha(_CROSS_OBJ, obj1 + tpos, memk, mem, obj1, need_maps=True)
    obj3, _ = mha(_CROSS_OBJ_ENT, obj2 + tpos, ent3, ent3, obj2, k_is_v=True)
    obj4 = ffn(_FFN_OBJ, obj3)

    out_ent_ref[0] = ent3.astype(out_ent_ref.dtype)
    out_trip_ref[0] = jnp.concatenate([sub4, obj4], axis=-1).astype(out_trip_ref.dtype)
    sub_maps_ref[0] = sub_maps.astype(sub_maps_ref.dtype)
    obj_maps_ref[0] = obj_maps.astype(obj_maps_ref.dtype)


# ----------------------------------------------------------------------------
# Wrapper: one pallas_call for the whole layer (grid over batch only)
# ----------------------------------------------------------------------------

def decoder_layer_forward(packed, nhead, tgt_entity, tgt_triplet, entity_pos,
                          triplet_pos, so_pos, memory, pos, eps=1e-5):
    Le, N, E = tgt_entity.shape
    T = tgt_triplet.shape[0]
    S = memory.shape[0]
    F = packed["ffn_w1"].shape[-1]

    # seq-first -> batch-first layout plumbing (only data movement outside kernel)
    bf = lambda x: jnp.transpose(x, (1, 0, 2))
    ent, epos = bf(tgt_entity), bf(entity_pos)
    trip, tpos = bf(tgt_triplet), bf(triplet_pos)
    mem, posb = bf(memory), bf(pos)
    sopos = so_pos.reshape(2, E)

    kernel = functools.partial(_decoder_layer_kernel, nhead=nhead, eps=eps)

    def act_spec(shape):
        return pl.BlockSpec((1,) + shape, lambda b: (b, 0, 0))

    in_specs = [
        act_spec((Le, E)),                                  # tgt_entity
        act_spec((Le, E)),                                  # entity_pos
        act_spec((T, 2 * E)),                               # tgt_triplet
        act_spec((T, E)),                                   # triplet_pos
        pl.BlockSpec((2, E), lambda b: (0, 0)),             # so_pos (shared)
        act_spec((S, E)),                                   # memory
        act_spec((S, E)),                                   # pos
        pl.BlockSpec((7, E, 3 * E), lambda b: (0, 0, 0)),   # MHA W_in (packed q|k|v)
        pl.BlockSpec((7, E, E), lambda b: (0, 0, 0)),       # MHA W_out
        pl.BlockSpec((7, 6, E), lambda b: (0, 0, 0)),       # MHA biases + LN slab
        pl.BlockSpec((3, E, F), lambda b: (0, 0, 0)),       # FFN W1
        pl.BlockSpec((3, F, E), lambda b: (0, 0, 0)),       # FFN W2
        pl.BlockSpec((3, 4, F), lambda b: (0, 0, 0)),       # FFN biases + LN slab
    ]
    out_specs = [
        act_spec((Le, E)),
        act_spec((T, 2 * E)),
        act_spec((T, S)),
        act_spec((T, S)),
    ]
    out_shape = [
        jax.ShapeDtypeStruct((N, Le, E), tgt_entity.dtype),
        jax.ShapeDtypeStruct((N, T, 2 * E), tgt_triplet.dtype),
        jax.ShapeDtypeStruct((N, T, S), jnp.float32),
        jax.ShapeDtypeStruct((N, T, S), jnp.float32),
    ]

    out_ent_b, out_trip_b, sub_maps, obj_maps = pl.pallas_call(
        kernel,
        grid=(N,),
        in_specs=in_specs,
        out_specs=out_specs,
        out_shape=out_shape,
        compiler_params=pltpu.CompilerParams(
            dimension_semantics=("parallel",)),
    )(ent, epos, trip, tpos, sopos, mem, posb,
      packed["mha_w_in"], packed["mha_w_out"], packed["mha_vec"],
      packed["ffn_w1"], packed["ffn_w2"], packed["ffn_vec"])

    return (jnp.transpose(out_ent_b, (1, 0, 2)),
            jnp.transpose(out_trip_b, (1, 0, 2)),
            sub_maps, obj_maps)


# ----------------------------------------------------------------------------
# Parameter init (PyTorch layout) and one-time packing for the fused kernel
# ----------------------------------------------------------------------------

def init_mha(key, E):
    k1, k2, k3, k4 = jax.random.split(key, 4)
    return {
        "in_w": 0.05 * jax.random.normal(k1, (3 * E, E), jnp.float32),
        "in_b": 0.05 * jax.random.normal(k2, (3 * E,), jnp.float32),
        "out_w": 0.05 * jax.random.normal(k3, (E, E), jnp.float32),
        "out_b": 0.05 * jax.random.normal(k4, (E,), jnp.float32),
    }


def init_ln(E):
    return {"g": jnp.ones((E,), jnp.float32), "b": jnp.zeros((E,), jnp.float32)}


def init_ffn(key, E, F):
    k1, k2, k3, k4 = jax.random.split(key, 4)
    return {
        "w1": 0.05 * jax.random.normal(k1, (F, E), jnp.float32),
        "b1": 0.05 * jax.random.normal(k2, (F,), jnp.float32),
        "w2": 0.05 * jax.random.normal(k3, (E, F), jnp.float32),
        "b2": 0.05 * jax.random.normal(k4, (E,), jnp.float32),
        "ln_g": jnp.ones((E,), jnp.float32),
        "ln_b": jnp.zeros((E,), jnp.float32),
    }


def init_params(key, d_model, dim_feedforward):
    mha_names = ["self_attn_entity", "cross_attn_entity", "self_attn_so",
                 "cross_attn_sub", "cross_sub_entity", "cross_attn_obj",
                 "cross_obj_entity"]
    keys = jax.random.split(key, len(mha_names) + 3)
    params = {n: init_mha(k, d_model) for n, k in zip(mha_names, keys[:7])}
    for n in ["norm1_entity", "norm2_entity", "norm1_sub", "norm2_sub",
              "norm1_obj", "norm2_obj", "norm2_so"]:
        params[n] = init_ln(d_model)
    params["ffn_entity"] = init_ffn(keys[7], d_model, dim_feedforward)
    params["ffn_sub"] = init_ffn(keys[8], d_model, dim_feedforward)
    params["ffn_obj"] = init_ffn(keys[9], d_model, dim_feedforward)
    return params


def pack_params(raw, d_model, dim_feedforward):
    """Pre-transpose / stack weights ONCE into a few slabs for the fused kernel."""
    E, F = d_model, dim_feedforward
    assert F >= E
    pairs = [("self_attn_entity", "norm2_entity"),
             ("cross_attn_entity", "norm1_entity"),
             ("self_attn_so", "norm2_so"),
             ("cross_attn_sub", "norm1_sub"),
             ("cross_sub_entity", "norm2_sub"),
             ("cross_attn_obj", "norm1_obj"),
             ("cross_obj_entity", "norm2_obj")]
    mha_w_in = jnp.stack([raw[m]["in_w"].T for m, _ in pairs])          # (7, E, 3E)
    mha_w_out = jnp.stack([raw[m]["out_w"].T for m, _ in pairs])        # (7, E, E)
    mha_vec = jnp.stack([
        jnp.concatenate([raw[m]["in_b"].reshape(3, E),
                         raw[m]["out_b"].reshape(1, E),
                         raw[ln]["g"].reshape(1, E),
                         raw[ln]["b"].reshape(1, E)], axis=0)
        for m, ln in pairs])                                            # (7, 6, E)

    ffns = ["ffn_entity", "ffn_sub", "ffn_obj"]
    ffn_w1 = jnp.stack([raw[f]["w1"].T for f in ffns])                  # (3, E, F)
    ffn_w2 = jnp.stack([raw[f]["w2"].T for f in ffns])                  # (3, F, E)
    padE = lambda v: jnp.pad(v.reshape(1, E), ((0, 0), (0, F - E)))
    ffn_vec = jnp.stack([
        jnp.concatenate([raw[f]["b1"].reshape(1, F),
                         padE(raw[f]["b2"]),
                         padE(raw[f]["ln_g"]),
                         padE(raw[f]["ln_b"])], axis=0)
        for f in ffns])                                                 # (3, 4, F)
    return {"mha_w_in": mha_w_in, "mha_w_out": mha_w_out, "mha_vec": mha_vec,
            "ffn_w1": ffn_w1, "ffn_w2": ffn_w2, "ffn_vec": ffn_vec}


# ----------------------------------------------------------------------------
# main
# ----------------------------------------------------------------------------

if __name__ == "__main__":
    d_model = 32
    nhead = 4
    dim_feedforward = 64
    num_entity = 8      # entity query length
    t_num = 6           # triplet query length
    N = 2               # batch
    S = 16              # encoder memory length

    root = jax.random.PRNGKey(0)
    kp, k1, k2, k3, k4, k5, k6, k7 = jax.random.split(root, 8)

    raw_params = init_params(kp, d_model, dim_feedforward)
    packed = pack_params(raw_params, d_model, dim_feedforward)

    tgt_entity = jax.random.normal(k1, (num_entity, N, d_model), jnp.float32)
    tgt_triplet = jax.random.normal(k2, (t_num, N, 2 * d_model), jnp.float32)
    entity_pos = jax.random.normal(k3, (num_entity, N, d_model), jnp.float32)
    triplet_pos = jax.random.normal(k4, (t_num, N, d_model), jnp.float32)
    so_pos = jax.random.normal(k5, (2, 1, 1, d_model), jnp.float32)
    memory = jax.random.normal(k6, (S, N, d_model), jnp.float32)
    pos = jax.random.normal(k7, (S, N, d_model), jnp.float32)

    fwd = jax.jit(functools.partial(decoder_layer_forward, packed, nhead))
    out_entity, out_triplet, sub_maps, obj_maps = fwd(
        tgt_entity, tgt_triplet, entity_pos, triplet_pos, so_pos, memory, pos)
    jax.block_until_ready((out_entity, out_triplet, sub_maps, obj_maps))

    assert out_entity.shape == (num_entity, N, d_model)
    assert out_triplet.shape == (t_num, N, 2 * d_model)
    assert sub_maps.shape == (N, t_num, S)
    assert obj_maps.shape == (N, t_num, S)
    assert bool(jnp.isfinite(out_entity).all())
    assert bool(jnp.isfinite(out_triplet).all())
    # Attention maps are softmax probabilities -> rows sum to ~1.
    assert bool(jnp.all(jnp.abs(jnp.sum(sub_maps, axis=-1) - 1.0) < 5e-2))
    assert bool(jnp.all(jnp.abs(jnp.sum(obj_maps, axis=-1) - 1.0) < 5e-2))

    print("KERNEL_OK")
</pallas_src>

<mosaic_0001>
module attributes {stable_mosaic.version = 11 : i64} {
  func.func @_decoder_layer_kernel(%arg0: i32, %arg1: memref<1x8x32xf32, #tpu.memory_space<vmem>>, %arg2: memref<1x8x32xf32, #tpu.memory_space<vmem>>, %arg3: memref<1x6x64xf32, #tpu.memory_space<vmem>>, %arg4: memref<1x6x32xf32, #tpu.memory_space<vmem>>, %arg5: memref<2x32xf32, #tpu.memory_space<vmem>>, %arg6: memref<1x16x32xf32, #tpu.memory_space<vmem>>, %arg7: memref<1x16x32xf32, #tpu.memory_space<vmem>>, %arg8: memref<7x32x96xf32, #tpu.memory_space<vmem>>, %arg9: memref<7x32x32xf32, #tpu.memory_space<vmem>>, %arg10: memref<7x6x32xf32, #tpu.memory_space<vmem>>, %arg11: memref<3x32x64xf32, #tpu.memory_space<vmem>>, %arg12: memref<3x64x32xf32, #tpu.memory_space<vmem>>, %arg13: memref<3x4x64xf32, #tpu.memory_space<vmem>>, %arg14: memref<1x8x32xf32, #tpu.memory_space<vmem>>, %arg15: memref<1x6x64xf32, #tpu.memory_space<vmem>>, %arg16: memref<1x6x16xf32, #tpu.memory_space<vmem>>, %arg17: memref<1x6x16xf32, #tpu.memory_space<vmem>>) attributes {dimension_semantics = [#tpu.dimension_semantics<parallel>], iteration_bounds = array<i64: 2>, scalar_prefetch = 0 : i64, scratch_operands = 0 : i64, tpu.core_type = #tpu.core_type<tc>, window_params = [{transform_indices = @transform_0, window_bounds = array<i64: 1, 8, 32>}, {transform_indices = @transform_1, window_bounds = array<i64: 1, 8, 32>}, {transform_indices = @transform_2, window_bounds = array<i64: 1, 6, 64>}, {transform_indices = @transform_3, window_bounds = array<i64: 1, 6, 32>}, {pipeline_mode = #tpu.pipeline_mode<synchronous>, transform_indices = @transform_4, window_bounds = array<i64: 2, 32>}, {transform_indices = @transform_5, window_bounds = array<i64: 1, 16, 32>}, {transform_indices = @transform_6, window_bounds = array<i64: 1, 16, 32>}, {pipeline_mode = #tpu.pipeline_mode<synchronous>, transform_indices = @transform_7, window_bounds = array<i64: 7, 32, 96>}, {pipeline_mode = #tpu.pipeline_mode<synchronous>, transform_indices = @transform_8, window_bounds = array<i64: 7, 32, 32>}, {pipeline_mode = #tpu.pipeline_mode<synchronous>, transform_indices = @transform_9, window_bounds = array<i64: 7, 6, 32>}, {pipeline_mode = #tpu.pipeline_mode<synchronous>, transform_indices = @transform_10, window_bounds = array<i64: 3, 32, 64>}, {pipeline_mode = #tpu.pipeline_mode<synchronous>, transform_indices = @transform_11, window_bounds = array<i64: 3, 64, 32>}, {pipeline_mode = #tpu.pipeline_mode<synchronous>, transform_indices = @transform_12, window_bounds = array<i64: 3, 4, 64>}, {transform_indices = @transform_13, window_bounds = array<i64: 1, 8, 32>}, {transform_indices = @transform_14, window_bounds = array<i64: 1, 6, 64>}, {transform_indices = @transform_15, window_bounds = array<i64: 1, 6, 16>}, {transform_indices = @transform_16, window_bounds = array<i64: 1, 6, 16>}]} {
    %c0 = arith.constant 0 : index
    %c0_0 = arith.constant 0 : index
    %c0_1 = arith.constant 0 : index
    %0 = vector.load %arg1[%c0, %c0_0, %c0_1] : memref<1x8x32xf32, #tpu.memory_space<vmem>>, vector<1x8x32xf32>
    %1 = vector.shape_cast %0 : vector<1x8x32xf32> to vector<8x32xf32>
    %c0_2 = arith.constant 0 : index
    %c0_3 = arith.constant 0 : index
    %c0_4 = arith.constant 0 : index
    %2 = vector.load %arg2[%c0_2, %c0_3, %c0_4] : memref<1x8x32xf32, #tpu.memory_space<vmem>>, vector<1x8x32xf32>
    %3 = vector.shape_cast %2 : vector<1x8x32xf32> to vector<8x32xf32>
    %c0_5 = arith.constant 0 : index
    %c0_6 = arith.constant 0 : index
    %c0_7 = arith.constant 0 : index
    %4 = vector.load %arg3[%c0_5, %c0_6, %c0_7] : memref<1x6x64xf32, #tpu.memory_space<vmem>>, vector<1x6x64xf32>
    %5 = vector.shape_cast %4 : vector<1x6x64xf32> to vector<6x64xf32>
    %c0_8 = arith.constant 0 : index
    %c0_9 = arith.constant 0 : index
    %c0_10 = arith.constant 0 : index
    %6 = vector.load %arg4[%c0_8, %c0_9, %c0_10] : memref<1x6x32xf32, #tpu.memory_space<vmem>>, vector<1x6x32xf32>
    %7 = vector.shape_cast %6 : vector<1x6x32xf32> to vector<6x32xf32>
    %c0_11 = arith.constant 0 : index
    %c0_12 = arith.constant 0 : index
    %8 = vector.load %arg5[%c0_11, %c0_12] : memref<2x32xf32, #tpu.memory_space<vmem>>, vector<2x32xf32>
    %c0_13 = arith.constant 0 : index
    %c0_14 = arith.constant 0 : index
    %c0_15 = arith.constant 0 : index
    %9 = vector.load %arg6[%c0_13, %c0_14, %c0_15] : memref<1x16x32xf32, #tpu.memory_space<vmem>>, vector<1x16x32xf32>
    %10 = vector.shape_cast %9 : vector<1x16x32xf32> to vector<16x32xf32>
    %c0_16 = arith.constant 0 : index
    %c0_17 = arith.constant 0 : index
    %c0_18 = arith.constant 0 : index
    %11 = vector.load %arg7[%c0_16, %c0_17, %c0_18] : memref<1x16x32xf32, #tpu.memory_space<vmem>>, vector<1x16x32xf32>
    %12 = vector.shape_cast %11 : vector<1x16x32xf32> to vector<16x32xf32>
    %13 = arith.addf %10, %12 : vector<16x32xf32>
    %14 = arith.addf %1, %3 : vector<8x32xf32>
    %c0_19 = arith.constant 0 : index
    %c0_20 = arith.constant 0 : index
    %c0_21 = arith.constant 0 : index
    %15 = vector.load %arg8[%c0_19, %c0_20, %c0_21] : memref<7x32x96xf32, #tpu.memory_space<vmem>>, vector<1x32x96xf32>
    %16 = vector.shape_cast %15 : vector<1x32x96xf32> to vector<32x96xf32>
    %c0_22 = arith.constant 0 : index
    %c0_23 = arith.constant 0 : index
    %c0_24 = arith.constant 0 : index
    %17 = vector.load %arg9[%c0_22, %c0_23, %c0_24] : memref<7x32x32xf32, #tpu.memory_space<vmem>>, vector<1x32x32xf32>
    %18 = vector.shape_cast %17 : vector<1x32x32xf32> to vector<32x32xf32>
    %c0_25 = arith.constant 0 : index
    %c0_26 = arith.constant 0 : index
    %c0_27 = arith.constant 0 : index
    %19 = vector.load %arg10[%c0_25, %c0_26, %c0_27] : memref<7x6x32xf32, #tpu.memory_space<vmem>>, vector<1x6x32xf32>
    %20 = vector.shape_cast %19 : vector<1x6x32xf32> to vector<6x32xf32>
    %21 = vector.extract_strided_slice %16 {offsets = [0, 0], sizes = [32, 64], strides = [1, 1]} : vector<32x96xf32> to vector<32x64xf32>
    %cst = arith.constant dense<0.000000e+00> : vector<8x64xf32>
    %22 = tpu.matmul %14, %21, %cst {dimension_numbers = #tpu.dot_dimension_numbers<[1], [0], [0], [1], [0, 0, 1, 1], [], []>} : vector<8x32xf32>, vector<32x64xf32>, vector<8x64xf32> -> vector<8x64xf32>
    %23 = vector.extract_strided_slice %22 {offsets = [0, 0], sizes = [8, 32], strides = [1, 1]} : vector<8x64xf32> to vector<8x32xf32>
    %24 = vector.extract_strided_slice %20 {offsets = [0, 0], sizes = [1, 32], strides = [1, 1]} : vector<6x32xf32> to vector<1x32xf32>
    %25 = vector.broadcast %24 : vector<1x32xf32> to vector<8x32xf32>
    %26 = arith.addf %23, %25 : vector<8x32xf32>
    %27 = vector.extract_strided_slice %22 {offsets = [0, 32], sizes = [8, 32], strides = [1, 1]} : vector<8x64xf32> to vector<8x32xf32>
    %28 = vector.extract_strided_slice %20 {offsets = [1, 0], sizes = [1, 32], strides = [1, 1]} : vector<6x32xf32> to vector<1x32xf32>
    %29 = vector.broadcast %28 : vector<1x32xf32> to vector<8x32xf32>
    %30 = arith.addf %27, %29 : vector<8x32xf32>
    %31 = vector.extract_strided_slice %16 {offsets = [0, 64], sizes = [32, 32], strides = [1, 1]} : vector<32x96xf32> to vector<32x32xf32>
    %cst_28 = arith.constant dense<0.000000e+00> : vector<8x32xf32>
    %32 = tpu.matmul %1, %31, %cst_28 {dimension_numbers = #tpu.dot_dimension_numbers<[1], [0], [0], [1], [0, 0, 1, 1], [], []>} : vector<8x32xf32>, vector<32x32xf32>, vector<8x32xf32> -> vector<8x32xf32>
    %33 = vector.extract_strided_slice %20 {offsets = [2, 0], sizes = [1, 32], strides = [1, 1]} : vector<6x32xf32> to vector<1x32xf32>
    %34 = vector.broadcast %33 : vector<1x32xf32> to vector<8x32xf32>
    %35 = arith.addf %32, %34 : vector<8x32xf32>
    %36 = tpu.iota {dimensions = array<i32: 1>} : vector<8x32xi32>
    %c0_i32 = arith.constant 0 : i32
    %37 = vector.broadcast %c0_i32 : i32 to vector<8x32xi32>
    %38 = arith.cmpi sge, %36, %37 : vector<8x32xi32>
    %c8_i32 = arith.constant 8 : i32
    %39 = vector.broadcast %c8_i32 : i32 to vector<8x32xi32>
    %40 = arith.cmpi slt, %36, %39 : vector<8x32xi32>
    %41 = arith.andi %38, %40 : vector<8x32xi1>
    %42 = arith.extui %41 : vector<8x32xi1> to vector<8x32xi32>
    %43 = arith.sitofp %42 : vector<8x32xi32> to vector<8x32xf32>
    %c8_i32_29 = arith.constant 8 : i32
    %44 = vector.broadcast %c8_i32_29 : i32 to vector<8x32xi32>
    %45 = arith.cmpi sge, %36, %44 : vector<8x32xi32>
    %c16_i32 = arith.constant 16 : i32
    %46 = vector.broadcast %c16_i32 : i32 to vector<8x32xi32>
    %47 = arith.cmpi slt, %36, %46 : vector<8x32xi32>
    %48 = arith.andi %45, %47 : vector<8x32xi1>
    %49 = arith.extui %48 : vector<8x32xi1> to vector<8x32xi32>
    %50 = arith.sitofp %49 : vector<8x32xi32> to vector<8x32xf32>
    %c16_i32_30 = arith.constant 16 : i32
    %51 = vector.broadcast %c16_i32_30 : i32 to vector<8x32xi32>
    %52 = arith.cmpi sge, %36, %51 : vector<8x32xi32>
    %c24_i32 = arith.constant 24 : i32
    %53 = vector.broadcast %c24_i32 : i32 to vector<8x32xi32>
    %54 = arith.cmpi slt, %36, %53 : vector<8x32xi32>
    %55 = arith.andi %52, %54 : vector<8x32xi1>
    %56 = arith.extui %55 : vector<8x32xi1> to vector<8x32xi32>
    %57 = arith.sitofp %56 : vector<8x32xi32> to vector<8x32xf32>
    %c24_i32_31 = arith.constant 24 : i32
    %58 = vector.broadcast %c24_i32_31 : i32 to vector<8x32xi32>
    %59 = arith.cmpi sge, %36, %58 : vector<8x32xi32>
    %c32_i32 = arith.constant 32 : i32
    %60 = vector.broadcast %c32_i32 : i32 to vector<8x32xi32>
    %61 = arith.cmpi slt, %36, %60 : vector<8x32xi32>
    %62 = arith.andi %59, %61 : vector<8x32xi1>
    %63 = arith.extui %62 : vector<8x32xi1> to vector<8x32xi32>
    %64 = arith.sitofp %63 : vector<8x32xi32> to vector<8x32xf32>
    %65 = tpu.concatenate %43, %50, %57, %64 in 0 : vector<8x32xf32>, vector<8x32xf32>, vector<8x32xf32>, vector<8x32xf32> -> vector<32x32xf32>
    %66 = tpu.iota {dimensions = array<i32: 0>} : vector<8x8xi32>
    %67 = tpu.iota {dimensions = array<i32: 1>} : vector<8x8xi32>
    %68 = arith.cmpi eq, %66, %67 : vector<8x8xi32>
    %69 = arith.extui %68 : vector<8x8xi1> to vector<8x8xi32>
    %70 = arith.sitofp %69 : vector<8x8xi32> to vector<8x8xf32>
    %71 = tpu.concatenate %70, %70, %70, %70 in 1 : vector<8x8xf32>, vector<8x8xf32>, vector<8x8xf32>, vector<8x8xf32> -> vector<8x32xf32>
    %72 = tpu.concatenate %26, %26, %26, %26 in 0 : vector<8x32xf32>, vector<8x32xf32>, vector<8x32xf32>, vector<8x32xf32> -> vector<32x32xf32>
    %73 = arith.mulf %72, %65 : vector<32x32xf32>
    %cst_32 = arith.constant dense<0.000000e+00> : vector<32x8xf32>
    %74 = tpu.matmul %73, %30, %cst_32 {dimension_numbers = #tpu.dot_dimension_numbers<[1], [1], [0], [0], [0, 0, 1, 0], [], []>} : vector<32x32xf32>, vector<8x32xf32>, vector<32x8xf32> -> vector<32x8xf32>
    %cst_33 = arith.constant 0.353553385 : f32
    %75 = vector.broadcast %cst_33 : f32 to vector<32x8xf32>
    %76 = arith.mulf %74, %75 : vector<32x8xf32>
    %cst_34 = arith.constant dense<0xFF800000> : vector<32xf32>
    %77 = vector.multi_reduction <maximumf>, %76, %cst_34 [1] : vector<32x8xf32> to vector<32xf32>
    %78 = vector.shape_cast %77 : vector<32xf32> to vector<32x1xf32>
    %79 = vector.broadcast %78 : vector<32x1xf32> to vector<32x8xf32>
    %80 = arith.subf %76, %79 : vector<32x8xf32>
    %81 = math.exp %80 : vector<32x8xf32>
    %cst_35 = arith.constant dense<0.000000e+00> : vector<32xf32>
    %82 = vector.multi_reduction <add>, %81, %cst_35 [1] : vector<32x8xf32> to vector<32xf32>
    %83 = vector.shape_cast %82 : vector<32xf32> to vector<32x1xf32>
    %84 = tpu.reciprocal %83 {approx = true} : vector<32x1xf32> -> vector<32x1xf32>
    %85 = vector.broadcast %84 : vector<32x1xf32> to vector<32x8xf32>
    %86 = arith.mulf %81, %85 : vector<32x8xf32>
    %cst_36 = arith.constant dense<0.000000e+00> : vector<32x32xf32>
    %87 = tpu.matmul %86, %35, %cst_36 {dimension_numbers = #tpu.dot_dimension_numbers<[1], [0], [0], [1], [0, 0, 1, 1], [], []>} : vector<32x8xf32>, vector<8x32xf32>, vector<32x32xf32> -> vector<32x32xf32>
    %88 = arith.mulf %87, %65 : vector<32x32xf32>
    %cst_37 = arith.constant dense<0.000000e+00> : vector<8x32xf32>
    %89 = tpu.matmul %71, %88, %cst_37 {dimension_numbers = #tpu.dot_dimension_numbers<[1], [0], [0], [1], [0, 0, 1, 1], [], []>} : vector<8x32xf32>, vector<32x32xf32>, vector<8x32xf32> -> vector<8x32xf32>
    %cst_38 = arith.constant dense<0.000000e+00> : vector<8x32xf32>
    %90 = tpu.matmul %89, %18, %cst_38 {dimension_numbers = #tpu.dot_dimension_numbers<[1], [0], [0], [1], [0, 0, 1, 1], [], []>} : vector<8x32xf32>, vector<32x32xf32>, vector<8x32xf32> -> vector<8x32xf32>
    %91 = vector.extract_strided_slice %20 {offsets = [3, 0], sizes = [1, 32], strides = [1, 1]} : vector<6x32xf32> to vector<1x32xf32>
    %92 = vector.broadcast %91 : vector<1x32xf32> to vector<8x32xf32>
    %93 = arith.addf %90, %92 : vector<8x32xf32>
    %94 = arith.addf %1, %93 : vector<8x32xf32>
    %95 = vector.extract_strided_slice %20 {offsets = [4, 0], sizes = [1, 32], strides = [1, 1]} : vector<6x32xf32> to vector<1x32xf32>
    %96 = vector.extract_strided_slice %20 {offsets = [5, 0], sizes = [1, 32], strides = [1, 1]} : vector<6x32xf32> to vector<1x32xf32>
    %cst_39 = arith.constant dense<0.000000e+00> : vector<8xf32>
    %97 = vector.multi_reduction <add>, %94, %cst_39 [1] : vector<8x32xf32> to vector<8xf32>
    %98 = vector.shape_cast %97 : vector<8xf32> to vector<8x1xf32>
    %cst_40 = arith.constant 3.200000e+01 : f32
    %99 = vector.broadcast %cst_40 : f32 to vector<8x1xf32>
    %100 = arith.divf %98, %99 : vector<8x1xf32>
    %101 = vector.broadcast %100 : vector<8x1xf32> to vector<8x32xf32>
    %102 = arith.subf %94, %101 : vector<8x32xf32>
    %103 = arith.mulf %102, %102 : vector<8x32xf32>
    %cst_41 = arith.constant dense<0.000000e+00> : vector<8xf32>
    %104 = vector.multi_reduction <add>, %103, %cst_41 [1] : vector<8x32xf32> to vector<8xf32>
    %105 = vector.shape_cast %104 : vector<8xf32> to vector<8x1xf32>
    %cst_42 = arith.constant 3.200000e+01 : f32
    %106 = vector.broadcast %cst_42 : f32 to vector<8x1xf32>
    %107 = arith.divf %105, %106 : vector<8x1xf32>
    %cst_43 = arith.constant 9.99999974E-6 : f32
    %108 = vector.broadcast %cst_43 : f32 to vector<8x1xf32>
    %109 = arith.addf %107, %108 : vector<8x1xf32>
    %110 = math.rsqrt %109 : vector<8x1xf32>
    %111 = vector.broadcast %110 : vector<8x1xf32> to vector<8x32xf32>
    %112 = arith.mulf %102, %111 : vector<8x32xf32>
    %113 = vector.broadcast %95 : vector<1x32xf32> to vector<8x32xf32>
    %114 = arith.mulf %112, %113 : vector<8x32xf32>
    %115 = vector.broadcast %96 : vector<1x32xf32> to vector<8x32xf32>
    %116 = arith.addf %114, %115 : vector<8x32xf32>
    %117 = arith.addf %116, %3 : vector<8x32xf32>
    %c1 = arith.constant 1 : index
    %c0_44 = arith.constant 0 : index
    %c0_45 = arith.constant 0 : index
    %118 = vector.load %arg8[%c1, %c0_44, %c0_45] : memref<7x32x96xf32, #tpu.memory_space<vmem>>, vector<1x32x96xf32>
    %119 = vector.shape_cast %118 : vector<1x32x96xf32> to vector<32x96xf32>
    %c1_46 = arith.constant 1 : index
    %c0_47 = arith.constant 0 : index
    %c0_48 = arith.constant 0 : index
    %120 = vector.load %arg9[%c1_46, %c0_47, %c0_48] : memref<7x32x32xf32, #tpu.memory_space<vmem>>, vector<1x32x32xf32>
    %121 = vector.shape_cast %120 : vector<1x32x32xf32> to vector<32x32xf32>
    %c1_49 = arith.constant 1 : index
    %c0_50 = arith.constant 0 : index
    %c0_51 = arith.constant 0 : index
    %122 = vector.load %arg10[%c1_49, %c0_50, %c0_51] : memref<7x6x32xf32, #tpu.memory_space<vmem>>, vector<1x6x32xf32>
    %123 = vector.shape_cast %122 : vector<1x6x32xf32> to vector<6x32xf32>
    %124 = vector.extract_strided_slice %119 {offsets = [0, 0], sizes = [32, 32], strides = [1, 1]} : vector<32x96xf32> to vector<32x32xf32>
    %cst_52 = arith.constant dense<0.000000e+00> : vector<8x32xf32>
    %125 = tpu.matmul %117, %124, %cst_52 {dimension_numbers = #tpu.dot_dimension_numbers<[1], [0], [0], [1], [0, 0, 1, 1], [], []>} : vector<8x32xf32>, vector<32x32xf32>, vector<8x32xf32> -> vector<8x32xf32>
    %126 = vector.extract_strided_slice %123 {offsets = [0, 0], sizes = [1, 32], strides = [1, 1]} : vector<6x32xf32> to vector<1x32xf32>
    %127 = vector.broadcast %126 : vector<1x32xf32> to vector<8x32xf32>
    %128 = arith.addf %125, %127 : vector<8x32xf32>
    %129 = vector.extract_strided_slice %119 {offsets = [0, 32], sizes = [32, 32], strides = [1, 1]} : vector<32x96xf32> to vector<32x32xf32>
    %cst_53 = arith.constant dense<0.000000e+00> : vector<16x32xf32>
    %130 = tpu.matmul %13, %129, %cst_53 {dimension_numbers = #tpu.dot_dimension_numbers<[1], [0], [0], [1], [0, 0, 1, 1], [], []>} : vector<16x32xf32>, vector<32x32xf32>, vector<16x32xf32> -> vector<16x32xf32>
    %131 = vector.extract_strided_slice %123 {offsets = [1, 0], sizes = [1, 32], strides = [1, 1]} : vector<6x32xf32> to vector<1x32xf32>
    %132 = vector.broadcast %131 : vector<1x32xf32> to vector<16x32xf32>
    %133 = arith.addf %130, %132 : vector<16x32xf32>
    %134 = vector.extract_strided_slice %119 {offsets = [0, 64], sizes = [32, 32], strides = [1, 1]} : vector<32x96xf32> to vector<32x32xf32>
    %cst_54 = arith.constant dense<0.000000e+00> : vector<16x32xf32>
    %135 = tpu.matmul %10, %134, %cst_54 {dimension_numbers = #tpu.dot_dimension_numbers<[1], [0], [0], [1], [0, 0, 1, 1], [], []>} : vector<16x32xf32>, vector<32x32xf32>, vector<16x32xf32> -> vector<16x32xf32>
    %136 = vector.extract_strided_slice %123 {offsets = [2, 0], sizes = [1, 32], strides = [1, 1]} : vector<6x32xf32> to vector<1x32xf32>
    %137 = vector.broadcast %136 : vector<1x32xf32> to vector<16x32xf32>
    %138 = arith.addf %135, %137 : vector<16x32xf32>
    %139 = tpu.concatenate %128, %128, %128, %128 in 0 : vector<8x32xf32>, vector<8x32xf32>, vector<8x32xf32>, vector<8x32xf32> -> vector<32x32xf32>
    %140 = arith.mulf %139, %65 : vector<32x32xf32>
    %cst_55 = arith.constant dense<0.000000e+00> : vector<32x16xf32>
    %141 = tpu.matmul %140, %133, %cst_55 {dimension_numbers = #tpu.dot_dimension_numbers<[1], [1], [0], [0], [0, 0, 1, 0], [], []>} : vector<32x32xf32>, vector<16x32xf32>, vector<32x16xf32> -> vector<32x16xf32>
    %cst_56 = arith.constant 0.353553385 : f32
    %142 = vector.broadcast %cst_56 : f32 to vector<32x16xf32>
    %143 = arith.mulf %141, %142 : vector<32x16xf32>
    %cst_57 = arith.constant dense<0xFF800000> : vector<32xf32>
    %144 = vector.multi_reduction <maximumf>, %143, %cst_57 [1] : vector<32x16xf32> to vector<32xf32>
    %145 = vector.shape_cast %144 : vector<32xf32> to vector<32x1xf32>
    %146 = vector.broadcast %145 : vector<32x1xf32> to vector<32x16xf32>
    %147 = arith.subf %143, %146 : vector<32x16xf32>
    %148 = math.exp %147 : vector<32x16xf32>
    %cst_58 = arith.constant dense<0.000000e+00> : vector<32xf32>
    %149 = vector.multi_reduction <add>, %148, %cst_58 [1] : vector<32x16xf32> to vector<32xf32>
    %150 = vector.shape_cast %149 : vector<32xf32> to vector<32x1xf32>
    %151 = tpu.reciprocal %150 {approx = true} : vector<32x1xf32> -> vector<32x1xf32>
    %152 = vector.broadcast %151 : vector<32x1xf32> to vector<32x16xf32>
    %153 = arith.mulf %148, %152 : vector<32x16xf32>
    %cst_59 = arith.constant dense<0.000000e+00> : vector<32x32xf32>
    %154 = tpu.matmul %153, %138, %cst_59 {dimension_numbers = #tpu.dot_dimension_numbers<[1], [0], [0], [1], [0, 0, 1, 1], [], []>} : vector<32x16xf32>, vector<16x32xf32>, vector<32x32xf32> -> vector<32x32xf32>
    %155 = arith.mulf %154, %65 : vector<32x32xf32>
    %cst_60 = arith.constant dense<0.000000e+00> : vector<8x32xf32>
    %156 = tpu.matmul %71, %155, %cst_60 {dimension_numbers = #tpu.dot_dimension_numbers<[1], [0], [0], [1], [0, 0, 1, 1], [], []>} : vector<8x32xf32>, vector<32x32xf32>, vector<8x32xf32> -> vector<8x32xf32>
    %cst_61 = arith.constant dense<0.000000e+00> : vector<8x32xf32>
    %157 = tpu.matmul %156, %121, %cst_61 {dimension_numbers = #tpu.dot_dimension_numbers<[1], [0], [0], [1], [0, 0, 1, 1], [], []>} : vector<8x32xf32>, vector<32x32xf32>, vector<8x32xf32> -> vector<8x32xf32>
    %158 = vector.extract_strided_slice %123 {offsets = [3, 0], sizes = [1, 32], strides = [1, 1]} : vector<6x32xf32> to vector<1x32xf32>
    %159 = vector.broadcast %158 : vector<1x32xf32> to vector<8x32xf32>
    %160 = arith.addf %157, %159 : vector<8x32xf32>
    %161 = arith.addf %116, %160 : vector<8x32xf32>
    %162 = vector.extract_strided_slice %123 {offsets = [4, 0], sizes = [1, 32], strides = [1, 1]} : vector<6x32xf32> to vector<1x32xf32>
    %163 = vector.extract_strided_slice %123 {offsets = [5, 0], sizes = [1, 32], strides = [1, 1]} : vector<6x32xf32> to vector<1x32xf32>
    %cst_62 = arith.constant dense<0.000000e+00> : vector<8xf32>
    %164 = vector.multi_reduction <add>, %161, %cst_62 [1] : vector<8x32xf32> to vector<8xf32>
    %165 = vector.shape_cast %164 : vector<8xf32> to vector<8x1xf32>
    %cst_63 = arith.constant 3.200000e+01 : f32
    %166 = vector.broadcast %cst_63 : f32 to vector<8x1xf32>
    %167 = arith.divf %165, %166 : vector<8x1xf32>
    %168 = vector.broadcast %167 : vector<8x1xf32> to vector<8x32xf32>
    %169 = arith.subf %161, %168 : vector<8x32xf32>
    %170 = arith.mulf %169, %169 : vector<8x32xf32>
    %cst_64 = arith.constant dense<0.000000e+00> : vector<8xf32>
    %171 = vector.multi_reduction <add>, %170, %cst_64 [1] : vector<8x32xf32> to vector<8xf32>
    %172 = vector.shape_cast %171 : vector<8xf32> to vector<8x1xf32>
    %cst_65 = arith.constant 3.200000e+01 : f32
    %173 = vector.broadcast %cst_65 : f32 to vector<8x1xf32>
    %174 = arith.divf %172, %173 : vector<8x1xf32>
    %cst_66 = arith.constant 9.99999974E-6 : f32
    %175 = vector.broadcast %cst_66 : f32 to vector<8x1xf32>
    %176 = arith.addf %174, %175 : vector<8x1xf32>
    %177 = math.rsqrt %176 : vector<8x1xf32>
    %178 = vector.broadcast %177 : vector<8x1xf32> to vector<8x32xf32>
    %179 = arith.mulf %169, %178 : vector<8x32xf32>
    %180 = vector.broadcast %162 : vector<1x32xf32> to vector<8x32xf32>
    %181 = arith.mulf %179, %180 : vector<8x32xf32>
    %182 = vector.broadcast %163 : vector<1x32xf32> to vector<8x32xf32>
    %183 = arith.addf %181, %182 : vector<8x32xf32>
    %c0_67 = arith.constant 0 : index
    %c0_68 = arith.constant 0 : index
    %c0_69 = arith.constant 0 : index
    %184 = vector.load %arg11[%c0_67, %c0_68, %c0_69] : memref<3x32x64xf32, #tpu.memory_space<vmem>>, vector<1x32x64xf32>
    %185 = vector.shape_cast %184 : vector<1x32x64xf32> to vector<32x64xf32>
    %c0_70 = arith.constant 0 : index
    %c0_71 = arith.constant 0 : index
    %c0_72 = arith.constant 0 : index
    %186 = vector.load %arg12[%c0_70, %c0_71, %c0_72] : memref<3x64x32xf32, #tpu.memory_space<vmem>>, vector<1x64x32xf32>
    %187 = vector.shape_cast %186 : vector<1x64x32xf32> to vector<64x32xf32>
    %c0_73 = arith.constant 0 : index
    %c0_74 = arith.constant 0 : index
    %c0_75 = arith.constant 0 : index
    %188 = vector.load %arg13[%c0_73, %c0_74, %c0_75] : memref<3x4x64xf32, #tpu.memory_space<vmem>>, vector<1x4x64xf32>
    %189 = vector.shape_cast %188 : vector<1x4x64xf32> to vector<4x64xf32>
    %cst_76 = arith.constant dense<0.000000e+00> : vector<8x64xf32>
    %190 = tpu.matmul %183, %185, %cst_76 {dimension_numbers = #tpu.dot_dimension_numbers<[1], [0], [0], [1], [0, 0, 1, 1], [], []>} : vector<8x32xf32>, vector<32x64xf32>, vector<8x64xf32> -> vector<8x64xf32>
    %191 = vector.extract_strided_slice %189 {offsets = [0, 0], sizes = [1, 64], strides = [1, 1]} : vector<4x64xf32> to vector<1x64xf32>
    %192 = vector.broadcast %191 : vector<1x64xf32> to vector<8x64xf32>
    %193 = arith.addf %190, %192 : vector<8x64xf32>
    %cst_77 = arith.constant 0.000000e+00 : f32
    %194 = vector.broadcast %cst_77 : f32 to vector<8x64xf32>
    %195 = arith.maximumf %193, %194 : vector<8x64xf32>
    %cst_78 = arith.constant dense<0.000000e+00> : vector<8x32xf32>
    %196 = tpu.matmul %195, %187, %cst_78 {dimension_numbers = #tpu.dot_dimension_numbers<[1], [0], [0], [1], [0, 0, 1, 1], [], []>} : vector<8x64xf32>, vector<64x32xf32>, vector<8x32xf32> -> vector<8x32xf32>
    %197 = vector.extract_strided_slice %189 {offsets = [1, 0], sizes = [1, 32], strides = [1, 1]} : vector<4x64xf32> to vector<1x32xf32>
    %198 = vector.broadcast %197 : vector<1x32xf32> to vector<8x32xf32>
    %199 = arith.addf %196, %198 : vector<8x32xf32>
    %200 = arith.addf %183, %199 : vector<8x32xf32>
    %201 = vector.extract_strided_slice %189 {offsets = [2, 0], sizes = [1, 32], strides = [1, 1]} : vector<4x64xf32> to vector<1x32xf32>
    %202 = vector.extract_strided_slice %189 {offsets = [3, 0], sizes = [1, 32], strides = [1, 1]} : vector<4x64xf32> to vector<1x32xf32>
    %cst_79 = arith.constant dense<0.000000e+00> : vector<8xf32>
    %203 = vector.multi_reduction <add>, %200, %cst_79 [1] : vector<8x32xf32> to vector<8xf32>
    %204 = vector.shape_cast %203 : vector<8xf32> to vector<8x1xf32>
    %cst_80 = arith.constant 3.200000e+01 : f32
    %205 = vector.broadcast %cst_80 : f32 to vector<8x1xf32>
    %206 = arith.divf %204, %205 : vector<8x1xf32>
    %207 = vector.broadcast %206 : vector<8x1xf32> to vector<8x32xf32>
    %208 = arith.subf %200, %207 : vector<8x32xf32>
    %209 = arith.mulf %208, %208 : vector<8x32xf32>
    %cst_81 = arith.constant dense<0.000000e+00> : vector<8xf32>
    %210 = vector.multi_reduction <add>, %209, %cst_81 [1] : vector<8x32xf32> to vector<8xf32>
    %211 = vector.shape_cast %210 : vector<8xf32> to vector<8x1xf32>
    %cst_82 = arith.constant 3.200000e+01 : f32
    %212 = vector.broadcast %cst_82 : f32 to vector<8x1xf32>
    %213 = arith.divf %211, %212 : vector<8x1xf32>
    %cst_83 = arith.constant 9.99999974E-6 : f32
    %214 = vector.broadcast %cst_83 : f32 to vector<8x1xf32>
    %215 = arith.addf %213, %214 : vector<8x1xf32>
    %216 = math.rsqrt %215 : vector<8x1xf32>
    %217 = vector.broadcast %216 : vector<8x1xf32> to vector<8x32xf32>
    %218 = arith.mulf %208, %217 : vector<8x32xf32>
    %219 = vector.broadcast %201 : vector<1x32xf32> to vector<8x32xf32>
    %220 = arith.mulf %218, %219 : vector<8x32xf32>
    %221 = vector.broadcast %202 : vector<1x32xf32> to vector<8x32xf32>
    %222 = arith.addf %220, %221 : vector<8x32xf32>
    %223 = vector.extract_strided_slice %5 {offsets = [0, 0], sizes = [6, 32], strides = [1, 1]} : vector<6x64xf32> to vector<6x32xf32>
    %224 = vector.extract_strided_slice %5 {offsets = [0, 32], sizes = [6, 32], strides = [1, 1]} : vector<6x64xf32> to vector<6x32xf32>
    %225 = arith.addf %223, %7 : vector<6x32xf32>
    %226 = vector.extract_strided_slice %8 {offsets = [0, 0], sizes = [1, 32], strides = [1, 1]} : vector<2x32xf32> to vector<1x32xf32>
    %227 = vector.broadcast %226 : vector<1x32xf32> to vector<6x32xf32>
    %228 = arith.addf %225, %227 : vector<6x32xf32>
    %229 = arith.addf %224, %7 : vector<6x32xf32>
    %230 = vector.extract_strided_slice %8 {offsets = [1, 0], sizes = [1, 32], strides = [1, 1]} : vector<2x32xf32> to vector<1x32xf32>
    %231 = vector.broadcast %230 : vector<1x32xf32> to vector<6x32xf32>
    %232 = arith.addf %229, %231 : vector<6x32xf32>
    %233 = tpu.concatenate %228, %232 in 0 : vector<6x32xf32>, vector<6x32xf32> -> vector<12x32xf32>
    %234 = tpu.concatenate %223, %224 in 0 : vector<6x32xf32>, vector<6x32xf32> -> vector<12x32xf32>
    %c2 = arith.constant 2 : index
    %c0_84 = arith.constant 0 : index
    %c0_85 = arith.constant 0 : index
    %235 = vector.load %arg8[%c2, %c0_84, %c0_85] : memref<7x32x96xf32, #tpu.memory_space<vmem>>, vector<1x32x96xf32>
    %236 = vector.shape_cast %235 : vector<1x32x96xf32> to vector<32x96xf32>
    %c2_86 = arith.constant 2 : index
    %c0_87 = arith.constant 0 : index
    %c0_88 = arith.constant 0 : index
    %237 = vector.load %arg9[%c2_86, %c0_87, %c0_88] : memref<7x32x32xf32, #tpu.memory_space<vmem>>, vector<1x32x32xf32>
    %238 = vector.shape_cast %237 : vector<1x32x32xf32> to vector<32x32xf32>
    %c2_89 = arith.constant 2 : index
    %c0_90 = arith.constant 0 : index
    %c0_91 = arith.constant 0 : index
    %239 = vector.load %arg10[%c2_89, %c0_90, %c0_91] : memref<7x6x32xf32, #tpu.memory_space<vmem>>, vector<1x6x32xf32>
    %240 = vector.shape_cast %239 : vector<1x6x32xf32> to vector<6x32xf32>
    %241 = vector.extract_strided_slice %236 {offsets = [0, 0], sizes = [32, 64], strides = [1, 1]} : vector<32x96xf32> to vector<32x64xf32>
    %cst_92 = arith.constant dense<0.000000e+00> : vector<12x64xf32>
    %242 = tpu.matmul %233, %241, %cst_92 {dimension_numbers = #tpu.dot_dimension_numbers<[1], [0], [0], [1], [0, 0, 1, 1], [], []>} : vector<12x32xf32>, vector<32x64xf32>, vector<12x64xf32> -> vector<12x64xf32>
    %243 = vector.extract_strided_slice %242 {offsets = [0, 0], sizes = [12, 32], strides = [1, 1]} : vector<12x64xf32> to vector<12x32xf32>
    %244 = vector.extract_strided_slice %240 {offsets = [0, 0], sizes = [1, 32], strides = [1, 1]} : vector<6x32xf32> to vector<1x32xf32>
    %245 = vector.broadcast %244 : vector<1x32xf32> to vector<12x32xf32>
    %246 = arith.addf %243, %245 : vector<12x32xf32>
    %247 = vector.extract_strided_slice %242 {offsets = [0, 32], sizes = [12, 32], strides = [1, 1]} : vector<12x64xf32> to vector<12x32xf32>
    %248 = vector.extract_strided_slice %240 {offsets = [1, 0], sizes = [1, 32], strides = [1, 1]} : vector<6x32xf32> to vector<1x32xf32>
    %249 = vector.broadcast %248 : vector<1x32xf32> to vector<12x32xf32>
    %250 = arith.addf %247, %249 : vector<12x32xf32>
    %251 = vector.extract_strided_slice %236 {offsets = [0, 64], sizes = [32, 32], strides = [1, 1]} : vector<32x96xf32> to vector<32x32xf32>
    %cst_93 = arith.constant dense<0.000000e+00> : vector<12x32xf32>
    %252 = tpu.matmul %234, %251, %cst_93 {dimension_numbers = #tpu.dot_dimension_numbers<[1], [0], [0], [1], [0, 0, 1, 1], [], []>} : vector<12x32xf32>, vector<32x32xf32>, vector<12x32xf32> -> vector<12x32xf32>
    %253 = vector.extract_strided_slice %240 {offsets = [2, 0], sizes = [1, 32], strides = [1, 1]} : vector<6x32xf32> to vector<1x32xf32>
    %254 = vector.broadcast %253 : vector<1x32xf32> to vector<12x32xf32>
    %255 = arith.addf %252, %254 : vector<12x32xf32>
    %256 = tpu.iota {dimensions = array<i32: 1>} : vector<12x32xi32>
    %c0_i32_94 = arith.constant 0 : i32
    %257 = vector.broadcast %c0_i32_94 : i32 to vector<12x32xi32>
    %258 = arith.cmpi sge, %256, %257 : vector<12x32xi32>
    %c8_i32_95 = arith.constant 8 : i32
    %259 = vector.broadcast %c8_i32_95 : i32 to vector<12x32xi32>
    %260 = arith.cmpi slt, %256, %259 : vector<12x32xi32>
    %261 = arith.andi %258, %260 : vector<12x32xi1>
    %262 = arith.extui %261 : vector<12x32xi1> to vector<12x32xi32>
    %263 = arith.sitofp %262 : vector<12x32xi32> to vector<12x32xf32>
    %c8_i32_96 = arith.constant 8 : i32
    %264 = vector.broadcast %c8_i32_96 : i32 to vector<12x32xi32>
    %265 = arith.cmpi sge, %256, %264 : vector<12x32xi32>
    %c16_i32_97 = arith.constant 16 : i32
    %266 = vector.broadcast %c16_i32_97 : i32 to vector<12x32xi32>
    %267 = arith.cmpi slt, %256, %266 : vector<12x32xi32>
    %268 = arith.andi %265, %267 : vector<12x32xi1>
    %269 = arith.extui %268 : vector<12x32xi1> to vector<12x32xi32>
    %270 = arith.sitofp %269 : vector<12x32xi32> to vector<12x32xf32>
    %c16_i32_98 = arith.constant 16 : i32
    %271 = vector.broadcast %c16_i32_98 : i32 to vector<12x32xi32>
    %272 = arith.cmpi sge, %256, %271 : vector<12x32xi32>
    %c24_i32_99 = arith.constant 24 : i32
    %273 = vector.broadcast %c24_i32_99 : i32 to vector<12x32xi32>
    %274 = arith.cmpi slt, %256, %273 : vector<12x32xi32>
    %275 = arith.andi %272, %274 : vector<12x32xi1>
    %276 = arith.extui %275 : vector<12x32xi1> to vector<12x32xi32>
    %277 = arith.sitofp %276 : vector<12x32xi32> to vector<12x32xf32>
    %c24_i32_100 = arith.constant 24 : i32
    %278 = vector.broadcast %c24_i32_100 : i32 to vector<12x32xi32>
    %279 = arith.cmpi sge, %256, %278 : vector<12x32xi32>
    %c32_i32_101 = arith.constant 32 : i32
    %280 = vector.broadcast %c32_i32_101 : i32 to vector<12x32xi32>
    %281 = arith.cmpi slt, %256, %280 : vector<12x32xi32>
    %282 = arith.andi %279, %281 : vector<12x32xi1>
    %283 = arith.extui %282 : vector<12x32xi1> to vector<12x32xi32>
    %284 = arith.sitofp %283 : vector<12x32xi32> to vector<12x32xf32>
    %285 = tpu.concatenate %263, %270, %277, %284 in 0 : vector<12x32xf32>, vector<12x32xf32>, vector<12x32xf32>, vector<12x32xf32> -> vector<48x32xf32>
    %286 = tpu.iota {dimensions = array<i32: 0>} : vector<12x12xi32>
    %287 = tpu.iota {dimensions = array<i32: 1>} : vector<12x12xi32>
    %288 = arith.cmpi eq, %286, %287 : vector<12x12xi32>
    %289 = arith.extui %288 : vector<12x12xi1> to vector<12x12xi32>
    %290 = arith.sitofp %289 : vector<12x12xi32> to vector<12x12xf32>
    %291 = tpu.concatenate %290, %290, %290, %290 in 1 : vector<12x12xf32>, vector<12x12xf32>, vector<12x12xf32>, vector<12x12xf32> -> vector<12x48xf32>
    %292 = tpu.concatenate %246, %246, %246, %246 in 0 : vector<12x32xf32>, vector<12x32xf32>, vector<12x32xf32>, vector<12x32xf32> -> vector<48x32xf32>
    %293 = arith.mulf %292, %285 : vector<48x32xf32>
    %cst_102 = arith.constant dense<0.000000e+00> : vector<48x12xf32>
    %294 = tpu.matmul %293, %250, %cst_102 {dimension_numbers = #tpu.dot_dimension_numbers<[1], [1], [0], [0], [0, 0, 1, 0], [], []>} : vector<48x32xf32>, vector<12x32xf32>, vector<48x12xf32> -> vector<48x12xf32>
    %cst_103 = arith.constant 0.353553385 : f32
    %295 = vector.broadcast %cst_103 : f32 to vector<48x12xf32>
    %296 = arith.mulf %294, %295 : vector<48x12xf32>
    %cst_104 = arith.constant dense<0xFF800000> : vector<48xf32>
    %297 = vector.multi_reduction <maximumf>, %296, %cst_104 [1] : vector<48x12xf32> to vector<48xf32>
    %298 = vector.shape_cast %297 : vector<48xf32> to vector<48x1xf32>
    %299 = vector.broadcast %298 : vector<48x1xf32> to vector<48x12xf32>
    %300 = arith.subf %296, %299 : vector<48x12xf32>
    %301 = math.exp %300 : vector<48x12xf32>
    %cst_105 = arith.constant dense<0.000000e+00> : vector<48xf32>
    %302 = vector.multi_reduction <add>, %301, %cst_105 [1] : vector<48x12xf32> to vector<48xf32>
    %303 = vector.shape_cast %302 : vector<48xf32> to vector<48x1xf32>
    %304 = tpu.reciprocal %303 {approx = true} : vector<48x1xf32> -> vector<48x1xf32>
    %305 = vector.broadcast %304 : vector<48x1xf32> to vector<48x12xf32>
    %306 = arith.mulf %301, %305 : vector<48x12xf32>
    %cst_106 = arith.constant dense<0.000000e+00> : vector<48x32xf32>
    %307 = tpu.matmul %306, %255, %cst_106 {dimension_numbers = #tpu.dot_dimension_numbers<[1], [0], [0], [1], [0, 0, 1, 1], [], []>} : vector<48x12xf32>, vector<12x32xf32>, vector<48x32xf32> -> vector<48x32xf32>
    %308 = arith.mulf %307, %285 : vector<48x32xf32>
    %cst_107 = arith.constant dense<0.000000e+00> : vector<12x32xf32>
    %309 = tpu.matmul %291, %308, %cst_107 {dimension_numbers = #tpu.dot_dimension_numbers<[1], [0], [0], [1], [0, 0, 1, 1], [], []>} : vector<12x48xf32>, vector<48x32xf32>, vector<12x32xf32> -> vector<12x32xf32>
    %cst_108 = arith.constant dense<0.000000e+00> : vector<12x32xf32>
    %310 = tpu.matmul %309, %238, %cst_108 {dimension_numbers = #tpu.dot_dimension_numbers<[1], [0], [0], [1], [0, 0, 1, 1], [], []>} : vector<12x32xf32>, vector<32x32xf32>, vector<12x32xf32> -> vector<12x32xf32>
    %311 = vector.extract_strided_slice %240 {offsets = [3, 0], sizes = [1, 32], strides = [1, 1]} : vector<6x32xf32> to vector<1x32xf32>
    %312 = vector.broadcast %311 : vector<1x32xf32> to vector<12x32xf32>
    %313 = arith.addf %310, %312 : vector<12x32xf32>
    %314 = arith.addf %234, %313 : vector<12x32xf32>
    %315 = vector.extract_strided_slice %240 {offsets = [4, 0], sizes = [1, 32], strides = [1, 1]} : vector<6x32xf32> to vector<1x32xf32>
    %316 = vector.extract_strided_slice %240 {offsets = [5, 0], sizes = [1, 32], strides = [1, 1]} : vector<6x32xf32> to vector<1x32xf32>
    %cst_109 = arith.constant dense<0.000000e+00> : vector<12xf32>
    %317 = vector.multi_reduction <add>, %314, %cst_109 [1] : vector<12x32xf32> to vector<12xf32>
    %318 = vector.shape_cast %317 : vector<12xf32> to vector<12x1xf32>
    %cst_110 = arith.constant 3.200000e+01 : f32
    %319 = vector.broadcast %cst_110 : f32 to vector<12x1xf32>
    %320 = arith.divf %318, %319 : vector<12x1xf32>
    %321 = vector.broadcast %320 : vector<12x1xf32> to vector<12x32xf32>
    %322 = arith.subf %314, %321 : vector<12x32xf32>
    %323 = arith.mulf %322, %322 : vector<12x32xf32>
    %cst_111 = arith.constant dense<0.000000e+00> : vector<12xf32>
    %324 = vector.multi_reduction <add>, %323, %cst_111 [1] : vector<12x32xf32> to vector<12xf32>
    %325 = vector.shape_cast %324 : vector<12xf32> to vector<12x1xf32>
    %cst_112 = arith.constant 3.200000e+01 : f32
    %326 = vector.broadcast %cst_112 : f32 to vector<12x1xf32>
    %327 = arith.divf %325, %326 : vector<12x1xf32>
    %cst_113 = arith.constant 9.99999974E-6 : f32
    %328 = vector.broadcast %cst_113 : f32 to vector<12x1xf32>
    %329 = arith.addf %327, %328 : vector<12x1xf32>
    %330 = math.rsqrt %329 : vector<12x1xf32>
    %331 = vector.broadcast %330 : vector<12x1xf32> to vector<12x32xf32>
    %332 = arith.mulf %322, %331 : vector<12x32xf32>
    %333 = vector.broadcast %315 : vector<1x32xf32> to vector<12x32xf32>
    %334 = arith.mulf %332, %333 : vector<12x32xf32>
    %335 = vector.broadcast %316 : vector<1x32xf32> to vector<12x32xf32>
    %336 = arith.addf %334, %335 : vector<12x32xf32>
    %337 = vector.extract_strided_slice %336 {offsets = [0, 0], sizes = [6, 32], strides = [1, 1]} : vector<12x32xf32> to vector<6x32xf32>
    %338 = vector.extract_strided_slice %336 {offsets = [6, 0], sizes = [6, 32], strides = [1, 1]} : vector<12x32xf32> to vector<6x32xf32>
    %339 = arith.addf %337, %7 : vector<6x32xf32>
    %c3 = arith.constant 3 : index
    %c0_114 = arith.constant 0 : index
    %c0_115 = arith.constant 0 : index
    %340 = vector.load %arg8[%c3, %c0_114, %c0_115] : memref<7x32x96xf32, #tpu.memory_space<vmem>>, vector<1x32x96xf32>
    %341 = vector.shape_cast %340 : vector<1x32x96xf32> to vector<32x96xf32>
    %c3_116 = arith.constant 3 : index
    %c0_117 = arith.constant 0 : index
    %c0_118 = arith.constant 0 : index
    %342 = vector.load %arg9[%c3_116, %c0_117, %c0_118] : memref<7x32x32xf32, #tpu.memory_space<vmem>>, vector<1x32x32xf32>
    %343 = vector.shape_cast %342 : vector<1x32x32xf32> to vector<32x32xf32>
    %c3_119 = arith.constant 3 : index
    %c0_120 = arith.constant 0 : index
    %c0_121 = arith.constant 0 : index
    %344 = vector.load %arg10[%c3_119, %c0_120, %c0_121] : memref<7x6x32xf32, #tpu.memory_space<vmem>>, vector<1x6x32xf32>
    %345 = vector.shape_cast %344 : vector<1x6x32xf32> to vector<6x32xf32>
    %346 = vector.extract_strided_slice %341 {offsets = [0, 0], sizes = [32, 32], strides = [1, 1]} : vector<32x96xf32> to vector<32x32xf32>
    %cst_122 = arith.constant dense<0.000000e+00> : vector<6x32xf32>
    %347 = tpu.matmul %339, %346, %cst_122 {dimension_numbers = #tpu.dot_dimension_numbers<[1], [0], [0], [1], [0, 0, 1, 1], [], []>} : vector<6x32xf32>, vector<32x32xf32>, vector<6x32xf32> -> vector<6x32xf32>
    %348 = vector.extract_strided_slice %345 {offsets = [0, 0], sizes = [1, 32], strides = [1, 1]} : vector<6x32xf32> to vector<1x32xf32>
    %349 = vector.broadcast %348 : vector<1x32xf32> to vector<6x32xf32>
    %350 = arith.addf %347, %349 : vector<6x32xf32>
    %351 = vector.extract_strided_slice %341 {offsets = [0, 32], sizes = [32, 32], strides = [1, 1]} : vector<32x96xf32> to vector<32x32xf32>
    %cst_123 = arith.constant dense<0.000000e+00> : vector<16x32xf32>
    %352 = tpu.matmul %13, %351, %cst_123 {dimension_numbers = #tpu.dot_dimension_numbers<[1], [0], [0], [1], [0, 0, 1, 1], [], []>} : vector<16x32xf32>, vector<32x32xf32>, vector<16x32xf32> -> vector<16x32xf32>
    %353 = vector.extract_strided_slice %345 {offsets = [1, 0], sizes = [1, 32], strides = [1, 1]} : vector<6x32xf32> to vector<1x32xf32>
    %354 = vector.broadcast %353 : vector<1x32xf32> to vector<16x32xf32>
    %355 = arith.addf %352, %354 : vector<16x32xf32>
    %356 = vector.extract_strided_slice %341 {offsets = [0, 64], sizes = [32, 32], strides = [1, 1]} : vector<32x96xf32> to vector<32x32xf32>
    %cst_124 = arith.constant dense<0.000000e+00> : vector<16x32xf32>
    %357 = tpu.matmul %10, %356, %cst_124 {dimension_numbers = #tpu.dot_dimension_numbers<[1], [0], [0], [1], [0, 0, 1, 1], [], []>} : vector<16x32xf32>, vector<32x32xf32>, vector<16x32xf32> -> vector<16x32xf32>
    %358 = vector.extract_strided_slice %345 {offsets = [2, 0], sizes = [1, 32], strides = [1, 1]} : vector<6x32xf32> to vector<1x32xf32>
    %359 = vector.broadcast %358 : vector<1x32xf32> to vector<16x32xf32>
    %360 = arith.addf %357, %359 : vector<16x32xf32>
    %361 = tpu.iota {dimensions = array<i32: 1>} : vector<6x32xi32>
    %c0_i32_125 = arith.constant 0 : i32
    %362 = vector.broadcast %c0_i32_125 : i32 to vector<6x32xi32>
    %363 = arith.cmpi sge, %361, %362 : vector<6x32xi32>
    %c8_i32_126 = arith.constant 8 : i32
    %364 = vector.broadcast %c8_i32_126 : i32 to vector<6x32xi32>
    %365 = arith.cmpi slt, %361, %364 : vector<6x32xi32>
    %366 = arith.andi %363, %365 : vector<6x32xi1>
    %367 = arith.extui %366 : vector<6x32xi1> to vector<6x32xi32>
    %368 = arith.sitofp %367 : vector<6x32xi32> to vector<6x32xf32>
    %c8_i32_127 = arith.constant 8 : i32
    %369 = vector.broadcast %c8_i32_127 : i32 to vector<6x32xi32>
    %370 = arith.cmpi sge, %361, %369 : vector<6x32xi32>
    %c16_i32_128 = arith.constant 16 : i32
    %371 = vector.broadcast %c16_i32_128 : i32 to vector<6x32xi32>
    %372 = arith.cmpi slt, %361, %371 : vector<6x32xi32>
    %373 = arith.andi %370, %372 : vector<6x32xi1>
    %374 = arith.extui %373 : vector<6x32xi1> to vector<6x32xi32>
    %375 = arith.sitofp %374 : vector<6x32xi32> to vector<6x32xf32>
    %c16_i32_129 = arith.constant 16 : i32
    %376 = vector.broadcast %c16_i32_129 : i32 to vector<6x32xi32>
    %377 = arith.cmpi sge, %361, %376 : vector<6x32xi32>
    %c24_i32_130 = arith.constant 24 : i32
    %378 = vector.broadcast %c24_i32_130 : i32 to vector<6x32xi32>
    %379 = arith.cmpi slt, %361, %378 : vector<6x32xi32>
    %380 = arith.andi %377, %379 : vector<6x32xi1>
    %381 = arith.extui %380 : vector<6x32xi1> to vector<6x32xi32>
    %382 = arith.sitofp %381 : vector<6x32xi32> to vector<6x32xf32>
    %c24_i32_131 = arith.constant 24 : i32
    %383 = vector.broadcast %c24_i32_131 : i32 to vector<6x32xi32>
    %384 = arith.cmpi sge, %361, %383 : vector<6x32xi32>
    %c32_i32_132 = arith.constant 32 : i32
    %385 = vector.broadcast %c32_i32_132 : i32 to vector<6x32xi32>
    %386 = arith.cmpi slt, %361, %385 : vector<6x32xi32>
    %387 = arith.andi %384, %386 : vector<6x32xi1>
    %388 = arith.extui %387 : vector<6x32xi1> to vector<6x32xi32>
    %389 = arith.sitofp %388 : vector<6x32xi32> to vector<6x32xf32>
    %390 = tpu.concatenate %368, %375, %382, %389 in 0 : vector<6x32xf32>, vector<6x32xf32>, vector<6x32xf32>, vector<6x32xf32> -> vector<24x32xf32>
    %391 = tpu.iota {dimensions = array<i32: 0>} : vector<6x6xi32>
    %392 = tpu.iota {dimensions = array<i32: 1>} : vector<6x6xi32>
    %393 = arith.cmpi eq, %391, %392 : vector<6x6xi32>
    %394 = arith.extui %393 : vector<6x6xi1> to vector<6x6xi32>
    %395 = arith.sitofp %394 : vector<6x6xi32> to vector<6x6xf32>
    %396 = tpu.concatenate %395, %395, %395, %395 in 1 : vector<6x6xf32>, vector<6x6xf32>, vector<6x6xf32>, vector<6x6xf32> -> vector<6x24xf32>
    %397 = tpu.concatenate %350, %350, %350, %350 in 0 : vector<6x32xf32>, vector<6x32xf32>, vector<6x32xf32>, vector<6x32xf32> -> vector<24x32xf32>
    %398 = arith.mulf %397, %390 : vector<24x32xf32>
    %cst_133 = arith.constant dense<0.000000e+00> : vector<24x16xf32>
    %399 = tpu.matmul %398, %355, %cst_133 {dimension_numbers = #tpu.dot_dimension_numbers<[1], [1], [0], [0], [0, 0, 1, 0], [], []>} : vector<24x32xf32>, vector<16x32xf32>, vector<24x16xf32> -> vector<24x16xf32>
    %cst_134 = arith.constant 0.353553385 : f32
    %400 = vector.broadcast %cst_134 : f32 to vector<24x16xf32>
    %401 = arith.mulf %399, %400 : vector<24x16xf32>
    %cst_135 = arith.constant dense<0xFF800000> : vector<24xf32>
    %402 = vector.multi_reduction <maximumf>, %401, %cst_135 [1] : vector<24x16xf32> to vector<24xf32>
    %403 = vector.shape_cast %402 : vector<24xf32> to vector<24x1xf32>
    %404 = vector.broadcast %403 : vector<24x1xf32> to vector<24x16xf32>
    %405 = arith.subf %401, %404 : vector<24x16xf32>
    %406 = math.exp %405 : vector<24x16xf32>
    %cst_136 = arith.constant dense<0.000000e+00> : vector<24xf32>
    %407 = vector.multi_reduction <add>, %406, %cst_136 [1] : vector<24x16xf32> to vector<24xf32>
    %408 = vector.shape_cast %407 : vector<24xf32> to vector<24x1xf32>
    %409 = tpu.reciprocal %408 {approx = true} : vector<24x1xf32> -> vector<24x1xf32>
    %410 = vector.broadcast %409 : vector<24x1xf32> to vector<24x16xf32>
    %411 = arith.mulf %406, %410 : vector<24x16xf32>
    %cst_137 = arith.constant dense<0.000000e+00> : vector<24x32xf32>
    %412 = tpu.matmul %411, %360, %cst_137 {dimension_numbers = #tpu.dot_dimension_numbers<[1], [0], [0], [1], [0, 0, 1, 1], [], []>} : vector<24x16xf32>, vector<16x32xf32>, vector<24x32xf32> -> vector<24x32xf32>
    %413 = arith.mulf %412, %390 : vector<24x32xf32>
    %cst_138 = arith.constant dense<0.000000e+00> : vector<6x32xf32>
    %414 = tpu.matmul %396, %413, %cst_138 {dimension_numbers = #tpu.dot_dimension_numbers<[1], [0], [0], [1], [0, 0, 1, 1], [], []>} : vector<6x24xf32>, vector<24x32xf32>, vector<6x32xf32> -> vector<6x32xf32>
    %cst_139 = arith.constant dense<0.000000e+00> : vector<6x16xf32>
    %415 = tpu.matmul %396, %411, %cst_139 {dimension_numbers = #tpu.dot_dimension_numbers<[1], [0], [0], [1], [0, 0, 1, 1], [], []>} : vector<6x24xf32>, vector<24x16xf32>, vector<6x16xf32> -> vector<6x16xf32>
    %cst_140 = arith.constant 2.500000e-01 : f32
    %416 = vector.broadcast %cst_140 : f32 to vector<6x16xf32>
    %417 = arith.mulf %415, %416 : vector<6x16xf32>
    %cst_141 = arith.constant dense<0.000000e+00> : vector<6x32xf32>
    %418 = tpu.matmul %414, %343, %cst_141 {dimension_numbers = #tpu.dot_dimension_numbers<[1], [0], [0], [1], [0, 0, 1, 1], [], []>} : vector<6x32xf32>, vector<32x32xf32>, vector<6x32xf32> -> vector<6x32xf32>
    %419 = vector.extract_strided_slice %345 {offsets = [3, 0], sizes = [1, 32], strides = [1, 1]} : vector<6x32xf32> to vector<1x32xf32>
    %420 = vector.broadcast %419 : vector<1x32xf32> to vector<6x32xf32>
    %421 = arith.addf %418, %420 : vector<6x32xf32>
    %422 = arith.addf %337, %421 : vector<6x32xf32>
    %423 = vector.extract_strided_slice %345 {offsets = [4, 0], sizes = [1, 32], strides = [1, 1]} : vector<6x32xf32> to vector<1x32xf32>
    %424 = vector.extract_strided_slice %345 {offsets = [5, 0], sizes = [1, 32], strides = [1, 1]} : vector<6x32xf32> to vector<1x32xf32>
    %cst_142 = arith.constant dense<0.000000e+00> : vector<6xf32>
    %425 = vector.multi_reduction <add>, %422, %cst_142 [1] : vector<6x32xf32> to vector<6xf32>
    %426 = vector.shape_cast %425 : vector<6xf32> to vector<6x1xf32>
    %cst_143 = arith.constant 3.200000e+01 : f32
    %427 = vector.broadcast %cst_143 : f32 to vector<6x1xf32>
    %428 = arith.divf %426, %427 : vector<6x1xf32>
    %429 = vector.broadcast %428 : vector<6x1xf32> to vector<6x32xf32>
    %430 = arith.subf %422, %429 : vector<6x32xf32>
    %431 = arith.mulf %430, %430 : vector<6x32xf32>
    %cst_144 = arith.constant dense<0.000000e+00> : vector<6xf32>
    %432 = vector.multi_reduction <add>, %431, %cst_144 [1] : vector<6x32xf32> to vector<6xf32>
    %433 = vector.shape_cast %432 : vector<6xf32> to vector<6x1xf32>
    %cst_145 = arith.constant 3.200000e+01 : f32
    %434 = vector.broadcast %cst_145 : f32 to vector<6x1xf32>
    %435 = arith.divf %433, %434 : vector<6x1xf32>
    %cst_146 = arith.constant 9.99999974E-6 : f32
    %436 = vector.broadcast %cst_146 : f32 to vector<6x1xf32>
    %437 = arith.addf %435, %436 : vector<6x1xf32>
    %438 = math.rsqrt %437 : vector<6x1xf32>
    %439 = vector.broadcast %438 : vector<6x1xf32> to vector<6x32xf32>
    %440 = arith.mulf %430, %439 : vector<6x32xf32>
    %441 = vector.broadcast %423 : vector<1x32xf32> to vector<6x32xf32>
    %442 = arith.mulf %440, %441 : vector<6x32xf32>
    %443 = vector.broadcast %424 : vector<1x32xf32> to vector<6x32xf32>
    %444 = arith.addf %442, %443 : vector<6x32xf32>
    %445 = arith.addf %444, %7 : vector<6x32xf32>
    %c4 = arith.constant 4 : index
    %c0_147 = arith.constant 0 : index
    %c0_148 = arith.constant 0 : index
    %446 = vector.load %arg8[%c4, %c0_147, %c0_148] : memref<7x32x96xf32, #tpu.memory_space<vmem>>, vector<1x32x96xf32>
    %447 = vector.shape_cast %446 : vector<1x32x96xf32> to vector<32x96xf32>
    %c4_149 = arith.constant 4 : index
    %c0_150 = arith.constant 0 : index
    %c0_151 = arith.constant 0 : index
    %448 = vector.load %arg9[%c4_149, %c0_150, %c0_151] : memref<7x32x32xf32, #tpu.memory_space<vmem>>, vector<1x32x32xf32>
    %449 = vector.shape_cast %448 : vector<1x32x32xf32> to vector<32x32xf32>
    %c4_152 = arith.constant 4 : index
    %c0_153 = arith.constant 0 : index
    %c0_154 = arith.constant 0 : index
    %450 = vector.load %arg10[%c4_152, %c0_153, %c0_154] : memref<7x6x32xf32, #tpu.memory_space<vmem>>, vector<1x6x32xf32>
    %451 = vector.shape_cast %450 : vector<1x6x32xf32> to vector<6x32xf32>
    %452 = vector.extract_strided_slice %447 {offsets = [0, 0], sizes = [32, 32], strides = [1, 1]} : vector<32x96xf32> to vector<32x32xf32>
    %cst_155 = arith.constant dense<0.000000e+00> : vector<6x32xf32>
    %453 = tpu.matmul %445, %452, %cst_155 {dimension_numbers = #tpu.dot_dimension_numbers<[1], [0], [0], [1], [0, 0, 1, 1], [], []>} : vector<6x32xf32>, vector<32x32xf32>, vector<6x32xf32> -> vector<6x32xf32>
    %454 = vector.extract_strided_slice %451 {offsets = [0, 0], sizes = [1, 32], strides = [1, 1]} : vector<6x32xf32> to vector<1x32xf32>
    %455 = vector.broadcast %454 : vector<1x32xf32> to vector<6x32xf32>
    %456 = arith.addf %453, %455 : vector<6x32xf32>
    %457 = vector.extract_strided_slice %447 {offsets = [0, 32], sizes = [32, 64], strides = [1, 1]} : vector<32x96xf32> to vector<32x64xf32>
    %cst_156 = arith.constant dense<0.000000e+00> : vector<8x64xf32>
    %458 = tpu.matmul %222, %457, %cst_156 {dimension_numbers = #tpu.dot_dimension_numbers<[1], [0], [0], [1], [0, 0, 1, 1], [], []>} : vector<8x32xf32>, vector<32x64xf32>, vector<8x64xf32> -> vector<8x64xf32>
    %459 = vector.extract_strided_slice %458 {offsets = [0, 0], sizes = [8, 32], strides = [1, 1]} : vector<8x64xf32> to vector<8x32xf32>
    %460 = vector.extract_strided_slice %451 {offsets = [1, 0], sizes = [1, 32], strides = [1, 1]} : vector<6x32xf32> to vector<1x32xf32>
    %461 = vector.broadcast %460 : vector<1x32xf32> to vector<8x32xf32>
    %462 = arith.addf %459, %461 : vector<8x32xf32>
    %463 = vector.extract_strided_slice %458 {offsets = [0, 32], sizes = [8, 32], strides = [1, 1]} : vector<8x64xf32> to vector<8x32xf32>
    %464 = vector.extract_strided_slice %451 {offsets = [2, 0], sizes = [1, 32], strides = [1, 1]} : vector<6x32xf32> to vector<1x32xf32>
    %465 = vector.broadcast %464 : vector<1x32xf32> to vector<8x32xf32>
    %466 = arith.addf %463, %465 : vector<8x32xf32>
    %467 = tpu.concatenate %456, %456, %456, %456 in 0 : vector<6x32xf32>, vector<6x32xf32>, vector<6x32xf32>, vector<6x32xf32> -> vector<24x32xf32>
    %468 = arith.mulf %467, %390 : vector<24x32xf32>
    %cst_157 = arith.constant dense<0.000000e+00> : vector<24x8xf32>
    %469 = tpu.matmul %468, %462, %cst_157 {dimension_numbers = #tpu.dot_dimension_numbers<[1], [1], [0], [0], [0, 0, 1, 0], [], []>} : vector<24x32xf32>, vector<8x32xf32>, vector<24x8xf32> -> vector<24x8xf32>
    %cst_158 = arith.constant 0.353553385 : f32
    %470 = vector.broadcast %cst_158 : f32 to vector<24x8xf32>
    %471 = arith.mulf %469, %470 : vector<24x8xf32>
    %cst_159 = arith.constant dense<0xFF800000> : vector<24xf32>
    %472 = vector.multi_reduction <maximumf>, %471, %cst_159 [1] : vector<24x8xf32> to vector<24xf32>
    %473 = vector.shape_cast %472 : vector<24xf32> to vector<24x1xf32>
    %474 = vector.broadcast %473 : vector<24x1xf32> to vector<24x8xf32>
    %475 = arith.subf %471, %474 : vector<24x8xf32>
    %476 = math.exp %475 : vector<24x8xf32>
    %cst_160 = arith.constant dense<0.000000e+00> : vector<24xf32>
    %477 = vector.multi_reduction <add>, %476, %cst_160 [1] : vector<24x8xf32> to vector<24xf32>
    %478 = vector.shape_cast %477 : vector<24xf32> to vector<24x1xf32>
    %479 = tpu.reciprocal %478 {approx = true} : vector<24x1xf32> -> vector<24x1xf32>
    %480 = vector.broadcast %479 : vector<24x1xf32> to vector<24x8xf32>
    %481 = arith.mulf %476, %480 : vector<24x8xf32>
    %cst_161 = arith.constant dense<0.000000e+00> : vector<24x32xf32>
    %482 = tpu.matmul %481, %466, %cst_161 {dimension_numbers = #tpu.dot_dimension_numbers<[1], [0], [0], [1], [0, 0, 1, 1], [], []>} : vector<24x8xf32>, vector<8x32xf32>, vector<24x32xf32> -> vector<24x32xf32>
    %483 = arith.mulf %482, %390 : vector<24x32xf32>
    %cst_162 = arith.constant dense<0.000000e+00> : vector<6x32xf32>
    %484 = tpu.matmul %396, %483, %cst_162 {dimension_numbers = #tpu.dot_dimension_numbers<[1], [0], [0], [1], [0, 0, 1, 1], [], []>} : vector<6x24xf32>, vector<24x32xf32>, vector<6x32xf32> -> vector<6x32xf32>
    %cst_163 = arith.constant dense<0.000000e+00> : vector<6x32xf32>
    %485 = tpu.matmul %484, %449, %cst_163 {dimension_numbers = #tpu.dot_dimension_numbers<[1], [0], [0], [1], [0, 0, 1, 1], [], []>} : vector<6x32xf32>, vector<32x32xf32>, vector<6x32xf32> -> vector<6x32xf32>
    %486 = vector.extract_strided_slice %451 {offsets = [3, 0], sizes = [1, 32], strides = [1, 1]} : vector<6x32xf32> to vector<1x32xf32>
    %487 = vector.broadcast %486 : vector<1x32xf32> to vector<6x32xf32>
    %488 = arith.addf %485, %487 : vector<6x32xf32>
    %489 = arith.addf %444, %488 : vector<6x32xf32>
    %490 = vector.extract_strided_slice %451 {offsets = [4, 0], sizes = [1, 32], strides = [1, 1]} : vector<6x32xf32> to vector<1x32xf32>
    %491 = vector.extract_strided_slice %451 {offsets = [5, 0], sizes = [1, 32], strides = [1, 1]} : vector<6x32xf32> to vector<1x32xf32>
    %cst_164 = arith.constant dense<0.000000e+00> : vector<6xf32>
    %492 = vector.multi_reduction <add>, %489, %cst_164 [1] : vector<6x32xf32> to vector<6xf32>
    %493 = vector.shape_cast %492 : vector<6xf32> to vector<6x1xf32>
    %cst_165 = arith.constant 3.200000e+01 : f32
    %494 = vector.broadcast %cst_165 : f32 to vector<6x1xf32>
    %495 = arith.divf %493, %494 : vector<6x1xf32>
    %496 = vector.broadcast %495 : vector<6x1xf32> to vector<6x32xf32>
    %497 = arith.subf %489, %496 : vector<6x32xf32>
    %498 = arith.mulf %497, %497 : vector<6x32xf32>
    %cst_166 = arith.constant dense<0.000000e+00> : vector<6xf32>
    %499 = vector.multi_reduction <add>, %498, %cst_166 [1] : vector<6x32xf32> to vector<6xf32>
    %500 = vector.shape_cast %499 : vector<6xf32> to vector<6x1xf32>
    %cst_167 = arith.constant 3.200000e+01 : f32
    %501 = vector.broadcast %cst_167 : f32 to vector<6x1xf32>
    %502 = arith.divf %500, %501 : vector<6x1xf32>
    %cst_168 = arith.constant 9.99999974E-6 : f32
    %503 = vector.broadcast %cst_168 : f32 to vector<6x1xf32>
    %504 = arith.addf %502, %503 : vector<6x1xf32>
    %505 = math.rsqrt %504 : vector<6x1xf32>
    %506 = vector.broadcast %505 : vector<6x1xf32> to vector<6x32xf32>
    %507 = arith.mulf %497, %506 : vector<6x32xf32>
    %508 = vector.broadcast %490 : vector<1x32xf32> to vector<6x32xf32>
    %509 = arith.mulf %507, %508 : vector<6x32xf32>
    %510 = vector.broadcast %491 : vector<1x32xf32> to vector<6x32xf32>
    %511 = arith.addf %509, %510 : vector<6x32xf32>
    %c1_169 = arith.constant 1 : index
    %c0_170 = arith.constant 0 : index
    %c0_171 = arith.constant 0 : index
    %512 = vector.load %arg11[%c1_169, %c0_170, %c0_171] : memref<3x32x64xf32, #tpu.memory_space<vmem>>, vector<1x32x64xf32>
    %513 = vector.shape_cast %512 : vector<1x32x64xf32> to vector<32x64xf32>
    %c1_172 = arith.constant 1 : index
    %c0_173 = arith.constant 0 : index
    %c0_174 = arith.constant 0 : index
    %514 = vector.load %arg12[%c1_172, %c0_173, %c0_174] : memref<3x64x32xf32, #tpu.memory_space<vmem>>, vector<1x64x32xf32>
    %515 = vector.shape_cast %514 : vector<1x64x32xf32> to vector<64x32xf32>
    %c1_175 = arith.constant 1 : index
    %c0_176 = arith.constant 0 : index
    %c0_177 = arith.constant 0 : index
    %516 = vector.load %arg13[%c1_175, %c0_176, %c0_177] : memref<3x4x64xf32, #tpu.memory_space<vmem>>, vector<1x4x64xf32>
    %517 = vector.shape_cast %516 : vector<1x4x64xf32> to vector<4x64xf32>
    %cst_178 = arith.constant dense<0.000000e+00> : vector<6x64xf32>
    %518 = tpu.matmul %511, %513, %cst_178 {dimension_numbers = #tpu.dot_dimension_numbers<[1], [0], [0], [1], [0, 0, 1, 1], [], []>} : vector<6x32xf32>, vector<32x64xf32>, vector<6x64xf32> -> vector<6x64xf32>
    %519 = vector.extract_strided_slice %517 {offsets = [0, 0], sizes = [1, 64], strides = [1, 1]} : vector<4x64xf32> to vector<1x64xf32>
    %520 = vector.broadcast %519 : vector<1x64xf32> to vector<6x64xf32>
    %521 = arith.addf %518, %520 : vector<6x64xf32>
    %cst_179 = arith.constant 0.000000e+00 : f32
    %522 = vector.broadcast %cst_179 : f32 to vector<6x64xf32>
    %523 = arith.maximumf %521, %522 : vector<6x64xf32>
    %cst_180 = arith.constant dense<0.000000e+00> : vector<6x32xf32>
    %524 = tpu.matmul %523, %515, %cst_180 {dimension_numbers = #tpu.dot_dimension_numbers<[1], [0], [0], [1], [0, 0, 1, 1], [], []>} : vector<6x64xf32>, vector<64x32xf32>, vector<6x32xf32> -> vector<6x32xf32>
    %525 = vector.extract_strided_slice %517 {offsets = [1, 0], sizes = [1, 32], strides = [1, 1]} : vector<4x64xf32> to vector<1x32xf32>
    %526 = vector.broadcast %525 : vector<1x32xf32> to vector<6x32xf32>
    %527 = arith.addf %524, %526 : vector<6x32xf32>
    %528 = arith.addf %511, %527 : vector<6x32xf32>
    %529 = vector.extract_strided_slice %517 {offsets = [2, 0], sizes = [1, 32], strides = [1, 1]} : vector<4x64xf32> to vector<1x32xf32>
    %530 = vector.extract_strided_slice %517 {offsets = [3, 0], sizes = [1, 32], strides = [1, 1]} : vector<4x64xf32> to vector<1x32xf32>
    %cst_181 = arith.constant dense<0.000000e+00> : vector<6xf32>
    %531 = vector.multi_reduction <add>, %528, %cst_181 [1] : vector<6x32xf32> to vector<6xf32>
    %532 = vector.shape_cast %531 : vector<6xf32> to vector<6x1xf32>
    %cst_182 = arith.constant 3.200000e+01 : f32
    %533 = vector.broadcast %cst_182 : f32 to vector<6x1xf32>
    %534 = arith.divf %532, %533 : vector<6x1xf32>
    %535 = vector.broadcast %534 : vector<6x1xf32> to vector<6x32xf32>
    %536 = arith.subf %528, %535 : vector<6x32xf32>
    %537 = arith.mulf %536, %536 : vector<6x32xf32>
    %cst_183 = arith.constant dense<0.000000e+00> : vector<6xf32>
    %538 = vector.multi_reduction <add>, %537, %cst_183 [1] : vector<6x32xf32> to vector<6xf32>
    %539 = vector.shape_cast %538 : vector<6xf32> to vector<6x1xf32>
    %cst_184 = arith.constant 3.200000e+01 : f32
    %540 = vector.broadcast %cst_184 : f32 to vector<6x1xf32>
    %541 = arith.divf %539, %540 : vector<6x1xf32>
    %cst_185 = arith.constant 9.99999974E-6 : f32
    %542 = vector.broadcast %cst_185 : f32 to vector<6x1xf32>
    %543 = arith.addf %541, %542 : vector<6x1xf32>
    %544 = math.rsqrt %543 : vector<6x1xf32>
    %545 = vector.broadcast %544 : vector<6x1xf32> to vector<6x32xf32>
    %546 = arith.mulf %536, %545 : vector<6x32xf32>
    %547 = vector.broadcast %529 : vector<1x32xf32> to vector<6x32xf32>
    %548 = arith.mulf %546, %547 : vector<6x32xf32>
    %549 = vector.broadcast %530 : vector<1x32xf32> to vector<6x32xf32>
    %550 = arith.addf %548, %549 : vector<6x32xf32>
    %551 = arith.addf %338, %7 : vector<6x32xf32>
    %c5 = arith.constant 5 : index
    %c0_186 = arith.constant 0 : index
    %c0_187 = arith.constant 0 : index
    %552 = vector.load %arg8[%c5, %c0_186, %c0_187] : memref<7x32x96xf32, #tpu.memory_space<vmem>>, vector<1x32x96xf32>
    %553 = vector.shape_cast %552 : vector<1x32x96xf32> to vector<32x96xf32>
    %c5_188 = arith.constant 5 : index
    %c0_189 = arith.constant 0 : index
    %c0_190 = arith.constant 0 : index
    %554 = vector.load %arg9[%c5_188, %c0_189, %c0_190] : memref<7x32x32xf32, #tpu.memory_space<vmem>>, vector<1x32x32xf32>
    %555 = vector.shape_cast %554 : vector<1x32x32xf32> to vector<32x32xf32>
    %c5_191 = arith.constant 5 : index
    %c0_192 = arith.constant 0 : index
    %c0_193 = arith.constant 0 : index
    %556 = vector.load %arg10[%c5_191, %c0_192, %c0_193] : memref<7x6x32xf32, #tpu.memory_space<vmem>>, vector<1x6x32xf32>
    %557 = vector.shape_cast %556 : vector<1x6x32xf32> to vector<6x32xf32>
    %558 = vector.extract_strided_slice %553 {offsets = [0, 0], sizes = [32, 32], strides = [1, 1]} : vector<32x96xf32> to vector<32x32xf32>
    %cst_194 = arith.constant dense<0.000000e+00> : vector<6x32xf32>
    %559 = tpu.matmul %551, %558, %cst_194 {dimension_numbers = #tpu.dot_dimension_numbers<[1], [0], [0], [1], [0, 0, 1, 1], [], []>} : vector<6x32xf32>, vector<32x32xf32>, vector<6x32xf32> -> vector<6x32xf32>
    %560 = vector.extract_strided_slice %557 {offsets = [0, 0], sizes = [1, 32], strides = [1, 1]} : vector<6x32xf32> to vector<1x32xf32>
    %561 = vector.broadcast %560 : vector<1x32xf32> to vector<6x32xf32>
    %562 = arith.addf %559, %561 : vector<6x32xf32>
    %563 = vector.extract_strided_slice %553 {offsets = [0, 32], sizes = [32, 32], strides = [1, 1]} : vector<32x96xf32> to vector<32x32xf32>
    %cst_195 = arith.constant dense<0.000000e+00> : vector<16x32xf32>
    %564 = tpu.matmul %13, %563, %cst_195 {dimension_numbers = #tpu.dot_dimension_numbers<[1], [0], [0], [1], [0, 0, 1, 1], [], []>} : vector<16x32xf32>, vector<32x32xf32>, vector<16x32xf32> -> vector<16x32xf32>
    %565 = vector.extract_strided_slice %557 {offsets = [1, 0], sizes = [1, 32], strides = [1, 1]} : vector<6x32xf32> to vector<1x32xf32>
    %566 = vector.broadcast %565 : vector<1x32xf32> to vector<16x32xf32>
    %567 = arith.addf %564, %566 : vector<16x32xf32>
    %568 = vector.extract_strided_slice %553 {offsets = [0, 64], sizes = [32, 32], strides = [1, 1]} : vector<32x96xf32> to vector<32x32xf32>
    %cst_196 = arith.constant dense<0.000000e+00> : vector<16x32xf32>
    %569 = tpu.matmul %10, %568, %cst_196 {dimension_numbers = #tpu.dot_dimension_numbers<[1], [0], [0], [1], [0, 0, 1, 1], [], []>} : vector<16x32xf32>, vector<32x32xf32>, vector<16x32xf32> -> vector<16x32xf32>
    %570 = vector.extract_strided_slice %557 {offsets = [2, 0], sizes = [1, 32], strides = [1, 1]} : vector<6x32xf32> to vector<1x32xf32>
    %571 = vector.broadcast %570 : vector<1x32xf32> to vector<16x32xf32>
    %572 = arith.addf %569, %571 : vector<16x32xf32>
    %573 = tpu.concatenate %562, %562, %562, %562 in 0 : vector<6x32xf32>, vector<6x32xf32>, vector<6x32xf32>, vector<6x32xf32> -> vector<24x32xf32>
    %574 = arith.mulf %573, %390 : vector<24x32xf32>
    %cst_197 = arith.constant dense<0.000000e+00> : vector<24x16xf32>
    %575 = tpu.matmul %574, %567, %cst_197 {dimension_numbers = #tpu.dot_dimension_numbers<[1], [1], [0], [0], [0, 0, 1, 0], [], []>} : vector<24x32xf32>, vector<16x32xf32>, vector<24x16xf32> -> vector<24x16xf32>
    %cst_198 = arith.constant 0.353553385 : f32
    %576 = vector.broadcast %cst_198 : f32 to vector<24x16xf32>
    %577 = arith.mulf %575, %576 : vector<24x16xf32>
    %cst_199 = arith.constant dense<0xFF800000> : vector<24xf32>
    %578 = vector.multi_reduction <maximumf>, %577, %cst_199 [1] : vector<24x16xf32> to vector<24xf32>
    %579 = vector.shape_cast %578 : vector<24xf32> to vector<24x1xf32>
    %580 = vector.broadcast %579 : vector<24x1xf32> to vector<24x16xf32>
    %581 = arith.subf %577, %580 : vector<24x16xf32>
    %582 = math.exp %581 : vector<24x16xf32>
    %cst_200 = arith.constant dense<0.000000e+00> : vector<24xf32>
    %583 = vector.multi_reduction <add>, %582, %cst_200 [1] : vector<24x16xf32> to vector<24xf32>
    %584 = vector.shape_cast %583 : vector<24xf32> to vector<24x1xf32>
    %585 = tpu.reciprocal %584 {approx = true} : vector<24x1xf32> -> vector<24x1xf32>
    %586 = vector.broadcast %585 : vector<24x1xf32> to vector<24x16xf32>
    %587 = arith.mulf %582, %586 : vector<24x16xf32>
    %cst_201 = arith.constant dense<0.000000e+00> : vector<24x32xf32>
    %588 = tpu.matmul %587, %572, %cst_201 {dimension_numbers = #tpu.dot_dimension_numbers<[1], [0], [0], [1], [0, 0, 1, 1], [], []>} : vector<24x16xf32>, vector<16x32xf32>, vector<24x32xf32> -> vector<24x32xf32>
    %589 = arith.mulf %588, %390 : vector<24x32xf32>
    %cst_202 = arith.constant dense<0.000000e+00> : vector<6x32xf32>
    %590 = tpu.matmul %396, %589, %cst_202 {dimension_numbers = #tpu.dot_dimension_numbers<[1], [0], [0], [1], [0, 0, 1, 1], [], []>} : vector<6x24xf32>, vector<24x32xf32>, vector<6x32xf32> -> vector<6x32xf32>
    %cst_203 = arith.constant dense<0.000000e+00> : vector<6x16xf32>
    %591 = tpu.matmul %396, %587, %cst_203 {dimension_numbers = #tpu.dot_dimension_numbers<[1], [0], [0], [1], [0, 0, 1, 1], [], []>} : vector<6x24xf32>, vector<24x16xf32>, vector<6x16xf32> -> vector<6x16xf32>
    %cst_204 = arith.constant 2.500000e-01 : f32
    %592 = vector.broadcast %cst_204 : f32 to vector<6x16xf32>
    %593 = arith.mulf %591, %592 : vector<6x16xf32>
    %cst_205 = arith.constant dense<0.000000e+00> : vector<6x32xf32>
    %594 = tpu.matmul %590, %555, %cst_205 {dimension_numbers = #tpu.dot_dimension_numbers<[1], [0], [0], [1], [0, 0, 1, 1], [], []>} : vector<6x32xf32>, vector<32x32xf32>, vector<6x32xf32> -> vector<6x32xf32>
    %595 = vector.extract_strided_slice %557 {offsets = [3, 0], sizes = [1, 32], strides = [1, 1]} : vector<6x32xf32> to vector<1x32xf32>
    %596 = vector.broadcast %595 : vector<1x32xf32> to vector<6x32xf32>
    %597 = arith.addf %594, %596 : vector<6x32xf32>
    %598 = arith.addf %338, %597 : vector<6x32xf32>
    %599 = vector.extract_strided_slice %557 {offsets = [4, 0], sizes = [1, 32], strides = [1, 1]} : vector<6x32xf32> to vector<1x32xf32>
    %600 = vector.extract_strided_slice %557 {offsets = [5, 0], sizes = [1, 32], strides = [1, 1]} : vector<6x32xf32> to vector<1x32xf32>
    %cst_206 = arith.constant dense<0.000000e+00> : vector<6xf32>
    %601 = vector.multi_reduction <add>, %598, %cst_206 [1] : vector<6x32xf32> to vector<6xf32>
    %602 = vector.shape_cast %601 : vector<6xf32> to vector<6x1xf32>
    %cst_207 = arith.constant 3.200000e+01 : f32
    %603 = vector.broadcast %cst_207 : f32 to vector<6x1xf32>
    %604 = arith.divf %602, %603 : vector<6x1xf32>
    %605 = vector.broadcast %604 : vector<6x1xf32> to vector<6x32xf32>
    %606 = arith.subf %598, %605 : vector<6x32xf32>
    %607 = arith.mulf %606, %606 : vector<6x32xf32>
    %cst_208 = arith.constant dense<0.000000e+00> : vector<6xf32>
    %608 = vector.multi_reduction <add>, %607, %cst_208 [1] : vector<6x32xf32> to vector<6xf32>
    %609 = vector.shape_cast %608 : vector<6xf32> to vector<6x1xf32>
    %cst_209 = arith.constant 3.200000e+01 : f32
    %610 = vector.broadcast %cst_209 : f32 to vector<6x1xf32>
    %611 = arith.divf %609, %610 : vector<6x1xf32>
    %cst_210 = arith.constant 9.99999974E-6 : f32
    %612 = vector.broadcast %cst_210 : f32 to vector<6x1xf32>
    %613 = arith.addf %611, %612 : vector<6x1xf32>
    %614 = math.rsqrt %613 : vector<6x1xf32>
    %615 = vector.broadcast %614 : vector<6x1xf32> to vector<6x32xf32>
    %616 = arith.mulf %606, %615 : vector<6x32xf32>
    %617 = vector.broadcast %599 : vector<1x32xf32> to vector<6x32xf32>
    %618 = arith.mulf %616, %617 : vector<6x32xf32>
    %619 = vector.broadcast %600 : vector<1x32xf32> to vector<6x32xf32>
    %620 = arith.addf %618, %619 : vector<6x32xf32>
    %621 = arith.addf %620, %7 : vector<6x32xf32>
    %c6 = arith.constant 6 : index
    %c0_211 = arith.constant 0 : index
    %c0_212 = arith.constant 0 : index
    %622 = vector.load %arg8[%c6, %c0_211, %c0_212] : memref<7x32x96xf32, #tpu.memory_space<vmem>>, vector<1x32x96xf32>
    %623 = vector.shape_cast %622 : vector<1x32x96xf32> to vector<32x96xf32>
    %c6_213 = arith.constant 6 : index
    %c0_214 = arith.constant 0 : index
    %c0_215 = arith.constant 0 : index
    %624 = vector.load %arg9[%c6_213, %c0_214, %c0_215] : memref<7x32x32xf32, #tpu.memory_space<vmem>>, vector<1x32x32xf32>
    %625 = vector.shape_cast %624 : vector<1x32x32xf32> to vector<32x32xf32>
    %c6_216 = arith.constant 6 : index
    %c0_217 = arith.constant 0 : index
    %c0_218 = arith.constant 0 : index
    %626 = vector.load %arg10[%c6_216, %c0_217, %c0_218] : memref<7x6x32xf32, #tpu.memory_space<vmem>>, vector<1x6x32xf32>
    %627 = vector.shape_cast %626 : vector<1x6x32xf32> to vector<6x32xf32>
    %628 = vector.extract_strided_slice %623 {offsets = [0, 0], sizes = [32, 32], strides = [1, 1]} : vector<32x96xf32> to vector<32x32xf32>
    %cst_219 = arith.constant dense<0.000000e+00> : vector<6x32xf32>
    %629 = tpu.matmul %621, %628, %cst_219 {dimension_numbers = #tpu.dot_dimension_numbers<[1], [0], [0], [1], [0, 0, 1, 1], [], []>} : vector<6x32xf32>, vector<32x32xf32>, vector<6x32xf32> -> vector<6x32xf32>
    %630 = vector.extract_strided_slice %627 {offsets = [0, 0], sizes = [1, 32], strides = [1, 1]} : vector<6x32xf32> to vector<1x32xf32>
    %631 = vector.broadcast %630 : vector<1x32xf32> to vector<6x32xf32>
    %632 = arith.addf %629, %631 : vector<6x32xf32>
    %633 = vector.extract_strided_slice %623 {offsets = [0, 32], sizes = [32, 64], strides = [1, 1]} : vector<32x96xf32> to vector<32x64xf32>
    %cst_220 = arith.constant dense<0.000000e+00> : vector<8x64xf32>
    %634 = tpu.matmul %222, %633, %cst_220 {dimension_numbers = #tpu.dot_dimension_numbers<[1], [0], [0], [1], [0, 0, 1, 1], [], []>} : vector<8x32xf32>, vector<32x64xf32>, vector<8x64xf32> -> vector<8x64xf32>
    %635 = vector.extract_strided_slice %634 {offsets = [0, 0], sizes = [8, 32], strides = [1, 1]} : vector<8x64xf32> to vector<8x32xf32>
    %636 = vector.extract_strided_slice %627 {offsets = [1, 0], sizes = [1, 32], strides = [1, 1]} : vector<6x32xf32> to vector<1x32xf32>
    %637 = vector.broadcast %636 : vector<1x32xf32> to vector<8x32xf32>
    %638 = arith.addf %635, %637 : vector<8x32xf32>
    %639 = vector.extract_strided_slice %634 {offsets = [0, 32], sizes = [8, 32], strides = [1, 1]} : vector<8x64xf32> to vector<8x32xf32>
    %640 = vector.extract_strided_slice %627 {offsets = [2, 0], sizes = [1, 32], strides = [1, 1]} : vector<6x32xf32> to vector<1x32xf32>
    %641 = vector.broadcast %640 : vector<1x32xf32> to vector<8x32xf32>
    %642 = arith.addf %639, %641 : vector<8x32xf32>
    %643 = tpu.concatenate %632, %632, %632, %632 in 0 : vector<6x32xf32>, vector<6x32xf32>, vector<6x32xf32>, vector<6x32xf32> -> vector<24x32xf32>
    %644 = arith.mulf %643, %390 : vector<24x32xf32>
    %cst_221 = arith.constant dense<0.000000e+00> : vector<24x8xf32>
    %645 = tpu.matmul %644, %638, %cst_221 {dimension_numbers = #tpu.dot_dimension_numbers<[1], [1], [0], [0], [0, 0, 1, 0], [], []>} : vector<24x32xf32>, vector<8x32xf32>, vector<24x8xf32> -> vector<24x8xf32>
    %cst_222 = arith.constant 0.353553385 : f32
    %646 = vector.broadcast %cst_222 : f32 to vector<24x8xf32>
    %647 = arith.mulf %645, %646 : vector<24x8xf32>
    %cst_223 = arith.constant dense<0xFF800000> : vector<24xf32>
    %648 = vector.multi_reduction <maximumf>, %647, %cst_223 [1] : vector<24x8xf32> to vector<24xf32>
    %649 = vector.shape_cast %648 : vector<24xf32> to vector<24x1xf32>
    %650 = vector.broadcast %649 : vector<24x1xf32> to vector<24x8xf32>
    %651 = arith.subf %647, %650 : vector<24x8xf32>
    %652 = math.exp %651 : vector<24x8xf32>
    %cst_224 = arith.constant dense<0.000000e+00> : vector<24xf32>
    %653 = vector.multi_reduction <add>, %652, %cst_224 [1] : vector<24x8xf32> to vector<24xf32>
    %654 = vector.shape_cast %653 : vector<24xf32> to vector<24x1xf32>
    %655 = tpu.reciprocal %654 {approx = true} : vector<24x1xf32> -> vector<24x1xf32>
    %656 = vector.broadcast %655 : vector<24x1xf32> to vector<24x8xf32>
    %657 = arith.mulf %652, %656 : vector<24x8xf32>
    %cst_225 = arith.constant dense<0.000000e+00> : vector<24x32xf32>
    %658 = tpu.matmul %657, %642, %cst_225 {dimension_numbers = #tpu.dot_dimension_numbers<[1], [0], [0], [1], [0, 0, 1, 1], [], []>} : vector<24x8xf32>, vector<8x32xf32>, vector<24x32xf32> -> vector<24x32xf32>
    %659 = arith.mulf %658, %390 : vector<24x32xf32>
    %cst_226 = arith.constant dense<0.000000e+00> : vector<6x32xf32>
    %660 = tpu.matmul %396, %659, %cst_226 {dimension_numbers = #tpu.dot_dimension_numbers<[1], [0], [0], [1], [0, 0, 1, 1], [], []>} : vector<6x24xf32>, vector<24x32xf32>, vector<6x32xf32> -> vector<6x32xf32>
    %cst_227 = arith.constant dense<0.000000e+00> : vector<6x32xf32>
    %661 = tpu.matmul %660, %625, %cst_227 {dimension_numbers = #tpu.dot_dimension_numbers<[1], [0], [0], [1], [0, 0, 1, 1], [], []>} : vector<6x32xf32>, vector<32x32xf32>, vector<6x32xf32> -> vector<6x32xf32>
    %662 = vector.extract_strided_slice %627 {offsets = [3, 0], sizes = [1, 32], strides = [1, 1]} : vector<6x32xf32> to vector<1x32xf32>
    %663 = vector.broadcast %662 : vector<1x32xf32> to vector<6x32xf32>
    %664 = arith.addf %661, %663 : vector<6x32xf32>
    %665 = arith.addf %620, %664 : vector<6x32xf32>
    %666 = vector.extract_strided_slice %627 {offsets = [4, 0], sizes = [1, 32], strides = [1, 1]} : vector<6x32xf32> to vector<1x32xf32>
    %667 = vector.extract_strided_slice %627 {offsets = [5, 0], sizes = [1, 32], strides = [1, 1]} : vector<6x32xf32> to vector<1x32xf32>
    %cst_228 = arith.constant dense<0.000000e+00> : vector<6xf32>
    %668 = vector.multi_reduction <add>, %665, %cst_228 [1] : vector<6x32xf32> to vector<6xf32>
    %669 = vector.shape_cast %668 : vector<6xf32> to vector<6x1xf32>
    %cst_229 = arith.constant 3.200000e+01 : f32
    %670 = vector.broadcast %cst_229 : f32 to vector<6x1xf32>
    %671 = arith.divf %669, %670 : vector<6x1xf32>
    %672 = vector.broadcast %671 : vector<6x1xf32> to vector<6x32xf32>
    %673 = arith.subf %665, %672 : vector<6x32xf32>
    %674 = arith.mulf %673, %673 : vector<6x32xf32>
    %cst_230 = arith.constant dense<0.000000e+00> : vector<6xf32>
    %675 = vector.multi_reduction <add>, %674, %cst_230 [1] : vector<6x32xf32> to vector<6xf32>
    %676 = vector.shape_cast %675 : vector<6xf32> to vector<6x1xf32>
    %cst_231 = arith.constant 3.200000e+01 : f32
    %677 = vector.broadcast %cst_231 : f32 to vector<6x1xf32>
    %678 = arith.divf %676, %677 : vector<6x1xf32>
    %cst_232 = arith.constant 9.99999974E-6 : f32
    %679 = vector.broadcast %cst_232 : f32 to vector<6x1xf32>
    %680 = arith.addf %678, %679 : vector<6x1xf32>
    %681 = math.rsqrt %680 : vector<6x1xf32>
    %682 = vector.broadcast %681 : vector<6x1xf32> to vector<6x32xf32>
    %683 = arith.mulf %673, %682 : vector<6x32xf32>
    %684 = vector.broadcast %666 : vector<1x32xf32> to vector<6x32xf32>
    %685 = arith.mulf %683, %684 : vector<6x32xf32>
    %686 = vector.broadcast %667 : vector<1x32xf32> to vector<6x32xf32>
    %687 = arith.addf %685, %686 : vector<6x32xf32>
    %c2_233 = arith.constant 2 : index
    %c0_234 = arith.constant 0 : index
    %c0_235 = arith.constant 0 : index
    %688 = vector.load %arg11[%c2_233, %c0_234, %c0_235] : memref<3x32x64xf32, #tpu.memory_space<vmem>>, vector<1x32x64xf32>
    %689 = vector.shape_cast %688 : vector<1x32x64xf32> to vector<32x64xf32>
    %c2_236 = arith.constant 2 : index
    %c0_237 = arith.constant 0 : index
    %c0_238 = arith.constant 0 : index
    %690 = vector.load %arg12[%c2_236, %c0_237, %c0_238] : memref<3x64x32xf32, #tpu.memory_space<vmem>>, vector<1x64x32xf32>
    %691 = vector.shape_cast %690 : vector<1x64x32xf32> to vector<64x32xf32>
    %c2_239 = arith.constant 2 : index
    %c0_240 = arith.constant 0 : index
    %c0_241 = arith.constant 0 : index
    %692 = vector.load %arg13[%c2_239, %c0_240, %c0_241] : memref<3x4x64xf32, #tpu.memory_space<vmem>>, vector<1x4x64xf32>
    %693 = vector.shape_cast %692 : vector<1x4x64xf32> to vector<4x64xf32>
    %cst_242 = arith.constant dense<0.000000e+00> : vector<6x64xf32>
    %694 = tpu.matmul %687, %689, %cst_242 {dimension_numbers = #tpu.dot_dimension_numbers<[1], [0], [0], [1], [0, 0, 1, 1], [], []>} : vector<6x32xf32>, vector<32x64xf32>, vector<6x64xf32> -> vector<6x64xf32>
    %695 = vector.extract_strided_slice %693 {offsets = [0, 0], sizes = [1, 64], strides = [1, 1]} : vector<4x64xf32> to vector<1x64xf32>
    %696 = vector.broadcast %695 : vector<1x64xf32> to vector<6x64xf32>
    %697 = arith.addf %694, %696 : vector<6x64xf32>
    %cst_243 = arith.constant 0.000000e+00 : f32
    %698 = vector.broadcast %cst_243 : f32 to vector<6x64xf32>
    %699 = arith.maximumf %697, %698 : vector<6x64xf32>
    %cst_244 = arith.constant dense<0.000000e+00> : vector<6x32xf32>
    %700 = tpu.matmul %699, %691, %cst_244 {dimension_numbers = #tpu.dot_dimension_numbers<[1], [0], [0], [1], [0, 0, 1, 1], [], []>} : vector<6x64xf32>, vector<64x32xf32>, vector<6x32xf32> -> vector<6x32xf32>
    %701 = vector.extract_strided_slice %693 {offsets = [1, 0], sizes = [1, 32], strides = [1, 1]} : vector<4x64xf32> to vector<1x32xf32>
    %702 = vector.broadcast %701 : vector<1x32xf32> to vector<6x32xf32>
    %703 = arith.addf %700, %702 : vector<6x32xf32>
    %704 = arith.addf %687, %703 : vector<6x32xf32>
    %705 = vector.extract_strided_slice %693 {offsets = [2, 0], sizes = [1, 32], strides = [1, 1]} : vector<4x64xf32> to vector<1x32xf32>
    %706 = vector.extract_strided_slice %693 {offsets = [3, 0], sizes = [1, 32], strides = [1, 1]} : vector<4x64xf32> to vector<1x32xf32>
    %cst_245 = arith.constant dense<0.000000e+00> : vector<6xf32>
    %707 = vector.multi_reduction <add>, %704, %cst_245 [1] : vector<6x32xf32> to vector<6xf32>
    %708 = vector.shape_cast %707 : vector<6xf32> to vector<6x1xf32>
    %cst_246 = arith.constant 3.200000e+01 : f32
    %709 = vector.broadcast %cst_246 : f32 to vector<6x1xf32>
    %710 = arith.divf %708, %709 : vector<6x1xf32>
    %711 = vector.broadcast %710 : vector<6x1xf32> to vector<6x32xf32>
    %712 = arith.subf %704, %711 : vector<6x32xf32>
    %713 = arith.mulf %712, %712 : vector<6x32xf32>
    %cst_247 = arith.constant dense<0.000000e+00> : vector<6xf32>
    %714 = vector.multi_reduction <add>, %713, %cst_247 [1] : vector<6x32xf32> to vector<6xf32>
    %715 = vector.shape_cast %714 : vector<6xf32> to vector<6x1xf32>
    %cst_248 = arith.constant 3.200000e+01 : f32
    %716 = vector.broadcast %cst_248 : f32 to vector<6x1xf32>
    %717 = arith.divf %715, %716 : vector<6x1xf32>
    %cst_249 = arith.constant 9.99999974E-6 : f32
    %718 = vector.broadcast %cst_249 : f32 to vector<6x1xf32>
    %719 = arith.addf %717, %718 : vector<6x1xf32>
    %720 = math.rsqrt %719 : vector<6x1xf32>
    %721 = vector.broadcast %720 : vector<6x1xf32> to vector<6x32xf32>
    %722 = arith.mulf %712, %721 : vector<6x32xf32>
    %723 = vector.broadcast %705 : vector<1x32xf32> to vector<6x32xf32>
    %724 = arith.mulf %722, %723 : vector<6x32xf32>
    %725 = vector.broadcast %706 : vector<1x32xf32> to vector<6x32xf32>
    %726 = arith.addf %724, %725 : vector<6x32xf32>
    %c0_250 = arith.constant 0 : index
    %c0_251 = arith.constant 0 : index
    %c0_252 = arith.constant 0 : index
    %727 = vector.load %arg14[%c0_250, %c0_251, %c0_252] : memref<1x8x32xf32, #tpu.memory_space<vmem>>, vector<1x8x32xf32>
    %728 = vector.shape_cast %727 : vector<1x8x32xf32> to vector<8x32xf32>
    %729 = vector.shape_cast %222 : vector<8x32xf32> to vector<1x8x32xf32>
    tpu.vector_store %arg14[%c0_250, %c0_251, %c0_252], %729 {strides = array<i32>} : memref<1x8x32xf32, #tpu.memory_space<vmem>>, vector<1x8x32xf32>,
    %730 = tpu.concatenate %550, %726 in 1 : vector<6x32xf32>, vector<6x32xf32> -> vector<6x64xf32>
    %c0_253 = arith.constant 0 : index
    %c0_254 = arith.constant 0 : index
    %c0_255 = arith.constant 0 : index
    %731 = vector.load %arg15[%c0_253, %c0_254, %c0_255] : memref<1x6x64xf32, #tpu.memory_space<vmem>>, vector<1x6x64xf32>
    %732 = vector.shape_cast %731 : vector<1x6x64xf32> to vector<6x64xf32>
    %733 = vector.shape_cast %730 : vector<6x64xf32> to vector<1x6x64xf32>
    tpu.vector_store %arg15[%c0_253, %c0_254, %c0_255], %733 {strides = array<i32>} : memref<1x6x64xf32, #tpu.memory_space<vmem>>, vector<1x6x64xf32>,
    %c0_256 = arith.constant 0 : index
    %c0_257 = arith.constant 0 : index
    %c0_258 = arith.constant 0 : index
    %734 = vector.load %arg16[%c0_256, %c0_257, %c0_258] : memref<1x6x16xf32, #tpu.memory_space<vmem>>, vector<1x6x16xf32>
    %735 = vector.shape_cast %734 : vector<1x6x16xf32> to vector<6x16xf32>
    %736 = vector.shape_cast %417 : vector<6x16xf32> to vector<1x6x16xf32>
    tpu.vector_store %arg16[%c0_256, %c0_257, %c0_258], %736 {strides = array<i32>} : memref<1x6x16xf32, #tpu.memory_space<vmem>>, vector<1x6x16xf32>,
    %c0_259 = arith.constant 0 : index
    %c0_260 = arith.constant 0 : index
    %c0_261 = arith.constant 0 : index
    %737 = vector.load %arg17[%c0_259, %c0_260, %c0_261] : memref<1x6x16xf32, #tpu.memory_space<vmem>>, vector<1x6x16xf32>
    %738 = vector.shape_cast %737 : vector<1x6x16xf32> to vector<6x16xf32>
    %739 = vector.shape_cast %593 : vector<6x16xf32> to vector<1x6x16xf32>
    tpu.vector_store %arg17[%c0_259, %c0_260, %c0_261], %739 {strides = array<i32>} : memref<1x6x16xf32, #tpu.memory_space<vmem>>, vector<1x6x16xf32>,
    return
  }
  func.func @transform_0(%arg0: i32) -> (i32, i32, i32) {
    %c0_i32 = arith.constant 0 : i32
    %c0_i32_0 = arith.constant 0 : i32
    %c0_i32_1 = arith.constant 0 : i32
    return %arg0, %c0_i32, %c0_i32_0 : i32, i32, i32
  }
  func.func @transform_1(%arg0: i32) -> (i32, i32, i32) {
    %c0_i32 = arith.constant 0 : i32
    %c0_i32_0 = arith.constant 0 : i32
    %c0_i32_1 = arith.constant 0 : i32
    return %arg0, %c0_i32, %c0_i32_0 : i32, i32, i32
  }
  func.func @transform_2(%arg0: i32) -> (i32, i32, i32) {
    %c0_i32 = arith.constant 0 : i32
    %c0_i32_0 = arith.constant 0 : i32
    %c0_i32_1 = arith.constant 0 : i32
    return %arg0, %c0_i32, %c0_i32_0 : i32, i32, i32
  }
  func.func @transform_3(%arg0: i32) -> (i32, i32, i32) {
    %c0_i32 = arith.constant 0 : i32
    %c0_i32_0 = arith.constant 0 : i32
    %c0_i32_1 = arith.constant 0 : i32
    return %arg0, %c0_i32, %c0_i32_0 : i32, i32, i32
  }
  func.func @transform_4(%arg0: i32) -> (i32, i32) {
    %c0_i32 = arith.constant 0 : i32
    %c0_i32_0 = arith.constant 0 : i32
    %c0_i32_1 = arith.constant 0 : i32
    return %c0_i32, %c0_i32_0 : i32, i32
  }
  func.func @transform_5(%arg0: i32) -> (i32, i32, i32) {
    %c0_i32 = arith.constant 0 : i32
    %c0_i32_0 = arith.constant 0 : i32
    %c0_i32_1 = arith.constant 0 : i32
    return %arg0, %c0_i32, %c0_i32_0 : i32, i32, i32
  }
  func.func @transform_6(%arg0: i32) -> (i32, i32, i32) {
    %c0_i32 = arith.constant 0 : i32
    %c0_i32_0 = arith.constant 0 : i32
    %c0_i32_1 = arith.constant 0 : i32
    return %arg0, %c0_i32, %c0_i32_0 : i32, i32, i32
  }
  func.func @transform_7(%arg0: i32) -> (i32, i32, i32) {
    %c0_i32 = arith.constant 0 : i32
    %c0_i32_0 = arith.constant 0 : i32
    %c0_i32_1 = arith.constant 0 : i32
    %c0_i32_2 = arith.constant 0 : i32
    return %c0_i32, %c0_i32_0, %c0_i32_1 : i32, i32, i32
  }
  func.func @transform_8(%arg0: i32) -> (i32, i32, i32) {
    %c0_i32 = arith.constant 0 : i32
    %c0_i32_0 = arith.constant 0 : i32
    %c0_i32_1 = arith.constant 0 : i32
    %c0_i32_2 = arith.constant 0 : i32
    return %c0_i32, %c0_i32_0, %c0_i32_1 : i32, i32, i32
  }
  func.func @transform_9(%arg0: i32) -> (i32, i32, i32) {
    %c0_i32 = arith.constant 0 : i32
    %c0_i32_0 = arith.constant 0 : i32
    %c0_i32_1 = arith.constant 0 : i32
    %c0_i32_2 = arith.constant 0 : i32
    return %c0_i32, %c0_i32_0, %c0_i32_1 : i32, i32, i32
  }
  func.func @transform_10(%arg0: i32) -> (i32, i32, i32) {
    %c0_i32 = arith.constant 0 : i32
    %c0_i32_0 = arith.constant 0 : i32
    %c0_i32_1 = arith.constant 0 : i32
    %c0_i32_2 = arith.constant 0 : i32
    return %c0_i32, %c0_i32_0, %c0_i32_1 : i32, i32, i32
  }
  func.func @transform_11(%arg0: i32) -> (i32, i32, i32) {
    %c0_i32 = arith.constant 0 : i32
    %c0_i32_0 = arith.constant 0 : i32
    %c0_i32_1 = arith.constant 0 : i32
    %c0_i32_2 = arith.constant 0 : i32
    return %c0_i32, %c0_i32_0, %c0_i32_1 : i32, i32, i32
  }
  func.func @transform_12(%arg0: i32) -> (i32, i32, i32) {
    %c0_i32 = arith.constant 0 : i32
    %c0_i32_0 = arith.constant 0 : i32
    %c0_i32_1 = arith.constant 0 : i32
    %c0_i32_2 = arith.constant 0 : i32
    return %c0_i32, %c0_i32_0, %c0_i32_1 : i32, i32, i32
  }
  func.func @transform_13(%arg0: i32) -> (i32, i32, i32) {
    %c0_i32 = arith.constant 0 : i32
    %c0_i32_0 = arith.constant 0 : i32
    %c0_i32_1 = arith.constant 0 : i32
    return %arg0, %c0_i32, %c0_i32_0 : i32, i32, i32
  }
  func.func @transform_14(%arg0: i32) -> (i32, i32, i32) {
    %c0_i32 = arith.constant 0 : i32
    %c0_i32_0 = arith.constant 0 : i32
    %c0_i32_1 = arith.constant 0 : i32
    return %arg0, %c0_i32, %c0_i32_0 : i32, i32, i32
  }
  func.func @transform_15(%arg0: i32) -> (i32, i32, i32) {
    %c0_i32 = arith.constant 0 : i32
    %c0_i32_0 = arith.constant 0 : i32
    %c0_i32_1 = arith.constant 0 : i32
    return %arg0, %c0_i32, %c0_i32_0 : i32, i32, i32
  }
  func.func @transform_16(%arg0: i32) -> (i32, i32, i32) {
    %c0_i32 = arith.constant 0 : i32
    %c0_i32_0 = arith.constant 0 : i32
    %c0_i32_1 = arith.constant 0 : i32
    return %arg0, %c0_i32, %c0_i32_0 : i32, i32, i32
  }
}

</mosaic_0001>

<bundles_post_ra>
// kernel: decoder_layer_forward.1
= control target key start
LH: loop header
LB: loop body
LE: loop exit
PB: predicated region body
PF: predicated region fallthrough
CT: control target
= control target key end

     0   :  { %s9255_s0 = inlined_call_operand.vmem [shape: f32[2,8,32], index: 0, kind: input, shape index: {}]   ;;  %s9256_s1 = inlined_call_operand.vmem [shape: f32[2,8,32], index: 1, kind: input, shape index: {}]   ;;  %s9257_s2 = inlined_call_operand.vmem [shape: f32[2,6,64], index: 2, kind: input, shape index: {}]   ;;  %s9258_s3 = inlined_call_operand.vmem [shape: f32[2,6,32], index: 3, kind: input, shape index: {}]   ;;  %s9259_s4 = inlined_call_operand.vmem [shape: f32[2,32], index: 4, kind: input, shape index: {}]   ;;  %s9260_s5 = inlined_call_operand.vmem [shape: f32[2,16,32], index: 5, kind: input, shape index: {}]   ;;  %s9261_s6 = inlined_call_operand.vmem [shape: f32[2,16,32], index: 6, kind: input, shape index: {}]   ;;  %s9262_s7 = inlined_call_operand.hbm [shape: f32[7,32,96], index: 7, kind: input, shape index: {}]   ;;  %s9263_s8 = inlined_call_operand.vmem [shape: f32[7,32,32], index: 8, kind: input, shape index: {}]   ;;  %s9264_s9 = inlined_call_operand.hbm [shape: f32[7,6,32], index: 9, kind: input, shape index: {}]   ;;  %s9265_s10 = inlined_call_operand.hbm [shape: f32[3,32,64], index: 10, kind: input, shape index: {}]   ;;  %s9266_s11 = inlined_call_operand.hbm [shape: f32[3,64,32], index: 11, kind: input, shape index: {}]   ;;  %s9267_s12 = inlined_call_operand.vmem [shape: f32[3,4,64], index: 12, kind: input, shape index: {}]   ;;  %s9268_s13 = inlined_call_operand.vmem [shape: f32[2,8,32], index: 13, kind: output, shape index: {0}]   ;;  %s9269_s14 = inlined_call_operand.vmem [shape: f32[2,6,64], index: 14, kind: output, shape index: {1}]   ;;  %s9270_s15 = inlined_call_operand.vmem [shape: f32[2,6,16], index: 15, kind: output, shape index: {2}]   ;;  %s9271_s16 = inlined_call_operand.vmem [shape: f32[2,6,16], index: 16, kind: output, shape index: {3}]  }
   0x1   :  { %9272 = sst [smem:[#allocation12_spill]] %s9255_s0 }
   0x2   :  { %22 = vsyncpa [#allocation3], 0 }
   0x3   :  { %23 = vsyncpa [#allocation5], 0 }
   0x4   :  { %24 = vsyncpa [#allocation8], 0  ;;  %s8044_s21 = smov 0  }
   0x5 LB: > { %s8050_s22 = sadd.s32 4294967295, %s7939_s21   ;;  %p6546_p0 = scmp.ge.s32.totalorder %s7939_s21, 1  ;;  %s7939_s21 = sphi %s8044_s21, %s30_s21  }
   0x6   : > { %p442_p1 = scmp.lt.s32.totalorder %s7939_s21, 3  ;;  %p7637_p2 = scmp.eq.s32.totalorder %s8050_s22, 0 }
   0x7   : > { %s7941_s24 = smov [#allocation4]   ;;  %s7942_s26 = smov [#allocation2]  }
   0x8   : > { %p8055_p3 = pnand %p6546_p0, %p442_p1  ;;  %s473_s25 = sshll.u32 %s7941_s24, 4  ;;  %s474_s25 = int_to_ptr.vmem [resolvable:$true] %s473_s25 }
   0x9   : > { %s457_s27 = sshll.u32 %s7942_s26, 4  ;;  %s7943_s29 = smov [#allocation6]   ;;  %s8061_s27 = int_to_ptr.vmem [resolvable:$true] %s457_s27 }
   0xa   : > { %p7624_p4 = pneg %p8055_p3  ;;  %s486_s30 = sshll.u32 %s7943_s29, 4  ;;  %s8069_s30 = int_to_ptr.vmem [resolvable:$true] %s486_s30 }
   0xb   : > { %s7944_s0 = smov [#allocation7]   ;;  %s7828_s18 = scalar_lea.vmem %s474_s25, 896 }
   0xc   : > { %p8065_p5 = pnand %p7637_p2, %p7624_p4  ;;  %s8071_s17 = sshll.u32 %s7944_s0, 4  ;;  %s500_s17 = int_to_ptr.vmem [resolvable:$true] %s8071_s17 }
   0xd   : > { %p7829_p7 = scmp.ne.s32.totalorder %s474_s25, %s7828_s18  ;;  %p7836_p10 = scmp.lt.s32.totalorder %s474_s25, %s474_s25 }
   0xe   : > { %p7819_p6 = pneg %p8065_p5  ;;  %p7837_p11 = scmp.lt.s32.totalorder %s7828_s18, %s7828_s18 }
  0x10   : > { %p7831_p8 = pnand %p7829_p7, %p7819_p6  ;;  %p7838_p12 = por %p7837_p11, %p7836_p10 }
  0x12   : > { %p7832_p9 = pneg %p7831_p8 }
  0x14   : > { %p7839_p13 = pnand %p7838_p12, %p7832_p9 }
  0x16   : > { %7842 = shalt.err (!%p7839_p13)
}
  0x17   : > { %s7945_s19 = smov 128   ;;  %s7946_s20 = smov 8  }
  0x18   : > { %7630 = dma.hbm_to_vmem [thread:$0]  (!%p8065_p5), %s9264_s9, 896, %s474_s25, [#allocation5], %s7945_s19, %s7945_s19, %s7946_s20  }
  0x19   : > { %s7854_s29 = scalar_lea.vmem %s8061_s27, 3584  ;;  %p7862_p7 = scmp.lt.s32.totalorder %s8061_s27, %s8061_s27 }
  0x1a   : > { %p7855_p0 = scmp.ne.s32.totalorder %s8061_s27, %s7854_s29  ;;  %p7863_p8 = scmp.lt.s32.totalorder %s7854_s29, %s7854_s29 }
  0x1c   : > { %p7857_p1 = pnand %p7855_p0, %p7819_p6  ;;  %p7864_p9 = por %p7863_p8, %p7862_p7 }
  0x1e   : > { %p7858_p4 = pneg %p7857_p1 }
  0x20   : > { %p7865_p10 = pnand %p7864_p9, %p7858_p4 }
  0x22   : > { %7868 = shalt.err (!%p7865_p10)
}
  0x23   : > { %7627 = dma.hbm_to_vmem [thread:$0]  (!%p8065_p5), %s9262_s7, 3584, %s8061_s27, [#allocation3], %s7945_s19, %s7945_s19, %s7946_s20  }
  0x24   : > { %s7880_s18 = scalar_lea.vmem %s8069_s30, 1536  ;;  %p7888_p0 = scmp.lt.s32.totalorder %s8069_s30, %s8069_s30 }
  0x25   : > { %p7881_p11 = scmp.ne.s32.totalorder %s8069_s30, %s7880_s18  ;;  %p7889_p1 = scmp.lt.s32.totalorder %s7880_s18, %s7880_s18 }
  0x27   : > { %p7883_p12 = pnand %p7881_p11, %p7819_p6  ;;  %p7890_p4 = por %p7889_p1, %p7888_p0 }
  0x29   : > { %p7884_p13 = pneg %p7883_p12 }
  0x2b   : > { %p7891_p7 = pnand %p7890_p4, %p7884_p13 }
  0x2d   : > { %7894 = shalt.err (!%p7891_p7)
}
  0x2e   : > { %7633 = dma.hbm_to_vmem [thread:$0]  (!%p8065_p5), %s9265_s10, 1536, %s8069_s30, [#allocation5], %s7945_s19, %s7945_s19, %s7946_s20  }
  0x2f   : > { %s7906_s26 = scalar_lea.vmem %s500_s17, 3072  ;;  %p7914_p11 = scmp.lt.s32.totalorder %s500_s17, %s500_s17 }
  0x30   : > { %p7907_p8 = scmp.ne.s32.totalorder %s500_s17, %s7906_s26  ;;  %p7915_p12 = scmp.lt.s32.totalorder %s7906_s26, %s7906_s26 }
  0x32   : > { %p7909_p9 = pnand %p7907_p8, %p7819_p6  ;;  %p7916_p13 = por %p7915_p12, %p7914_p11 }
  0x34   : > { %p7910_p10 = pneg %p7909_p9 }
  0x36   : > { %p7917_p0 = pnand %p7916_p13, %p7910_p10 }
  0x38   : > { %7920 = shalt.err (!%p7917_p0)
}
  0x39   : > { %7636 = dma.hbm_to_vmem [thread:$0]  (!%p8065_p5), %s9266_s11, 3072, %s500_s17, [#allocation8], %s7945_s19, %s7945_s19, %s7946_s20  }
  0x3a   : > { %562 = sbr.rel (%p8055_p3) target bundleno = 12505 (0x30d9), region = 72 }
  0x3f   : > { %7926 = dma.done.wait (%p7637_p2), [#allocation3], 3584  }
  0x40   : > { %7928 = vsyncadd (%p7637_p2), [#allocation3], 4294963712 }
  0x41   : > { %7930 = dma.done.wait (%p7637_p2), [#allocation5], 2432  }
  0x42   : > { %7932 = vsyncadd (%p7637_p2), [#allocation5], 4294964864 }
  0x43   : > { %7934 = dma.done.wait (%p7637_p2), [#allocation8], 3072  }
  0x44   : > { %7936 = vsyncadd (%p7637_p2), [#allocation8], 4294964224  ;;  %p656_p3 = scmp.lt.s32.totalorder %s8050_s22, 1  ;;  %v793_v0 = vlaneseq  ;;  %v7947_v1 = vmov 0.0   ;;  %vm7948_vm0 = vmmov 0   ;;  %s9275_s17 = sld [smem:[#allocation12_spill]] }
  0x45   : > { %7005 = vmatprep.subr.mxu1 %v7947_v1  ;;  %7013 = vmatprep.mubr.msk.f32.mxu1 %vm7948_vm0, %v7947_v1  ;;  %v713_v4 = vld [vmem:[#allocation2 + $0x18] sm:$0xff]  ;;  %v712_v5 = vld [vmem:[#allocation2 + $0x10] sm:$0xff]  ;;  %v711_v8 = vld [vmem:[#allocation2 + $0x8] sm:$0xff]  ;;  %vm719_vm1 = vcmask 261120   ;;  %s7949_s24 = smov 32   ;;  %s7950_s27 = smov 64  }
  0x46   : > { %s9277_s22 = smov (!%p656_p3, %s8050_s22), 1  ;;  %v8151_v2 = vshrl.u32 %v793_v0, 7  ;;  %7006 = vmatpush3.msra.mxu1 %v713_v4  ;;  %v8172_v9 = vld [vmem:[#allocation4] sm:$0x3f]  ;;  %v8188_v14 = vand.u32 127, %v793_v0  ;;  %821 = vrot.lane.b32.xlu1 %v713_v4, %s7950_s27  ;;  %s7951_s26 = smov 96  }
  0x47   : > { %s8154_s23 = sshll.u32 %s9277_s22, 3  ;;  %7007 = vmatprep.subr.mxu1 %v7947_v1  ;;  %v710_v11 = vld [vmem:[#allocation2] sm:$0xff]  ;;  %vm937_vm12 = vcmask 64512   ;;  %s7952_s29 = smov 8   ;;  %vm939_vm14 = vcmask 130048   ;;  %vm941_vm15 = vcmask 195584  }
  0x48   : > { %s663_s18 = scalar_lea.vmem %s9256_s1, %s8154_s23  ;;  %v8165_v3 = vsub.s32 1, %v8151_v2  ;;  %7008 = vmatpush3.msra.mxu1 %v712_v5  ;;  %v8186_v13 = vsub.s32 0, %v8151_v2  ;;  %vm903_vm2 = vcmp.lt.s32.totalorder %v8188_v14, 8  ;;  %vm907_vm3 = vcmp.ge.s32.totalorder %v8188_v14, 8  ;;  %s7953_s0 = smov 16  }
  0x49   : > { %v8169_v7 = vld [vmem:[%s663_s18] sm:$0xff]  ;;  %7009 = vmatprep.subr.mxu1 %v7947_v1  ;;  %v8195_v18 = vsel %vm903_vm2, 1.0, %v7947_v1  ;;  %vm908_vm4 = vcmp.lt.s32.totalorder %v8188_v14, 16  ;;  %vm912_vm5 = vcmp.ge.s32.totalorder %v8188_v14, 16  ;;  %vm913_vm6 = vcmp.lt.s32.totalorder %v8188_v14, 24  ;;  %s7954_s28 = smov 24  }
  0x4a   : > { %s659_s19 = scalar_lea.vmem %s9275_s17, %s8154_s23  ;;  %v801_v10 = vrot.slane %v8172_v9, %v8165_v3  ;;  %7010 = vmatpush3.msra.mxu1 %v711_v8  ;;  %v796_v15 = vrot.slane %v8172_v9, %v8186_v13  ;;  %819 = vrot.lane.b32.xlu1 %v712_v5, %s7950_s27  ;;  %vm909_vm7 = vmand %vm907_vm3, %vm908_vm4  ;;  %vm917_vm9 = vcmp.ge.s32.totalorder %v8188_v14, 24  ;;  %vm918_vm10 = vcmp.lt.s32.totalorder %v8188_v14, 32  ;;  %s6716_s30 = sshll.u32 %s9277_s22, 4 }
  0x4b   : > { %v8167_v6 = vld [vmem:[%s659_s19] sm:$0xff]  ;;  %7011 = vmatprep.subr.mxu1 %v7947_v1  ;;  %vm914_vm8 = vmand %vm912_vm5, %vm913_vm6  ;;  %v8210_v24 = vsel %vm909_vm7, 1.0, %v7947_v1  ;;  %v8243_v5 = vsub.s32 2, %v8151_v2  ;;  %vm924_vm13 = vcmp.eq.s32.totalorder %v8151_v2, %v8188_v14  ;;  %s8320_s20 = scalar_lea.vmem %s9260_s5, %s6716_s30  ;;  %vm2306_vm2 = vcmask 1045504   ;;  %s7955_s17 = smov 12  }
  0x4c   : > { %v709_v12 = vadd.f32 %v8169_v7, %v8167_v6  ;;  %803 = vrot.lane.b32.xlu0 %v801_v10, %s7949_s24  ;;  %7012 = vmatpush3.msra.mxu1 %v710_v11  ;;  %v8214_v25 = vsel %vm914_vm8, 1.0, %v7947_v1  ;;  %vm919_vm11 = vmand %vm917_vm9, %vm918_vm10  ;;  %vm2183_vm3 = vcmask 523264   ;;  %vm2522_vm4 = vcmask 1043456   ;;  %s7956_s19 = smov 36   ;;  %s685_s22 = scalar_lea.vmem %s9268_s13, %s8154_s23 }
  0x4d   : > { %7016 = vmatprep.subr.mxu1 %v7947_v1  ;;  %v8221_v28 = vsel %vm919_vm11, 1.0, %v7947_v1  ;;  %v810_v10 = vrot.slane %v8172_v9, %v8243_v5  ;;  %vm2545_vm5 = vcmask 97280   ;;  %vm2550_vm7 = vcmask 293888  }
  0x4e   : > { %7014 = vmatmul.mubr.msk.f32.vlgmr.msra.gmra.mxu1 %vm719_vm1, %v709_v12  ;;  %815 = vrot.lane.b32.xlu1 %v710_v11, %s7950_s27  ;;  %vm2884_vm8 = vcmask 392192   ;;  %vm3370_vm9 = vcmask 1041408   ;;  %vm3378_vm10 = vcmask 48128   ;;  %vm3381_vm11 = vcmask 146432  }
  0x4f   : > { %7024 = vmatprep.mubr.msk.f32.mxu1 %vm7948_vm0, %v7947_v1 }
  0xb8   : > { %v822_v30 = vpop.permute.xlu1 %821 }
  0xb9   : > { %7017 = vmatpush3.msra.mxu1 %v822_v30 }
  0xba   : > { %7018 = vmatprep.subr.mxu1 %v7947_v1 }
  0xbc   : > { %v820_v31 = vpop.permute.xlu1 %819 }
  0xbd   : > { %7019 = vmatpush3.msra.mxu1 %v820_v31 }
  0xbe   : > { %v804_v16 = vpop.permute.xlu0 %803  ;;  %7020 = vmatprep.subr.mxu1 %v7947_v1 }
  0xc0   : > { %v816_v33 = vpop.permute.xlu1 %815 }
 0x10e   : > { %v789_v17 = vpop.f32.mrf.mxu1 }
 0x10f   : > { %v797_v19 = vadd.f32 %v796_v15, %v789_v17  ;;  %v806_v20 = vadd.f32 %v804_v16, %v789_v17  ;;  %v8251_v15 = vsel %vm924_vm13, 1.0, %v7947_v1  ;;  %vm6294_vm13 = vcmask 128000  }
 0x110   : > { %v7015_v21 = vpop.f32.mrf.mxu1 }
 0x111   : > { %948 = vrot.lane.b32.xlu0 %v806_v20, %s7951_s26  ;;  %v943_v22 = vmul.f32 %v8195_v18, %v797_v19  ;;  %v944_v26 = vmul.f32 %v8210_v24, %v797_v19  ;;  %v945_v27 = vmul.f32 %v8214_v25, %v797_v19  ;;  %v946_v29 = vmul.f32 %v8221_v28, %v797_v19 }
 0x113   : > { %7029 = vmatprep.mubr.msk.f32.mxu0 %vm719_vm1, %v943_v22 }
 0x115   : > { %817 = vrot.lane.b32.xlu0 %v711_v8, %s7950_s27 }
 0x183   : > { %v949_v23 = vpop.permute.xlu0 %948 }
 0x184   : > { %7027 = vmatprep.subr.msk.mxu0 %vm719_vm1, %v949_v23 }
 0x185   : > { %7028 = vmatpush3.xpose.msk.msra.mxu0 %vm719_vm1, %v949_v23 }
 0x186   : > { %7043 = vmatprep.subr.mxu0 %v7947_v1 }
 0x187   : > { %v818_v32 = vpop.permute.xlu0 %817 }
 0x188   : > { %7030 = vmatmul.mubr.msk.f32.vlgmr.msra.gmra.mxu0 %vm719_vm1, %v944_v26  ;;  %7021 = vmatpush3.msra.mxu1 %v818_v32  ;;  %v717_v32 = vld [vmem:[%s9263_s8 + $0x18] sm:$0xff] }
 0x189   : > { %7032 = vmatprep.mubr.msk.f32.mxu0 %vm719_vm1, %v945_v27  ;;  %7022 = vmatprep.subr.mxu1 %v7947_v1 }
 0x18a   : > { %7023 = vmatpush3.msra.mxu1 %v816_v33  ;;  %v716_v33 = vld [vmem:[%s9263_s8 + $0x10] sm:$0xff] }
 0x18b   : > { %7025 = vmatmul.mubr.msk.f32.vlgmr.msra.gmra.mxu1 %vm719_vm1, %v8167_v6 }
 0x18c   : > { %7033 = vmatmul.mubr.msk.f32.gmra.mxu0 %vm719_vm1, %v946_v29 }
 0x18d   : > { %7051 = vmatprep.mubr.msk.f32.mxu0 %vm7948_vm0, %v7947_v1 }
 0x248   : > { %v7031_v34 = vpop.f32.mrf.mxu0 }
 0x249   : > { %v1050_v35 = vmul.f32 0.35355338, %v7031_v34  ;;  %v715_v34 = vld [vmem:[%s9263_s8 + $0x8] sm:$0xff] }
 0x24a   : > { %v1030_v36 = vpop.f32.mrf.mxu0 }
 0x24b   : > { %v1049_v37 = vmul.f32 0.35355338, %v1030_v36  ;;  %v1056_v38 = vsel %vm937_vm12, %v1050_v35, -inf  ;;  %v896_v8 = vpop.f32.mrf.mxu1 }
 0x24c   : > { %1057 = vmax.xlane.f32.xlu1 %v1056_v38  ;;  %v7034_v39 = vpop.f32.mrf.mxu0  ;;  %v897_v12 = vadd.f32 %v896_v8, %v810_v10 }
 0x24d   : > { %v1053_v40 = vsel %vm937_vm12, %v1049_v37, -inf  ;;  %v1052_v43 = vmul.f32 0.35355338, %v7034_v39  ;;  %v7026_v11 = vpop.f32.mrf.mxu1 }
 0x24e   : > { %1054 = vmax.xlane.f32.xlu0 %v1053_v40  ;;  %v1040_v41 = vpop.f32.mrf.mxu0  ;;  %7035 = vmatprep.subr.mxu1 %v897_v12 }
 0x24f   : > { %v1051_v42 = vmul.f32 0.35355338, %v1040_v41  ;;  %v1062_v45 = vsel %vm937_vm12, %v1052_v43, -inf  ;;  %7036 = vmatpush3.msra.mxu1 %v897_v12 }
 0x250   : > { %7054 = vmatprep.subr.mxu1 %v7947_v1 }
 0x251   : > { %v1059_v44 = vsel %vm937_vm12, %v1051_v42, -inf }
 0x252   : > { %1060 = vmax.xlane.f32.xlu0 %v1059_v44 }
 0x256   : > { %1063 = vmax.xlane.f32.xlu0 %v1062_v45 }
 0x2d5   : > { %v1058_v46 = vpop.xlane.xlu1 %1057 }
 0x2d6   : > { %v1066_v47 = vsub.f32 %v1050_v35, %v1058_v46 }
 0x2d7   : > { %v1055_v48 = vpop.xlane.xlu0 %1054 }
 0x2d8   : > { %v1071_v49 = vmul.f32 1.442695, %v1066_v47  ;;  %v1065_v50 = vsub.f32 %v1049_v37, %v1055_v48 }
 0x2da   : > { %7681 = vpow2.f32 %v1071_v49  ;;  %v1069_v51 = vmul.f32 1.442695, %v1065_v50  ;;  %v714_v49 = vld [vmem:[%s9263_s8] sm:$0xff] }
 0x2db   : > { %v1061_v52 = vpop.xlane.xlu0 %1060 }
 0x2dc   : > { %7683 = vpow2.f32 %v1069_v51  ;;  %v1067_v53 = vsub.f32 %v1051_v42, %v1061_v52  ;;  %v1378_v52 = vld [vmem:[#allocation2 + $0x38] sm:$0xff] }
 0x2de   : > { %v1073_v54 = vmul.f32 1.442695, %v1067_v53  ;;  %v8303_v53 = vsub.s32 3, %v8151_v2 }
 0x2df   : > { %v1064_v55 = vpop.xlane.xlu0 %1063 }
 0x2e0   : > { %7685 = vpow2.f32 %v1073_v54  ;;  %v1068_v56 = vsub.f32 %v1052_v43, %v1064_v55  ;;  %v1274_v54 = vrot.slane %v8172_v9, %v8303_v53 }
 0x2e2   : > { %v1075_v57 = vmul.f32 1.442695, %v1068_v56 }
 0x2e4   : > { %7687 = vpow2.f32 %v1075_v57 }
 0x2e7   : > { %v7682_v58 = vpop.eup %7681 }
 0x2e8   : > { %v1080_v59 = vsel %vm937_vm12, %v7682_v58, 0.0 }
 0x2e9   : > { %v7684_v60 = vpop.eup %7683  ;;  %1081 = vadd.xlane.f32.xlu0 %v1080_v59 }
 0x2ea   : > { %v1077_v61 = vsel %vm937_vm12, %v7684_v60, 0.0 }
 0x2eb   : > { %1078 = vadd.xlane.f32.xlu1 %v1077_v61  ;;  %v1376_v61 = vld [vmem:[#allocation2 + $0x28] sm:$0xff] }
 0x2ed   : > { %v7686_v62 = vpop.eup %7685 }
 0x2ee   : > { %v1083_v63 = vsel %vm937_vm12, %v7686_v62, 0.0 }
 0x2ef   : > { %1084 = vadd.xlane.f32.xlu1 %v1083_v63 }
 0x2f1   : > { %v7688_v0 = vpop.eup %7687 }
 0x2f2   : > { %v1086_v4 = vsel %vm937_vm12, %v7688_v0, 0.0 }
 0x2f3   : > { %1087 = vadd.xlane.f32.xlu0 %v1086_v4 }
 0x300   : > { %928 = vrot.lane.b32.xlu1 %v8251_v15, %s7952_s29  ;;  %s681_s29 = scalar_lea.vmem %s9261_s6, %s6716_s30  ;;  %s8428_s30 = scalar_lea.vmem %s9258_s3, %s8154_s23 }
 0x304   : > { %934 = vrot.lane.b32.xlu1 %v8251_v15, %s7954_s28 }
 0x309   : > { %931 = vrot.lane.b32.xlu0 %v8251_v15, %s7953_s0 }
 0x30d   : > { %1477 = vrot.lane.b32.xlu0 %v1378_v52, %s7951_s26 }
 0x372   : > { %v1082_v16 = vpop.xlane.xlu0 %1081 }
 0x373   : > { %7689 = vrcp.f32 %v1082_v16  ;;  %v703_v16 = vld [vmem:[%s8320_s20] sm:$0xff] }
 0x374   : > { %v1079_v17 = vpop.xlane.xlu1 %1078 }
 0x375   : > { %7691 = vrcp.f32 %v1079_v17  ;;  %v705_v17 = vld [vmem:[%s681_s29] sm:$0xff] }
 0x378   : > { %v1085_v19 = vpop.xlane.xlu1 %1084 }
 0x379   : > { %7693 = vrcp.f32 %v1085_v19  ;;  %v8327_v19 = vadd.f32 %v705_v17, %v703_v16 }
 0x37c   : > { %v1088_v20 = vpop.xlane.xlu0 %1087  ;;  %v929_v38 = vpop.permute.xlu1 %928 }
 0x37d   : > { %7695 = vrcp.f32 %v1088_v20  ;;  %v938_v41 = vsel %vm937_vm12, %v8251_v15, %v929_v38 }
 0x380   : > { %v7690_v21 = vpop.eup %7689  ;;  %v932_v43 = vpop.permute.xlu0 %931 }
 0x381   : > { %v1094_v26 = vmul.f32 %v7690_v21, %v7682_v58  ;;  %v940_v45 = vsel %vm939_vm14, %v938_v41, %v932_v43  ;;  %v8282_v46 = vpop.permute.xlu1 %934  ;;  %v704_v21 = vld [vmem:[%s8320_s20 + $0x8] sm:$0xff] }
 0x382   : > { %v7692_v22 = vpop.eup %7691  ;;  %v8289_v48 = vsel %vm941_vm15, %v940_v45, %v8282_v46 }
 0x383   : > { %v1093_v23 = vmul.f32 %v7692_v22, %v7684_v60  ;;  %v1377_v60 = vld [vmem:[#allocation2 + $0x30] sm:$0xff]  ;;  %v706_v22 = vld [vmem:[%s681_s29 + $0x8] sm:$0xff]  ;;  %s667_s29 = scalar_lea.vmem %s9257_s2, %s8154_s23 }
 0x385   : > { %7037 = vmatprep.mubr.msk.f32.mxu1 %vm937_vm12, %v1093_v23 }
 0x386   : > { %v7694_v27 = vpop.eup %7693  ;;  %7038 = vmatmul.mubr.msk.f32.vlgmr.msra.gmra.mxu1 %vm937_vm12, %v1094_v26 }
 0x387   : > { %v1095_v29 = vmul.f32 %v7694_v27, %v7686_v62  ;;  %7055 = vmatpush3.msra.mxu1 %v717_v32  ;;  %v1375_v62 = vld [vmem:[#allocation2 + $0x20] sm:$0xff]  ;;  %v8334_v27 = vadd.f32 %v706_v22, %v704_v21 }
 0x388   : > { %7056 = vmatprep.subr.mxu1 %v7947_v1 }
 0x389   : > { %7040 = vmatprep.mubr.msk.f32.mxu1 %vm937_vm12, %v1095_v29  ;;  %7057 = vmatpush3.msra.mxu1 %v716_v33 }
 0x38a   : > { %v7696_v30 = vpop.eup %7695  ;;  %7058 = vmatprep.subr.mxu1 %v7947_v1 }
 0x38b   : > { %v1096_v31 = vmul.f32 %v7696_v30, %v7688_v0  ;;  %7059 = vmatpush3.msra.mxu1 %v715_v34  ;;  %v8339_v30 = vsub.s32 4, %v8151_v2 }
 0x38c   : > { %7060 = vmatprep.subr.mxu1 %v7947_v1 }
 0x38d   : > { %7041 = vmatmul.mubr.msk.f32.gmra.mxu1 %vm937_vm12, %v1096_v31  ;;  %v8342_v31 = vsub.s32 5, %v8151_v2  ;;  %v1366_v32 = vrot.slane %v8172_v9, %v8339_v30 }
 0x38e   : > { %7062 = vmatprep.mubr.msk.f32.mxu1 %vm7948_vm0, %v7947_v1  ;;  %7061 = vmatpush3.msra.mxu1 %v714_v49 }
 0x446   : > { %v7039_v35 = vpop.f32.mrf.mxu1 }
 0x447   : > { %v1195_v44 = vmul.f32 %v7039_v35, %v8210_v24  ;;  %v1371_v35 = vrot.slane %v8172_v9, %v8342_v31 }
 0x448   : > { %v1175_v36 = vpop.f32.mrf.mxu1 }
 0x449   : > { %v1194_v47 = vmul.f32 %v8195_v18, %v1175_v36 }
 0x44d   : > { %v7042_v37 = vpop.f32.mrf.mxu1 }
 0x44e   : > { %v1197_v39 = vmul.f32 %v7042_v37, %v8221_v28 }
 0x44f   : > { %v1185_v40 = vpop.f32.mrf.mxu1 }
 0x450   : > { %v1196_v42 = vmul.f32 %v8214_v25, %v1185_v40  ;;  %7044 = vmatpush3.msra.mxu0 %v1197_v39  ;;  %v8354_v39 = vld [vmem:[#allocation4 + $0x8] sm:$0x3f] }
 0x451   : > { %7045 = vmatprep.subr.mxu0 %v7947_v1  ;;  %v1466_v40 = vrot.slane %v8354_v39, %v8165_v3 }
 0x452   : > { %7046 = vmatpush3.msra.mxu0 %v1196_v42 }
 0x453   : > { %7047 = vmatprep.subr.mxu0 %v7947_v1 }
 0x454   : > { %7048 = vmatpush3.msra.mxu0 %v1195_v44 }
 0x455   : > { %7049 = vmatprep.subr.mxu0 %v7947_v1 }
 0x456   : > { %7050 = vmatpush3.msra.mxu0 %v1194_v47 }
 0x457   : > { %7052 = vmatmul.mubr.msk.f32.vlgmr.msra.gmra.mxu0 %vm719_vm1, %v8289_v48  ;;  %7065 = vmatprep.subr.mxu0 %v7947_v1 }
 0x458   : > { %7073 = vmatprep.mubr.msk.f32.mxu0 %vm7948_vm0, %v7947_v1  ;;  %7066 = vmatpush3.msra.mxu0 %v1378_v52 }
 0x459   : > { %7067 = vmatprep.subr.mxu0 %v7947_v1 }
 0x45a   : > { %7068 = vmatpush3.msra.mxu0 %v1377_v60 }
 0x45b   : > { %7069 = vmatprep.subr.mxu0 %v7947_v1 }
 0x45c   : > { %7070 = vmatpush3.msra.mxu0 %v1376_v61 }
 0x45d   : > { %7071 = vmatprep.subr.mxu0 %v7947_v1 }
 0x45e   : > { %7072 = vmatpush3.msra.mxu0 %v1375_v62 }
 0x517   : > { %v1267_v50 = vpop.f32.mrf.mxu0 }
 0x518   : > { %7063 = vmatmul.mubr.msk.f32.vlgmr.msra.gmra.mxu1 %vm719_vm1, %v1267_v50 }
 0x519   : > { %v7053_v51 = vpop.f32.mrf.mxu0  ;;  %7084 = vmatprep.mubr.msk.f32.mxu1 %vm719_vm1, %v8327_v19 }
 0x5d8   : > { %v1344_v55 = vpop.f32.mrf.mxu1 }
 0x5d9   : > { %v1345_v56 = vadd.f32 %v1344_v55, %v1274_v54 }
 0x5da   : > { %v7064_v57 = vpop.f32.mrf.mxu1 }
 0x5db   : > { %v1348_v58 = vadd.f32 %v1345_v56, %v8167_v6  ;;  %v1478_v6 = vpop.permute.xlu0 %1477 }
 0x5dc   : > { %7076 = vmatprep.subr.mxu1 %v1478_v6 }
 0x5dd   : > { %v1349_v59 = vsel %vm719_vm1, %v1348_v58, 0.0  ;;  %7077 = vmatpush3.msra.mxu1 %v1478_v6 }
 0x5de   : > { %1350 = vadd.xlane.f32.xlu1 %v1349_v59 }
 0x5ef   : > { %1475 = vrot.lane.b32.xlu1 %v1377_v60, %s7951_s26 }
 0x5f3   : > { %1473 = vrot.lane.b32.xlu1 %v1376_v61, %s7951_s26 }
 0x5f7   : > { %1574 = vrot.lane.b32.xlu1 %v1378_v52, %s7950_s27 }
 0x5fb   : > { %1570 = vrot.lane.b32.xlu1 %v1376_v61, %s7950_s27 }
 0x667   : > { %v1351_v63 = vpop.xlane.xlu1 %1350 }
 0x668   : > { %v1353_v0 = vmul.f32 0.03125, %v1351_v63 }
 0x66a   : > { %v1354_v4 = vsub.f32 %v1348_v58, %v1353_v0 }
 0x66b   : > { %v1476_v11 = vpop.permute.xlu1 %1475 }
 0x66c   : > { %v1355_v8 = vmul.f32 %v1354_v4, %v1354_v4  ;;  %7078 = vmatprep.subr.mxu1 %v1476_v11 }
 0x66d   : > { %7079 = vmatpush3.msra.mxu1 %v1476_v11 }
 0x66e   : > { %v1356_v10 = vsel %vm719_vm1, %v1355_v8, 0.0 }
 0x66f   : > { %1357 = vadd.xlane.f32.xlu0 %v1356_v10  ;;  %v1474_v12 = vpop.permute.xlu1 %1473 }
 0x670   : > { %7080 = vmatprep.subr.mxu1 %v1474_v12 }
 0x671   : > { %7081 = vmatpush3.msra.mxu1 %v1474_v12 }
 0x673   : > { %v1575_v54 = vpop.permute.xlu1 %1574 }
 0x674   : > { %7087 = vmatprep.subr.mxu0 %v1575_v54 }
 0x677   : > { %v1571_v56 = vpop.permute.xlu1 %1570 }
 0x685   : > { %1471 = vrot.lane.b32.xlu0 %v1375_v62, %s7951_s26 }
 0x689   : > { %1572 = vrot.lane.b32.xlu0 %v1377_v60, %s7950_s27 }
 0x68d   : > { %1568 = vrot.lane.b32.xlu0 %v1375_v62, %s7950_s27 }
 0x6f8   : > { %v1358_v20 = vpop.xlane.xlu0 %1357 }
 0x6f9   : > { %v1359_v23 = vmul.f32 0.03125, %v1358_v20 }
 0x6fb   : > { %v1360_v26 = vadd.f32 1e-05, %v1359_v23 }
 0x6fc   : > { %v1472_v29 = vpop.permute.xlu0 %1471 }
 0x6fd   : > { %7697 = vrsqrt.f32 %v1360_v26  ;;  %7082 = vmatprep.subr.mxu1 %v1472_v29 }
 0x6fe   : > { %7083 = vmatpush3.msra.mxu1 %v1472_v29 }
 0x6ff   : > { %7085 = vmatmul.mubr.msk.f32.vlgmr.msra.gmra.mxu1 %vm719_vm1, %v8334_v27 }
 0x700   : > { %v1573_v55 = vpop.permute.xlu0 %1572 }
 0x704   : > { %v1569_v57 = vpop.permute.xlu0 %1568 }
 0x70a   : > { %v7698_v33 = vpop.eup %7697 }
 0x70b   : > { %v1362_v34 = vmul.f32 %v7698_v33, %v1354_v4 }
 0x70d   : > { %v1367_v36 = vmul.f32 %v1366_v32, %v1362_v34 }
 0x70f   : > { %v8348_v37 = vadd.f32 %v1371_v35, %v1367_v36 }
 0x711   : > { %v1373_v38 = vadd.f32 %v8348_v37, %v8169_v7  ;;  %v1389_v7 = vrot.slane %v8354_v39, %v8186_v13 }
 0x713   : > { %7074 = vmatmul.mubr.msk.f32.vlgmr.msra.gmra.mxu0 %vm719_vm1, %v1373_v38 }
 0x714   : > { %7095 = vmatprep.mubr.msk.f32.mxu0 %vm719_vm1, %v703_v16  ;;  %7088 = vmatpush3.msra.mxu0 %v1575_v54 }
 0x715   : > { %7089 = vmatprep.subr.mxu0 %v1573_v55 }
 0x716   : > { %7090 = vmatpush3.msra.mxu0 %v1573_v55 }
 0x717   : > { %7091 = vmatprep.subr.mxu0 %v1571_v56 }
 0x718   : > { %7092 = vmatpush3.msra.mxu0 %v1571_v56 }
 0x719   : > { %7093 = vmatprep.subr.mxu0 %v1569_v57 }
 0x71a   : > { %7094 = vmatpush3.msra.mxu0 %v1569_v57 }
 0x71b   : > { %7096 = vmatmul.mubr.msk.f32.vlgmr.msra.gmra.mxu0 %vm719_vm1, %v704_v21 }
 0x7bf   : > { %v7086_v41 = vpop.f32.mrf.mxu1 }
 0x7c0   : > { %v1561_v42 = vadd.f32 %v7086_v41, %v1466_v40 }
 0x7c1   : > { %v1555_v43 = vpop.f32.mrf.mxu1 }
 0x7c2   : > { %7098 = vmatprep.subr.msk.mxu1 %vm719_vm1, %v1561_v42  ;;  %v1556_v9 = vadd.f32 %v1555_v43, %v1466_v40 }
 0x7c3   : > { %7099 = vmatpush3.xpose.msk.msra.mxu1 %vm719_vm1, %v1561_v42 }
 0x7c4   : > { %7100 = vmatprep.subr.msk.mxu1 %vm719_vm1, %v1556_v9 }
 0x7c7   : > { %7101 = vmatpush3.xpose.msk.msra.mxu1 %vm719_vm1, %v1556_v9 }
 0x7c8   : > { %7118 = vmatprep.subr.mxu1 %v7947_v1 }
 0x7d3   : > { %v1459_v44 = vpop.f32.mrf.mxu0 }
 0x7d4   : > { %v1460_v45 = vadd.f32 %v1459_v44, %v1389_v7  ;;  %v1567_v7 = vrot.slane %v8354_v39, %v8243_v5 }
 0x7d5   : > { %v7075_v47 = vpop.f32.mrf.mxu0 }
 0x7d6   : > { %v1662_v49 = vmul.f32 %v8210_v24, %v1460_v45  ;;  %v1661_v50 = vmul.f32 %v8195_v18, %v1460_v45  ;;  %v1663_v51 = vmul.f32 %v8214_v25, %v1460_v45  ;;  %v1664_v52 = vmul.f32 %v8221_v28, %v1460_v45 }
 0x7d8   : > { %7102 = vmatprep.mubr.msk.f32.mxu1 %vm719_vm1, %v1661_v50 }
 0x7d9   : > { %7103 = vmatmul.mubr.msk.f32.vlgmr.msra.gmra.mxu1 %vm719_vm1, %v1662_v49 }
 0x7da   : > { %7105 = vmatprep.mubr.msk.f32.mxu1 %vm719_vm1, %v1663_v51 }
 0x7db   : > { %v7097_v44 = vpop.f32.mrf.mxu0 }
 0x7dc   : > { %v1658_v45 = vadd.f32 %v7097_v44, %v1567_v7 }
 0x7dd   : > { %7106 = vmatmul.mubr.msk.f32.gmra.mxu1 %vm719_vm1, %v1664_v52  ;;  %v1652_v47 = vpop.f32.mrf.mxu0 }
 0x7de   : > { %7126 = vmatprep.mubr.msk.f32.mxu1 %vm7948_vm0, %v7947_v1  ;;  %v1653_v49 = vadd.f32 %v1652_v47, %v1567_v7  ;;  %7108 = vmatprep.subr.mxu0 %v1658_v45 }
 0x7df   : > { %7109 = vmatpush3.msra.mxu0 %v1658_v45 }
 0x7e0   : > { %7110 = vmatprep.subr.mxu0 %v1653_v49 }
 0x7e1   : > { %7111 = vmatpush3.msra.mxu0 %v1653_v49 }
 0x7e2   : > { %7129 = vmatprep.subr.mxu0 %v7947_v1 }
 0x899   : > { %v7104_v58 = vpop.f32.mrf.mxu1 }
 0x89a   : > { %v1769_v59 = vmul.f32 0.35355338, %v7104_v58 }
 0x89b   : > { %v1749_v60 = vpop.f32.mrf.mxu1 }
 0x89c   : > { %v1768_v61 = vmul.f32 0.35355338, %v1749_v60  ;;  %v1775_v62 = vsel %vm939_vm14, %v1769_v59, -inf }
 0x89d   : > { %1776 = vmax.xlane.f32.xlu0 %v1775_v62  ;;  %v7107_v6 = vpop.f32.mrf.mxu1 }
 0x89e   : > { %v1771_v63 = vmul.f32 0.35355338, %v7107_v6  ;;  %v1772_v0 = vsel %vm939_vm14, %v1768_v61, -inf  ;;  %v6590_v6 = vld [vmem:[%s9263_s8 + $0x38] sm:$0xff] }
 0x89f   : > { %1773 = vmax.xlane.f32.xlu1 %v1772_v0  ;;  %v1759_v4 = vpop.f32.mrf.mxu1  ;;  %v6588_v0 = vld [vmem:[%s9263_s8 + $0x28] sm:$0xff] }
 0x8a0   : > { %v1770_v8 = vmul.f32 0.35355338, %v1759_v4  ;;  %v1781_v10 = vsel %vm939_vm14, %v1771_v63, -inf }
 0x8a2   : > { %v1778_v11 = vsel %vm939_vm14, %v1770_v8, -inf }
 0x8a3   : > { %1782 = vmax.xlane.f32.xlu1 %v1781_v10  ;;  %1779 = vmax.xlane.f32.xlu0 %v1778_v11 }
 0x926   : > { %v1777_v12 = vpop.xlane.xlu0 %1776 }
 0x927   : > { %v1785_v16 = vsub.f32 %v1769_v59, %v1777_v12 }
 0x928   : > { %v1774_v17 = vpop.xlane.xlu1 %1773 }
 0x929   : > { %v1790_v20 = vmul.f32 1.442695, %v1785_v16  ;;  %v1784_v21 = vsub.f32 %v1768_v61, %v1774_v17 }
 0x92b   : > { %7699 = vpow2.f32 %v1790_v20  ;;  %v1788_v22 = vmul.f32 1.442695, %v1784_v21  ;;  %v6587_v21 = vld [vmem:[%s9263_s8 + $0x20] sm:$0xff] }
 0x92c   : > { %v1783_v23 = vpop.xlane.xlu1 %1782  ;;  %v1780_v26 = vpop.xlane.xlu0 %1779 }
 0x92d   : > { %7701 = vpow2.f32 %v1788_v22  ;;  %v1787_v29 = vsub.f32 %v1771_v63, %v1783_v23  ;;  %v1786_v32 = vsub.f32 %v1770_v8, %v1780_v26  ;;  %v6589_v63 = vld [vmem:[%s9263_s8 + $0x30] sm:$0xff]  ;;  %v1990_v26 = vrot.slane %v8354_v39, %v8303_v53 }
 0x92f   : > { %v1794_v33 = vmul.f32 1.442695, %v1787_v29  ;;  %v1792_v34 = vmul.f32 1.442695, %v1786_v32 }
 0x931   : > { %7703 = vpow2.f32 %v1794_v33 }
 0x932   : > { %7705 = vpow2.f32 %v1792_v34 }
 0x938   : > { %v7700_v35 = vpop.eup %7699 }
 0x939   : > { %v1799_v36 = vsel %vm939_vm14, %v7700_v35, 0.0 }
 0x93a   : > { %v7702_v38 = vpop.eup %7701  ;;  %1800 = vadd.xlane.f32.xlu1 %v1799_v36  ;;  %v702_v36 = vld [vmem:[%s9259_s4] sm:$0x3] }
 0x93b   : > { %v1796_v40 = vsel %vm939_vm14, %v7702_v38, 0.0 }
 0x93c   : > { %1797 = vadd.xlane.f32.xlu0 %v1796_v40  ;;  %v8448_v40 = vld [vmem:[%s667_s29] sm:$0x3f]  ;;  %s693_s29 = scalar_lea.vmem %s9270_s15, %s8154_s23 }
 0x93e   : > { %v7704_v41 = vpop.eup %7703 }
 0x93f   : > { %v7706_v42 = vpop.eup %7705  ;;  %v1805_v43 = vsel %vm939_vm14, %v7704_v41, 0.0 }
 0x940   : > { %1806 = vadd.xlane.f32.xlu1 %v1805_v43  ;;  %v1802_v9 = vsel %vm939_vm14, %v7706_v42, 0.0 }
 0x941   : > { %1803 = vadd.xlane.f32.xlu0 %v1802_v9 }
 0x9c3   : > { %v1801_v50 = vpop.xlane.xlu1 %1800 }
 0x9c4   : > { %7707 = vrcp.f32 %v1801_v50  ;;  %v2091_v50 = vld [vmem:[#allocation6 + $0x18] sm:$0xff] }
 0x9c5   : > { %v1798_v51 = vpop.xlane.xlu0 %1797 }
 0x9c6   : > { %7709 = vrcp.f32 %v1798_v51  ;;  %v2090_v51 = vld [vmem:[#allocation6 + $0x10] sm:$0xff] }
 0x9c9   : > { %v1807_v52 = vpop.xlane.xlu1 %1806 }
 0x9ca   : > { %7711 = vrcp.f32 %v1807_v52  ;;  %v1804_v54 = vpop.xlane.xlu0 %1803  ;;  %v2089_v52 = vld [vmem:[#allocation6 + $0x8] sm:$0xff] }
 0x9cb   : > { %7713 = vrcp.f32 %v1804_v54  ;;  %v2088_v54 = vld [vmem:[#allocation6] sm:$0xff] }
 0x9d1   : > { %v7708_v55 = vpop.eup %7707 }
 0x9d2   : > { %v1813_v58 = vmul.f32 %v7708_v55, %v7700_v35  ;;  %v8455_v55 = vld [vmem:[#allocation2 + $0x58] sm:$0xff] }
 0x9d3   : > { %v7710_v56 = vpop.eup %7709 }
 0x9d4   : > { %v1812_v57 = vmul.f32 %v7710_v56, %v7702_v38  ;;  %v2295_v38 = vrot.slane %v702_v36, %v8165_v3  ;;  %v2315_v56 = vld [vmem:[#allocation2 + $0x40] sm:$0xff] }
 0x9d6   : > { %7112 = vmatprep.mubr.msk.f32.mxu0 %vm939_vm14, %v1812_v57  ;;  %v8460_v57 = vld [vmem:[#allocation4 + $0x10] sm:$0x3f] }
 0x9d7   : > { %v7712_v59 = vpop.eup %7711  ;;  %7113 = vmatmul.mubr.msk.f32.vlgmr.msra.gmra.mxu0 %vm939_vm14, %v1813_v58  ;;  %v2099_v58 = vld [vmem:[#allocation7 + $0x38] sm:$0xff] }
 0x9d8   : > { %v7714_v60 = vpop.eup %7713  ;;  %v1815_v61 = vmul.f32 %v7712_v59, %v7704_v41  ;;  %7130 = vmatpush3.msra.mxu0 %v6590_v6  ;;  %v2098_v59 = vld [vmem:[#allocation7 + $0x30] sm:$0xff]  ;;  %v2095_v6 = vld [vmem:[#allocation7 + $0x18] sm:$0xff] }
 0x9d9   : > { %v1814_v62 = vmul.f32 %v7714_v60, %v7706_v42  ;;  %7131 = vmatprep.subr.mxu0 %v7947_v1  ;;  %v2415_v60 = vrot.slane %v8460_v57, %v8165_v3 }
 0x9da   : > { %7132 = vmatpush3.msra.mxu0 %v6589_v63 }
 0x9db   : > { %7115 = vmatprep.mubr.msk.f32.mxu0 %vm939_vm14, %v1814_v62  ;;  %7133 = vmatprep.subr.mxu0 %v7947_v1  ;;  %v2096_v62 = vld [vmem:[#allocation7 + $0x20] sm:$0xff] }
 0x9dc   : > { %7116 = vmatmul.mubr.msk.f32.gmra.mxu0 %vm939_vm14, %v1815_v61  ;;  %v2097_v61 = vld [vmem:[#allocation7 + $0x28] sm:$0xff] }
 0x9dd   : > { %7137 = vmatprep.mubr.msk.f32.mxu0 %vm7948_vm0, %v7947_v1  ;;  %7134 = vmatpush3.msra.mxu0 %v6588_v0 }
 0x9de   : > { %7135 = vmatprep.subr.mxu0 %v7947_v1 }
 0x9df   : > { %7136 = vmatpush3.msra.mxu0 %v6587_v21 }
 0x9e0   : > { %7151 = vmatprep.subr.mxu0 %v7947_v1 }
 0xa97   : > { %v7114_v4 = vpop.f32.mrf.mxu0 }
 0xa98   : > { %v1914_v17 = vmul.f32 %v7114_v4, %v8210_v24 }
 0xa99   : > { %v1894_v8 = vpop.f32.mrf.mxu0 }
 0xa9a   : > { %v1913_v20 = vmul.f32 %v8195_v18, %v1894_v8  ;;  %v2285_v8 = vrot.slane %v702_v36, %v8186_v13 }
 0xa9c   : > { %v7117_v10 = vpop.f32.mrf.mxu0 }
 0xa9d   : > { %v1916_v11 = vmul.f32 %v7117_v10, %v8221_v28 }
 0xa9e   : > { %v1904_v12 = vpop.f32.mrf.mxu0 }
 0xa9f   : > { %v1915_v16 = vmul.f32 %v8214_v25, %v1904_v12  ;;  %7119 = vmatpush3.msra.mxu1 %v1916_v11  ;;  %v2081_v11 = vrot.slane %v8354_v39, %v8339_v30 }
 0xaa0   : > { %7120 = vmatprep.subr.mxu1 %v7947_v1 }
 0xaa1   : > { %7121 = vmatpush3.msra.mxu1 %v1915_v16 }
 0xaa2   : > { %7122 = vmatprep.subr.mxu1 %v7947_v1 }
 0xaa3   : > { %7123 = vmatpush3.msra.mxu1 %v1914_v17  ;;  %v2086_v17 = vrot.slane %v8354_v39, %v8342_v31  ;;  %v2094_v39 = vld [vmem:[#allocation7 + $0x10] sm:$0xff] }
 0xaa4   : > { %7124 = vmatprep.subr.mxu1 %v7947_v1 }
 0xaa5   : > { %7125 = vmatpush3.msra.mxu1 %v1913_v20 }
 0xaa6   : > { %7127 = vmatmul.mubr.msk.f32.vlgmr.msra.gmra.mxu1 %vm719_vm1, %v8289_v48  ;;  %7140 = vmatprep.subr.mxu1 %v7947_v1  ;;  %v8431_v48 = vld [vmem:[%s8428_s30] sm:$0x3f] }
 0xaa7   : > { %7148 = vmatprep.mubr.msk.f32.mxu1 %vm7948_vm0, %v7947_v1  ;;  %2288 = vrot.lane.b32.xlu1 %v8431_v48, %s7949_s24  ;;  %v2281_v10 = vadd.f32 %v8431_v48, %v8448_v40 }
 0xaa8   : > { %7141 = vmatpush3.msra.mxu1 %v2091_v50 }
 0xaa9   : > { %7142 = vmatprep.subr.mxu1 %v7947_v1  ;;  %v2286_v20 = vadd.f32 %v2285_v8, %v2281_v10 }
 0xaaa   : > { %7143 = vmatpush3.msra.mxu1 %v2090_v51 }
 0xaab   : > { %7144 = vmatprep.subr.mxu1 %v7947_v1 }
 0xaac   : > { %7145 = vmatpush3.msra.mxu1 %v2089_v52 }
 0xaad   : > { %7146 = vmatprep.subr.mxu1 %v7947_v1 }
 0xaae   : > { %7147 = vmatpush3.msra.mxu1 %v2088_v54 }
 0xaaf   : > { %7170 = vmatprep.subr.mxu1 %v8455_v55 }
 0xb19   : > { %v2289_v41 = vpop.permute.xlu1 %2288 }
 0xb1a   : > { %v2291_v43 = vadd.f32 %v2289_v41, %v8448_v40 }
 0xb66   : > { %v1983_v22 = vpop.f32.mrf.mxu1 }
 0xb67   : > { %7138 = vmatmul.mubr.msk.f32.vlgmr.msra.gmra.mxu0 %vm719_vm1, %v1983_v22 }
 0xb68   : > { %v7128_v23 = vpop.f32.mrf.mxu1  ;;  %7167 = vmatprep.mubr.msk.f32.mxu0 %vm7948_vm0, %v7947_v1  ;;  %7152 = vmatpush3.msra.mxu0 %v2099_v58 }
 0xb69   : > { %7153 = vmatprep.subr.mxu0 %v7947_v1 }
 0xb6a   : > { %7154 = vmatpush3.msra.mxu0 %v2098_v59  ;;  %v2309_v59 = vrot.slane %v8448_v40, 2 }
 0xb6b   : > { %7155 = vmatprep.subr.mxu0 %v7947_v1 }
 0xb6c   : > { %7156 = vmatpush3.msra.mxu0 %v2097_v61  ;;  %v8514_v61 = vsel %vm2522_vm4, %v8195_v18, %v8210_v24 }
 0xb6d   : > { %7157 = vmatprep.subr.mxu0 %v7947_v1 }
 0xb6e   : > { %7158 = vmatpush3.msra.mxu0 %v2096_v62 }
 0xb6f   : > { %7159 = vmatprep.subr.mxu0 %v7947_v1 }
 0xb70   : > { %7160 = vmatpush3.msra.mxu0 %v2095_v6 }
 0xb71   : > { %7161 = vmatprep.subr.mxu0 %v7947_v1 }
 0xb72   : > { %7162 = vmatpush3.msra.mxu0 %v2094_v39 }
 0xb73   : > { %7163 = vmatprep.subr.mxu0 %v7947_v1 }
 0xc27   : > { %v2060_v29 = vpop.f32.mrf.mxu0 }
 0xc28   : > { %v2061_v32 = vadd.f32 %v2060_v29, %v1990_v26  ;;  %v2317_v29 = vld [vmem:[#allocation2 + $0x50] sm:$0xff] }
 0xc29   : > { %v7139_v33 = vpop.f32.mrf.mxu0 }
 0xc2a   : > { %v2064_v34 = vadd.f32 %v2061_v32, %v8348_v37  ;;  %v2316_v32 = vld [vmem:[#allocation2 + $0x48] sm:$0xff]  ;;  %v2093_v33 = vld [vmem:[#allocation7 + $0x8] sm:$0xff] }
 0xc2b   : > { %7164 = vmatpush3.msra.mxu0 %v2093_v33 }
 0xc2c   : > { %v2065_v35 = vsel %vm719_vm1, %v2064_v34, 0.0  ;;  %7165 = vmatprep.subr.mxu0 %v7947_v1 }
 0xc2d   : > { %2066 = vadd.xlane.f32.xlu0 %v2065_v35  ;;  %v8490_v35 = vld [vmem:[%s9267_s12] sm:$0xf] }
 0xc2e   : > { %v2104_v36 = vrot.slane %v8490_v35, %v8186_v13 }
 0xc43   : > { %2297 = vrot.lane.b32.xlu0 %v2295_v38, %s7949_s24 }
 0xcb6   : > { %v2067_v42 = vpop.xlane.xlu0 %2066 }
 0xcb7   : > { %v2068_v37 = vmul.f32 0.03125, %v2067_v42 }
 0xcb9   : > { %v2069_v9 = vsub.f32 %v2064_v34, %v2068_v37  ;;  %v2092_v34 = vld [vmem:[#allocation7] sm:$0xff] }
 0xcba   : > { %v2298_v7 = vpop.permute.xlu0 %2297  ;;  %7166 = vmatpush3.msra.mxu0 %v2092_v34 }
 0xcbb   : > { %v2070_v44 = vmul.f32 %v2069_v9, %v2069_v9  ;;  %v2300_v45 = vadd.f32 %v2298_v7, %v2291_v43  ;;  %v2409_v43 = vrot.slane %v8460_v57, %v8186_v13 }
 0xcbd   : > { %v2071_v47 = vsel %vm719_vm1, %v2070_v44, 0.0  ;;  %v2302_v49 = vrot.slane %v2300_v45, 2 }
 0xcbe   : > { %2072 = vadd.xlane.f32.xlu1 %v2071_v47 }
 0xcbf   : > { %2303 = vrot.lane.b32.xlu0 %v2302_v49, %s7951_s26 }
 0xcc3   : > { %2417 = vrot.lane.b32.xlu0 %v2415_v60, %s7949_s24 }
 0xccf   : > { %2430 = vrot.lane.b32.xlu1 %v2315_v56, %s7950_s27 }
 0xd31   : > { %v2304_v21 = vpop.permute.xlu0 %2303 }
 0xd32   : > { %v2307_v26 = vsel %vm2306_vm2, %v2286_v20, %v2304_v21 }
 0xd47   : > { %v2073_v63 = vpop.xlane.xlu1 %2072 }
 0xd48   : > { %v2074_v0 = vmul.f32 0.03125, %v2073_v63  ;;  %v8524_v63 = vsel %vm2522_vm4, %v8214_v25, %v8221_v28 }
 0xd4a   : > { %v2075_v4 = vadd.f32 1e-05, %v2074_v0 }
 0xd4b   : > { %v2431_v20 = vpop.permute.xlu1 %2430 }
 0xd4c   : > { %7715 = vrsqrt.f32 %v2075_v4 }
 0xd59   : > { %v7716_v12 = vpop.eup %7715 }
 0xd5a   : > { %v2077_v16 = vmul.f32 %v7716_v12, %v2069_v9  ;;  %v2418_v9 = vpop.permute.xlu0 %2417 }
 0xd5c   : > { %v2082_v22 = vmul.f32 %v2081_v11, %v2077_v16 }
 0xd5e   : > { %v8477_v23 = vadd.f32 %v2086_v17, %v2082_v22 }
 0xd60   : > { %7149 = vmatmul.mubr.msk.f32.vlgmr.msra.gmra.mxu1 %vm719_vm1, %v8477_v23 }
 0xd61   : > { %7171 = vmatpush3.msra.mxu1 %v8455_v55  ;;  %7178 = vmatprep.mubr.msk.f32.mxu1 %vm719_vm1, %v2307_v26 }
 0xd62   : > { %7172 = vmatprep.subr.mxu1 %v2317_v29 }
 0xd63   : > { %7173 = vmatpush3.msra.mxu1 %v2317_v29 }
 0xd64   : > { %7174 = vmatprep.subr.mxu1 %v2316_v32 }
 0xd65   : > { %7175 = vmatpush3.msra.mxu1 %v2316_v32 }
 0xd66   : > { %7176 = vmatprep.subr.mxu1 %v2315_v56 }
 0xd67   : > { %7177 = vmatpush3.msra.mxu1 %v2315_v56 }
 0xd68   : > { %7179 = vmatmul.mubr.msk.f32.vlgmr.msra.gmra.mxu1 %vm719_vm1, %v2304_v21 }
 0xe20   : > { %v2174_v38 = vpop.f32.mrf.mxu1 }
 0xe21   : > { %v2175_v41 = vadd.f32 %v2174_v38, %v2104_v36 }
 0xe22   : > { %v7150_v42 = vpop.f32.mrf.mxu1 }
 0xe23   : > { %v2178_v37 = vmax.f32 %v2175_v41, 0.0 }
 0xe25   : > { %7168 = vmatmul.mubr.msk.f32.vlgmr.msra.gmra.mxu0 %vm2183_vm3, %v2178_v37 }
 0xe28   : > { %v7180_v7 = vpop.f32.mrf.mxu1 }
 0xe29   : > { %v2411_v44 = vadd.f32 %v7180_v7, %v2409_v43  ;;  %v2421_v45 = vadd.f32 %v7180_v7, %v2418_v9 }
 0xe2a   : > { %v2397_v47 = vpop.f32.mrf.mxu1 }
 0xe2b   : > { %v2410_v49 = vadd.f32 %v2409_v43, %v2397_v47  ;;  %2571 = vrot.lane.b32.xlu0 %v2421_v45, %s7951_s26  ;;  %v2556_v50 = vrot.slane %v2411_v44, 4  ;;  %v2420_v51 = vadd.f32 %v2418_v9, %v2397_v47 }
 0xe2d   : > { %v2555_v52 = vrot.slane %v2410_v49, 4  ;;  %v2561_v54 = vmul.f32 %v8195_v18, %v2410_v49  ;;  %v2564_v0 = vmul.f32 %v8214_v25, %v2410_v49  ;;  %v2425_v49 = vrot.slane %v8460_v57, %v8243_v5 }
 0xe2f   : > { %v2560_v56 = vsel %vm2522_vm4, %v2411_v44, %v2555_v52  ;;  %2569 = vrot.lane.b32.xlu0 %v2420_v51, %s7951_s26  ;;  %7196 = vmatprep.mubr.msk.f32.mxu0 %vm719_vm1, %v2561_v54  ;;  %v2557_v58 = vsel %vm2522_vm4, %v2555_v52, %v2556_v50 }
 0xe30   : > { %v2563_v6 = vmul.f32 %v8210_v24, %v2557_v58  ;;  %v2565_v4 = vmul.f32 %v2560_v56, %v8524_v63  ;;  %v2566_v8 = vmul.f32 %v8221_v28, %v2557_v58 }
 0xe33   : > { %2436 = vrot.lane.b32.xlu0 %v8455_v55, %s7950_s27  ;;  %v2562_v55 = vmul.f32 %v2560_v56, %v8514_v61 }
 0xe37   : > { %2434 = vrot.lane.b32.xlu0 %v2317_v29, %s7950_s27 }
 0xe3b   : > { %2432 = vrot.lane.b32.xlu0 %v2316_v32, %s7950_s27 }
 0xe3f   : > { %2310 = vrot.lane.b32.xlu0 %v2309_v59, %s7951_s26 }
 0xe9d   : > { %v2572_v60 = vpop.permute.xlu0 %2571 }
 0xe9e   : > { %7192 = vmatprep.subr.msk.mxu0 %vm719_vm1, %v2572_v60 }
 0xe9f   : > { %7193 = vmatpush3.xpose.msk.msra.mxu0 %vm719_vm1, %v2572_v60 }
 0xea1   : > { %v2570_v62 = vpop.permute.xlu0 %2569 }
 0xea2   : > { %7194 = vmatprep.subr.msk.mxu0 %vm719_vm1, %v2570_v62 }
 0xea3   : > { %7195 = vmatpush3.xpose.msk.msra.mxu0 %vm719_vm1, %v2570_v62 }
 0xea5   : > { %v2437_v12 = vpop.permute.xlu0 %2436 }
 0xea6   : > { %7197 = vmatmul.mubr.msk.f32.vlgmr.msra.gmra.mxu0 %vm719_vm1, %v2562_v55  ;;  %7181 = vmatprep.subr.mxu1 %v2437_v12 }
 0xea7   : > { %7199 = vmatprep.mubr.msk.f32.mxu0 %vm719_vm1, %v2563_v6  ;;  %7182 = vmatpush3.msra.mxu1 %v2437_v12 }
 0xea9   : > { %v2435_v16 = vpop.permute.xlu0 %2434 }
 0xeaa   : > { %7200 = vmatmul.mubr.msk.f32.gmra.mxu0 %vm719_vm1, %v2564_v0  ;;  %7183 = vmatprep.subr.mxu1 %v2435_v16 }
 0xeab   : > { %7202 = vmatprep.mubr.msk.f32.mxu0 %vm719_vm1, %v2565_v4  ;;  %7184 = vmatpush3.msra.mxu1 %v2435_v16 }
 0xead   : > { %v2433_v17 = vpop.permute.xlu0 %2432 }
 0xeae   : > { %7203 = vmatmul.mubr.msk.f32.gmra.mxu0 %vm719_vm1, %v2566_v8  ;;  %7185 = vmatprep.subr.mxu1 %v2433_v17 }
 0xeaf   : > { %7186 = vmatpush3.msra.mxu1 %v2433_v17 }
 0xeb0   : > { %7187 = vmatprep.subr.mxu1 %v2431_v20 }
 0xeb1   : > { %v8535_v21 = vpop.permute.xlu0 %2310  ;;  %7188 = vmatpush3.msra.mxu1 %v2431_v20 }
 0xeb2   : > { %v8540_v22 = vsel %vm2306_vm2, %v8448_v40, %v8535_v21 }
 0xeb3   : > { %7189 = vmatprep.mubr.msk.f32.mxu1 %vm719_vm1, %v8540_v22 }
 0xeb4   : > { %7190 = vmatmul.mubr.msk.f32.vlgmr.msra.gmra.mxu1 %vm719_vm1, %v8535_v21 }
 0xee5   : > { %v8533_v10 = vpop.f32.mrf.mxu0 }
 0xee7   : > { %v7169_v11 = vpop.f32.mrf.mxu0 }
 0xf66   : > { %v7198_v26 = vpop.f32.mrf.mxu0 }
 0xf67   : > { %v2691_v29 = vmul.f32 0.35355338, %v7198_v26 }
 0xf68   : > { %v2661_v32 = vpop.f32.mrf.mxu0 }
 0xf69   : > { %v2690_v39 = vmul.f32 0.35355338, %v2661_v32  ;;  %v2699_v33 = vsel %vm2545_vm5, %v2691_v29, -inf }
 0xf6a   : > { %2700 = vmax.xlane.f32.xlu1 %v2699_v33  ;;  %v7201_v34 = vpop.f32.mrf.mxu0 }
 0xf6b   : > { %v2693_v36 = vmul.f32 0.35355338, %v7201_v34  ;;  %v2696_v38 = vsel %vm2545_vm5, %v2690_v39, -inf }
 0xf6c   : > { %2697 = vmax.xlane.f32.xlu0 %v2696_v38  ;;  %v2671_v40 = vpop.f32.mrf.mxu0 }
 0xf6d   : > { %v2692_v42 = vmul.f32 0.35355338, %v2671_v40  ;;  %v2705_v37 = vsel %vm2545_vm5, %v2693_v36, -inf }
 0xf6e   : > { %v7204_v41 = vpop.f32.mrf.mxu0 }
 0xf6f   : > { %v2702_v7 = vsel %vm2545_vm5, %v2692_v42, -inf  ;;  %v2695_v44 = vmul.f32 0.35355338, %v7204_v41 }
 0xf70   : > { %2706 = vmax.xlane.f32.xlu0 %v2705_v37  ;;  %v2681_v43 = vpop.f32.mrf.mxu0 }
 0xf71   : > { %v2694_v9 = vmul.f32 0.35355338, %v2681_v43  ;;  %v2711_v47 = vsel %vm2545_vm5, %v2695_v44, -inf }
 0xf73   : > { %v2708_v45 = vsel %vm2545_vm5, %v2694_v9, -inf }
 0xf74   : > { %2703 = vmax.xlane.f32.xlu0 %v2702_v7  ;;  %v7191_v50 = vpop.f32.mrf.mxu1 }
 0xf75   : > { %v2519_v51 = vadd.f32 %v7191_v50, %v2425_v49 }
 0xf76   : > { %v2513_v52 = vpop.f32.mrf.mxu1 }
 0xf77   : > { %v2514_v54 = vadd.f32 %v2513_v52, %v2425_v49  ;;  %7205 = vmatprep.subr.msk.mxu1 %vm2522_vm4, %v2519_v51 }
 0xf78   : > { %2709 = vmax.xlane.f32.xlu0 %v2708_v45  ;;  %7206 = vmatpush3.msk.msra.mxu1 %vm2522_vm4, %v2519_v51 }
 0xf79   : > { %7207 = vmatprep.subr.mxu1 %v2514_v54 }
 0xf7a   : > { %7208 = vmatpush3.msra.mxu1 %v2514_v54 }
 0xf7c   : > { %2712 = vmax.xlane.f32.xlu0 %v2711_v47 }
 0xff3   : > { %v2701_v56 = vpop.xlane.xlu1 %2700 }
 0xff4   : > { %v2715_v58 = vsub.f32 %v2691_v29, %v2701_v56 }
 0xff5   : > { %v2698_v59 = vpop.xlane.xlu0 %2697 }
 0xff6   : > { %v2722_v60 = vmul.f32 1.442695, %v2715_v58  ;;  %v2714_v62 = vsub.f32 %v2690_v39, %v2698_v59 }
 0xff8   : > { %7717 = vpow2.f32 %v2722_v60  ;;  %v2720_v55 = vmul.f32 1.442695, %v2714_v62 }
 0xff9   : > { %v2707_v6 = vpop.xlane.xlu0 %2706 }
 0xffa   : > { %7719 = vpow2.f32 %v2720_v55  ;;  %v2717_v0 = vsub.f32 %v2693_v36, %v2707_v6 }
 0xffc   : > { %v2726_v4 = vmul.f32 1.442695, %v2717_v0 }
 0xffd   : > { %v2704_v8 = vpop.xlane.xlu0 %2703 }
 0xffe   : > { %7721 = vpow2.f32 %v2726_v4  ;;  %v2716_v11 = vsub.f32 %v2692_v42, %v2704_v8 }
0x1000   : > { %v2724_v12 = vmul.f32 1.442695, %v2716_v11 }
0x1001   : > { %v2710_v16 = vpop.xlane.xlu0 %2709 }
0x1002   : > { %7723 = vpow2.f32 %v2724_v12  ;;  %v2718_v17 = vsub.f32 %v2694_v9, %v2710_v16 }
0x1004   : > { %v2728_v20 = vmul.f32 1.442695, %v2718_v17 }
0x1005   : > { %v7718_v26 = vpop.eup %7717  ;;  %v2713_v32 = vpop.xlane.xlu0 %2712 }
0x1006   : > { %7725 = vpow2.f32 %v2728_v20  ;;  %v2719_v29 = vsub.f32 %v2695_v44, %v2713_v32  ;;  %v2735_v39 = vsel %vm2545_vm5, %v7718_v26, 0.0  ;;  %v2525_v44 = vadd.s32 8, %v8151_v2 }
0x1007   : > { %v7720_v33 = vpop.eup %7719  ;;  %2736 = vadd.xlane.f32.xlu1 %v2735_v39 }
0x1008   : > { %v2730_v34 = vmul.f32 1.442695, %v2719_v29  ;;  %v2732_v36 = vsel %vm2545_vm5, %v7720_v33, 0.0  ;;  %vm2526_vm6 = vcmp.eq.s32.totalorder %v2525_v44, %v8188_v14 }
0x1009   : > { %2733 = vadd.xlane.f32.xlu0 %v2732_v36  ;;  %v6618_v45 = vsel %vm2526_vm6, 1.0, %v7947_v1  ;;  %vm3056_vm6 = vcmask 257024  }
0x100a   : > { %7727 = vpow2.f32 %v2730_v34  ;;  %v7671_v47 = vpack.i.bf16 %v6618_v45, %v8251_v15 }
0x100b   : > { %v7722_v38 = vpop.eup %7721 }
0x100c   : > { %v2741_v40 = vsel %vm2545_vm5, %v7722_v38, 0.0 }
0x100d   : > { %2742 = vadd.xlane.f32.xlu1 %v2741_v40 }
0x100f   : > { %v7724_v41 = vpop.eup %7723 }
0x1010   : > { %v2738_v42 = vsel %vm2545_vm5, %v7724_v41, 0.0 }
0x1011   : > { %2739 = vadd.xlane.f32.xlu0 %v2738_v42  ;;  %v6612_v42 = vld [vmem:[%s9263_s8 + $0x50] sm:$0xff] }
0x1013   : > { %v7726_v37 = vpop.eup %7725 }
0x1014   : > { %v2744_v43 = vsel %vm2545_vm5, %v7726_v37, 0.0 }
0x1015   : > { %2745 = vadd.xlane.f32.xlu0 %v2744_v43 }
0x1017   : > { %v7728_v9 = vpop.eup %7727 }
0x1018   : > { %v2747_v7 = vsel %vm2545_vm5, %v7728_v9, 0.0 }
0x1019   : > { %2748 = vadd.xlane.f32.xlu1 %v2747_v7 }
0x102a   : > { %2536 = vrot.lane.b32.xlu1 %v6618_v45, %s7954_s28  ;;  %s7958_s28 = smov 18  }
0x102b   : > { %7672 = vrot.lane.b32.xlu0 %v7671_v47, %s7955_s17  ;;  %s697_s17 = scalar_lea.vmem %s9271_s16, %s8154_s23 }
0x102e   : > { %7677 = vrot.lane.b32.xlu1 %v7671_v47, %s7956_s19 }
0x1090   : > { %v2737_v49 = vpop.xlane.xlu1 %2736 }
0x1091   : > { %7729 = vrcp.f32 %v2737_v49 }
0x1092   : > { %v2734_v50 = vpop.xlane.xlu0 %2733 }
0x1093   : > { %7731 = vrcp.f32 %v2734_v50 }
0x1096   : > { %v2743_v51 = vpop.xlane.xlu1 %2742 }
0x1097   : > { %7733 = vrcp.f32 %v2743_v51 }
0x109a   : > { %v2740_v52 = vpop.xlane.xlu0 %2739 }
0x109b   : > { %7735 = vrcp.f32 %v2740_v52 }
0x109e   : > { %v2746_v2 = vpop.xlane.xlu0 %2745  ;;  %v7730_v14 = vpop.eup %7729 }
0x109f   : > { %7737 = vrcp.f32 %v2746_v2  ;;  %v2757_v60 = vmul.f32 %v7730_v14, %v7718_v26 }
0x10a0   : > { %v7732_v54 = vpop.eup %7731 }
0x10a1   : > { %v2756_v56 = vmul.f32 %v7732_v54, %v7720_v33  ;;  %v3097_v54 = vld [vmem:[#allocation2 + $0x78] sm:$0xff] }
0x10a2   : > { %v2749_v58 = vpop.xlane.xlu1 %2748  ;;  %v8567_v59 = vpop.permute.xlu0 %7672 }
0x10a3   : > { %7739 = vrcp.f32 %v2749_v58  ;;  %v7675_v62 = vunpack.i.h.bf16 %v8567_v59  ;;  %7209 = vmatprep.mubr.msk.f32.mxu1 %vm2545_vm5, %v2756_v56  ;;  %v7674_v55 = vunpack.i.l.bf16 %v8567_v59  ;;  %v3096_v56 = vld [vmem:[#allocation2 + $0x70] sm:$0xff]  ;;  %v2969_v58 = vrot.slane %v8460_v57, %v8303_v53 }
0x10a4   : > { %7210 = vmatmul.mubr.msk.f32.vlgmr.msra.gmra.mxu1 %vm2545_vm5, %v2757_v60  ;;  %v7734_v0 = vpop.eup %7733  ;;  %3194 = vrot.lane.b32.xlu1 %v3096_v56, %s7951_s26 }
0x10a5   : > { %v2547_v4 = vsel %vm2545_vm5, %v6618_v45, %v7675_v62  ;;  %v2546_v11 = vsel %vm2545_vm5, %v8251_v15, %v7674_v55  ;;  %v2759_v20 = vmul.f32 %v7734_v0, %v7722_v38 }
0x10a6   : > { %v2537_v6 = vpop.permute.xlu1 %2536  ;;  %v2548_v39 = vsel %vm941_vm15, %v2546_v11, %v8282_v46  ;;  %v3095_v11 = vld [vmem:[#allocation2 + $0x68] sm:$0xff] }
0x10a7   : > { %v2549_v16 = vsel %vm941_vm15, %v2547_v4, %v2537_v6 }
0x10a8   : > { %v7736_v8 = vpop.eup %7735 }
0x10a9   : > { %v2758_v12 = vmul.f32 %v7736_v8, %v7724_v41  ;;  %v6613_v41 = vld [vmem:[%s9263_s8 + $0x58] sm:$0xff] }
0x10aa   : > { %v7678_v17 = vpop.permute.xlu1 %7677  ;;  %7233 = vmatprep.subr.mxu1 %v6613_v41 }
0x10ab   : > { %v7680_v26 = vunpack.i.h.bf16 %v7678_v17  ;;  %v7679_v32 = vunpack.i.l.bf16 %v7678_v17  ;;  %7212 = vmatprep.mubr.msk.f32.mxu1 %vm2545_vm5, %v2758_v12  ;;  %7234 = vmatpush3.msra.mxu1 %v6613_v41  ;;  %v3094_v12 = vld [vmem:[#allocation2 + $0x60] sm:$0xff] }
0x10ac   : > { %v7738_v29 = vpop.eup %7737  ;;  %7213 = vmatmul.mubr.msk.f32.gmra.mxu1 %vm2545_vm5, %v2759_v20  ;;  %7235 = vmatprep.subr.mxu1 %v6612_v42 }
0x10ad   : > { %v2551_v33 = vsel %vm2550_vm7, %v2548_v39, %v7679_v32  ;;  %v2552_v34 = vsel %vm2550_vm7, %v2549_v16, %v7680_v26  ;;  %v2760_v36 = vmul.f32 %v7738_v29, %v7726_v37  ;;  %7236 = vmatpush3.msra.mxu1 %v6612_v42  ;;  %v8641_v42 = vrot.slane %v8460_v57, %v8342_v31 }
0x10ae   : > { %7230 = vmatprep.mubr.msk.f32.mxu0 %vm2884_vm8, %v2551_v33 }
0x10af   : > { %7215 = vmatprep.mubr.msk.f32.mxu1 %vm2545_vm5, %v2760_v36 }
0x10b0   : > { %v7740_v38 = vpop.eup %7739 }
0x10b1   : > { %v2761_v40 = vmul.f32 %v7740_v38, %v7728_v9 }
0x10b3   : > { %7216 = vmatmul.mubr.msk.f32.gmra.mxu1 %vm2545_vm5, %v2761_v40  ;;  %v8637_v40 = vrot.slane %v8460_v57, %v8339_v30 }
0x1116   : > { %v3195_v26 = vpop.permute.xlu1 %3194 }
0x1164   : > { %v7211_v46 = vpop.f32.mrf.mxu1 }
0x1165   : > { %v2879_v51 = vmul.f32 %v7211_v46, %v8514_v61  ;;  %v6610_v61 = vld [vmem:[%s9263_s8 + $0x40] sm:$0xff] }
0x1166   : > { %v2849_v37 = vpop.f32.mrf.mxu1 }
0x1167   : > { %v2878_v52 = vmul.f32 %v8195_v18, %v2849_v37 }
0x116c   : > { %v7214_v43 = vpop.f32.mrf.mxu1 }
0x116d   : > { %v2881_v49 = vmul.f32 %v7214_v43, %v8214_v25 }
0x116e   : > { %v2859_v7 = vpop.f32.mrf.mxu1 }
0x116f   : > { %v2880_v50 = vmul.f32 %v8210_v24, %v2859_v7 }
0x1173   : > { %v7217_v44 = vpop.f32.mrf.mxu1 }
0x1174   : > { %v2883_v9 = vmul.f32 %v7217_v44, %v8221_v28  ;;  %v8651_v44 = vld [vmem:[%s8320_s20] sm:$0xff] }
0x1175   : > { %v2869_v45 = vpop.f32.mrf.mxu1 }
0x1176   : > { %v2882_v47 = vmul.f32 %v2869_v45, %v8524_v63  ;;  %7218 = vmatprep.subr.mxu0 %v2883_v9  ;;  %v6611_v63 = vld [vmem:[%s9263_s8 + $0x48] sm:$0xff] }
0x1177   : > { %7219 = vmatpush3.msra.mxu0 %v2883_v9  ;;  %7237 = vmatprep.subr.mxu1 %v6611_v63  ;;  %v8655_v9 = vld [vmem:[#allocation4 + $0x18] sm:$0x3f] }
0x1178   : > { %7220 = vmatprep.subr.mxu0 %v2882_v47  ;;  %7238 = vmatpush3.msra.mxu1 %v6611_v63  ;;  %v3185_v57 = vrot.slane %v8655_v9, %v8165_v3 }
0x1179   : > { %7221 = vmatpush3.msra.mxu0 %v2882_v47  ;;  %7239 = vmatprep.subr.mxu1 %v6610_v61 }
0x117a   : > { %7222 = vmatprep.subr.mxu0 %v2881_v49  ;;  %7240 = vmatpush3.msra.mxu1 %v6610_v61  ;;  %v8668_v61 = vsel %vm2306_vm2, %v8195_v18, %v8210_v24 }
0x117b   : > { %7223 = vmatpush3.msra.mxu0 %v2881_v49 }
0x117c   : > { %7224 = vmatprep.subr.mxu0 %v2880_v50 }
0x117d   : > { %7225 = vmatpush3.msra.mxu0 %v2880_v50 }
0x117e   : > { %7226 = vmatprep.subr.mxu0 %v2879_v51 }
0x117f   : > { %7227 = vmatpush3.msra.mxu0 %v2879_v51 }
0x1180   : > { %7228 = vmatprep.subr.mxu0 %v2878_v52 }
0x1181   : > { %7229 = vmatpush3.msra.mxu0 %v2878_v52 }
0x1182   : > { %7231 = vmatmul.mubr.msk.f32.vlgmr.msra.gmra.mxu0 %vm2884_vm8, %v2552_v34  ;;  %7244 = vmatprep.subr.mxu0 %v7947_v1 }
0x1183   : > { %7252 = vmatprep.mubr.msk.f32.mxu0 %vm7948_vm0, %v7947_v1  ;;  %7245 = vmatpush3.msra.mxu0 %v3097_v54 }
0x1184   : > { %7246 = vmatprep.subr.mxu0 %v7947_v1 }
0x1185   : > { %7247 = vmatpush3.msra.mxu0 %v3096_v56 }
0x1186   : > { %7248 = vmatprep.subr.mxu0 %v7947_v1 }
0x1187   : > { %7249 = vmatpush3.msra.mxu0 %v3095_v11 }
0x1188   : > { %7250 = vmatprep.subr.mxu0 %v7947_v1 }
0x1189   : > { %7251 = vmatpush3.msra.mxu0 %v3094_v12 }
0x1242   : > { %v7232_v2 = vpop.f32.mrf.mxu0 }
0x1244   : > { %v2957_v14 = vpop.f32.mrf.mxu0 }
0x1245   : > { %7241 = vmatprep.mubr.msk.f32.mxu1 %vm719_vm1, %v2957_v14 }
0x1246   : > { %7242 = vmatmul.mubr.msk.f32.vlgmr.msra.gmra.mxu1 %vm719_vm1, %v7232_v2 }
0x1247   : > { %7263 = vmatprep.mubr.msk.f32.mxu1 %vm719_vm1, %v8327_v19 }
0x1306   : > { %v7243_v60 = vpop.f32.mrf.mxu1 }
0x1307   : > { %v8617_v62 = vadd.f32 %v7243_v60, %v2969_v58  ;;  %v8675_v60 = vsel %vm2522_vm4, %v8210_v24, %v8214_v25 }
0x1308   : > { %v3042_v6 = vpop.f32.mrf.mxu1 }
0x1309   : > { %v3043_v0 = vadd.f32 %v3042_v6, %v2969_v58 }
0x130b   : > { %v3051_v4 = vadd.f32 %v3043_v0, %v8540_v22  ;;  %v8685_v0 = vsel %vm3370_vm9, %v8214_v25, %v8221_v28 }
0x130d   : > { %v3053_v8 = vsel %vm719_vm1, %v3051_v4, 0.0 }
0x130e   : > { %3054 = vadd.xlane.f32.xlu0 %v3053_v8 }
0x1324   : > { %3196 = vrot.lane.b32.xlu0 %v3097_v54, %s7951_s26 }
0x1328   : > { %3192 = vrot.lane.b32.xlu0 %v3095_v11, %s7951_s26 }
0x132c   : > { %3287 = vrot.lane.b32.xlu0 %v3097_v54, %s7950_s27 }
0x1330   : > { %3283 = vrot.lane.b32.xlu0 %v3095_v11, %s7950_s27 }
0x1397   : > { %v3055_v16 = vpop.xlane.xlu0 %3054 }
0x1398   : > { %v3060_v17 = vmul.f32 0.03125, %v3055_v16 }
0x139a   : > { %v3062_v22 = vsub.f32 %v3051_v4, %v3060_v17 }
0x139b   : > { %v3197_v20 = vpop.permute.xlu0 %3196 }
0x139c   : > { %v3064_v32 = vmul.f32 %v3062_v22, %v3062_v22  ;;  %7255 = vmatprep.subr.mxu1 %v3197_v20 }
0x139d   : > { %7256 = vmatpush3.msra.mxu1 %v3197_v20 }
0x139e   : > { %v3066_v29 = vsel %vm719_vm1, %v3064_v32, 0.0  ;;  %7257 = vmatprep.subr.mxu1 %v3195_v26 }
0x139f   : > { %3067 = vadd.xlane.f32.xlu1 %v3066_v29  ;;  %7258 = vmatpush3.msra.mxu1 %v3195_v26  ;;  %v3193_v39 = vpop.permute.xlu0 %3192 }
0x13a0   : > { %7259 = vmatprep.subr.mxu1 %v3193_v39 }
0x13a1   : > { %7260 = vmatpush3.msra.mxu1 %v3193_v39 }
0x13a3   : > { %v3288_v8 = vpop.permute.xlu0 %3287 }
0x13a4   : > { %7266 = vmatprep.subr.mxu0 %v3288_v8 }
0x13a7   : > { %v3284_v25 = vpop.permute.xlu0 %3283 }
0x13b0   : > { %3190 = vrot.lane.b32.xlu1 %v3094_v12, %s7951_s26 }
0x13b4   : > { %3285 = vrot.lane.b32.xlu1 %v3096_v56, %s7950_s27 }
0x13b8   : > { %3281 = vrot.lane.b32.xlu1 %v3094_v12, %s7950_s27  ;;  %v8696_v12 = vld [vmem:[%s8320_s20 + $0x8] sm:$0xff]  ;;  %s7957_s20 = smov 6  }
0x1428   : > { %v3068_v33 = vpop.xlane.xlu1 %3067 }
0x1429   : > { %v3072_v34 = vmul.f32 0.03125, %v3068_v33 }
0x142b   : > { %v3074_v36 = vadd.f32 1e-05, %v3072_v34 }
0x142c   : > { %v3191_v38 = vpop.permute.xlu1 %3190 }
0x142d   : > { %7741 = vrsqrt.f32 %v3074_v36  ;;  %7261 = vmatprep.subr.mxu1 %v3191_v38 }
0x142e   : > { %7262 = vmatpush3.msra.mxu1 %v3191_v38 }
0x142f   : > { %7264 = vmatmul.mubr.msk.f32.vlgmr.msra.gmra.mxu1 %vm719_vm1, %v8334_v27  ;;  %7277 = vmatprep.subr.mxu1 %v7947_v1 }
0x1430   : > { %7281 = vmatprep.mubr.msk.f32.mxu1 %vm7948_vm0, %v7947_v1  ;;  %v3286_v11 = vpop.permute.xlu1 %3285 }
0x1434   : > { %v3282_v28 = vpop.permute.xlu1 %3281 }
0x143a   : > { %v7742_v41 = vpop.eup %7741 }
0x143b   : > { %v3078_v46 = vmul.f32 %v7742_v41, %v3062_v22 }
0x143d   : > { %v3084_v37 = vmul.f32 %v8637_v40, %v3078_v46 }
0x143f   : > { %v8645_v43 = vadd.f32 %v8641_v42, %v3084_v37 }
0x1441   : > { %v3092_v7 = vadd.f32 %v8645_v43, %v8431_v48  ;;  %v3108_v48 = vrot.slane %v8655_v9, %v8186_v13 }
0x1443   : > { %7253 = vmatmul.mubr.msk.f32.vlgmr.msra.gmra.mxu0 %vm719_vm1, %v3092_v7 }
0x1444   : > { %7274 = vmatprep.mubr.msk.f32.mxu0 %vm719_vm1, %v8651_v44  ;;  %7267 = vmatpush3.msra.mxu0 %v3288_v8 }
0x1445   : > { %7268 = vmatprep.subr.mxu0 %v3286_v11 }
0x1446   : > { %7269 = vmatpush3.msra.mxu0 %v3286_v11 }
0x1447   : > { %7270 = vmatprep.subr.mxu0 %v3284_v25 }
0x1448   : > { %7271 = vmatpush3.msra.mxu0 %v3284_v25 }
0x1449   : > { %7272 = vmatprep.subr.mxu0 %v3282_v28 }
0x144a   : > { %7273 = vmatpush3.msra.mxu0 %v3282_v28 }
0x144b   : > { %7275 = vmatmul.mubr.msk.f32.vlgmr.msra.gmra.mxu0 %vm719_vm1, %v8696_v12  ;;  %7290 = vmatprep.subr.mxu0 %v7947_v1 }
0x144c   : > { %7294 = vmatprep.mubr.msk.f32.mxu0 %vm7948_vm0, %v7947_v1 }
0x14ef   : > { %v7265_v45 = vpop.f32.mrf.mxu1 }
0x14f0   : > { %v3274_v47 = vadd.f32 %v7265_v45, %v3185_v57 }
0x14f1   : > { %v3268_v49 = vpop.f32.mrf.mxu1 }
0x14f2   : > { %7278 = vmatpush3.xpose.msk.msra.mxu1 %vm719_vm1, %v3274_v47  ;;  %v3269_v50 = vadd.f32 %v3268_v49, %v3185_v57 }
0x14f3   : > { %7279 = vmatprep.subr.mxu1 %v7947_v1 }
0x14f6   : > { %7280 = vmatpush3.xpose.msk.msra.mxu1 %vm719_vm1, %v3269_v50 }
0x14f7   : > { %7303 = vmatprep.subr.mxu1 %v7947_v1 }
0x1503   : > { %v3178_v51 = vpop.f32.mrf.mxu0 }
0x1504   : > { %v3179_v52 = vadd.f32 %v3178_v51, %v3108_v48 }
0x1505   : > { %v7254_v63 = vpop.f32.mrf.mxu0 }
0x1506   : > { %v3384_v2 = vrot.slane %v3179_v52, 2  ;;  %v3386_v14 = vrot.slane %v3179_v52, 4  ;;  %v3388_v58 = vrot.slane %v3179_v52, 6 }
0x1508   : > { %v3390_v54 = vsel %vm2306_vm2, %v3179_v52, %v3384_v2  ;;  %v3391_v6 = vsel %vm2522_vm4, %v3384_v2, %v3386_v14  ;;  %v3392_v4 = vsel %vm3370_vm9, %v3386_v14, %v3388_v58 }
0x1509   : > { %v3393_v56 = vmul.f32 %v3390_v54, %v8668_v61  ;;  %v3394_v18 = vmul.f32 %v3391_v6, %v8675_v60  ;;  %v3395_v24 = vmul.f32 %v3392_v4, %v8685_v0  ;;  %v3280_v54 = vrot.slane %v8655_v9, %v8243_v5 }
0x150a   : > { %v2182_v4 = vrot.slane %v8490_v35, %v8165_v3 }
0x150b   : > { %7282 = vmatmul.mubr.msk.f32.vlgmr.msra.gmra.mxu1 %vm719_vm1, %v3393_v56  ;;  %v7276_v56 = vpop.f32.mrf.mxu0 }
0x150c   : > { %7284 = vmatprep.mubr.msk.f32.mxu1 %vm7948_vm0, %v7947_v1  ;;  %v3365_v58 = vadd.f32 %v7276_v56, %v3280_v54 }
0x150d   : > { %v3359_v6 = vpop.f32.mrf.mxu0 }
0x150e   : > { %7291 = vmatpush3.msra.mxu0 %v3365_v58  ;;  %v2279_v58 = vrot.slane %v8490_v35, %v8303_v53 }
0x150f   : > { %7285 = vmatmul.mubr.msk.f32.gmra.mxu1 %vm719_vm1, %v3394_v18  ;;  %v3360_v18 = vadd.f32 %v3359_v6, %v3280_v54  ;;  %7292 = vmatprep.subr.mxu0 %v7947_v1 }
0x1510   : > { %7287 = vmatprep.mubr.msk.f32.mxu1 %vm7948_vm0, %v7947_v1 }
0x1511   : > { %7293 = vmatpush3.msra.mxu0 %v3360_v18 }
0x1512   : > { %7312 = vmatprep.subr.mxu0 %v7947_v1 }
0x1513   : > { %7288 = vmatmul.mubr.msk.f32.gmra.mxu1 %vm719_vm1, %v3395_v24  ;;  %v2254_v24 = vadd.f32 %v8533_v10, %v2182_v4  ;;  %v6640_v4 = vld [vmem:[%s9263_s8 + $0x70] sm:$0xff] }
0x1514   : > { %7309 = vmatprep.mubr.msk.f32.mxu1 %vm7948_vm0, %v7947_v1 }
0x1515   : > { %v2257_v8 = vadd.f32 %v2254_v24, %v8477_v23 }
0x1517   : > { %v2258_v11 = vsel %vm719_vm1, %v2257_v8, 0.0 }
0x15cb   : > { %v3477_v16 = vpop.f32.mrf.mxu1 }
0x15cc   : > { %v3491_v17 = vmul.f32 0.35355338, %v3477_v16 }
0x15cd   : > { %v7283_v22 = vpop.f32.mrf.mxu1 }
0x15ce   : > { %v3494_v20 = vsel %vm939_vm14, %v3491_v17, -inf }
0x15cf   : > { %3495 = vmax.xlane.f32.xlu0 %v3494_v20  ;;  %v3482_v26 = vpop.f32.mrf.mxu1 }
0x15d0   : > { %v3492_v32 = vmul.f32 0.35355338, %v3482_v26 }
0x15d1   : > { %v7286_v29 = vpop.f32.mrf.mxu1 }
0x15d2   : > { %v3497_v39 = vsel %vm939_vm14, %v3492_v32, -inf }
0x15d3   : > { %3498 = vmax.xlane.f32.xlu1 %v3497_v39  ;;  %v3487_v33 = vpop.f32.mrf.mxu1 }
0x15d4   : > { %v3493_v34 = vmul.f32 0.35355338, %v3487_v33 }
0x15d5   : > { %v7289_v36 = vpop.f32.mrf.mxu1 }
0x15d6   : > { %v3500_v38 = vsel %vm939_vm14, %v3493_v34, -inf }
0x15d7   : > { %3501 = vmax.xlane.f32.xlu0 %v3500_v38 }
0x1658   : > { %v3496_v41 = vpop.xlane.xlu0 %3495 }
0x1659   : > { %v3503_v46 = vsub.f32 %v3491_v17, %v3496_v41 }
0x165b   : > { %v3506_v37 = vmul.f32 1.442695, %v3503_v46 }
0x165c   : > { %v3499_v7 = vpop.xlane.xlu1 %3498 }
0x165d   : > { %7743 = vpow2.f32 %v3506_v37  ;;  %v3504_v57 = vsub.f32 %v3492_v32, %v3499_v7 }
0x165f   : > { %v3508_v45 = vmul.f32 1.442695, %v3504_v57 }
0x1660   : > { %v3502_v47 = vpop.xlane.xlu0 %3501 }
0x1661   : > { %7745 = vpow2.f32 %v3508_v45  ;;  %v3505_v49 = vsub.f32 %v3493_v34, %v3502_v47 }
0x1663   : > { %v3510_v50 = vmul.f32 1.442695, %v3505_v49 }
0x1665   : > { %7747 = vpow2.f32 %v3510_v50 }
0x166a   : > { %v7744_v48 = vpop.eup %7743 }
0x166b   : > { %v3512_v51 = vsel %vm939_vm14, %v7744_v48, 0.0 }
0x166c   : > { %3513 = vadd.xlane.f32.xlu0 %v3512_v51 }
0x166e   : > { %v7746_v52 = vpop.eup %7745 }
0x166f   : > { %v3515_v63 = vsel %vm939_vm14, %v7746_v52, 0.0 }
0x1670   : > { %3516 = vadd.xlane.f32.xlu1 %v3515_v63  ;;  %v2274_v63 = vrot.slane %v8490_v35, %v8243_v5  ;;  %v6639_v35 = vld [vmem:[%s9263_s8 + $0x68] sm:$0xff] }
0x1672   : > { %v7748_v2 = vpop.eup %7747 }
0x1673   : > { %v3518_v14 = vsel %vm939_vm14, %v7748_v2, 0.0 }
0x1674   : > { %3519 = vadd.xlane.f32.xlu0 %v3518_v14  ;;  %v6641_v14 = vld [vmem:[%s9263_s8 + $0x78] sm:$0xff] }
0x1681   : > { %3372 = vrot.lane.b32.xlu1 %v8251_v15, %s7957_s20 }
0x168a   : > { %3375 = vrot.lane.b32.xlu0 %v8251_v15, %s7958_s28 }
0x16a9   : > { %2259 = vadd.xlane.f32.xlu0 %v2258_v11  ;;  %v6638_v11 = vld [vmem:[%s9263_s8 + $0x60] sm:$0xff] }
0x16f5   : > { %v3514_v25 = vpop.xlane.xlu0 %3513 }
0x16f6   : > { %7749 = vrcp.f32 %v3514_v25 }
0x16f9   : > { %v3517_v28 = vpop.xlane.xlu1 %3516 }
0x16fa   : > { %7751 = vrcp.f32 %v3517_v28 }
0x16fd   : > { %v3520_v16 = vpop.xlane.xlu0 %3519  ;;  %v3373_v26 = vpop.permute.xlu1 %3372 }
0x16fe   : > { %7753 = vrcp.f32 %v3520_v16  ;;  %v3379_v29 = vsel %vm3378_vm10, %v8251_v15, %v3373_v26  ;;  %v3870_v16 = vld [vmem:[#allocation2 + $0x98] sm:$0xff] }
0x16ff   : > { %v3380_v33 = vsel %vm2545_vm5, %v3379_v29, %v7674_v55  ;;  %vm3841_vm5 = vcmask 259072   ;;  %v3868_v29 = vld [vmem:[#allocation2 + $0x88] sm:$0xff] }
0x1701   : > { %v3376_v39 = vpop.permute.xlu0 %3375 }
0x1702   : > { %v8735_v34 = vsel %vm3381_vm11, %v3380_v33, %v3376_v39  ;;  %v3867_v39 = vld [vmem:[#allocation2 + $0x80] sm:$0xff] }
0x1703   : > { %v7750_v17 = vpop.eup %7749 }
0x1704   : > { %v3524_v22 = vmul.f32 %v7750_v17, %v7744_v48  ;;  %v3766_v17 = vrot.slane %v8655_v9, %v8303_v53 }
0x1706   : > { %7295 = vmatmul.mubr.msk.f32.vlgmr.msra.gmra.mxu0 %vm939_vm14, %v3524_v22 }
0x1707   : > { %v7752_v20 = vpop.eup %7751  ;;  %7297 = vmatprep.mubr.msk.f32.mxu0 %vm7948_vm0, %v7947_v1 }
0x1708   : > { %v3525_v10 = vmul.f32 %v7752_v20, %v7746_v52 }
0x170a   : > { %7298 = vmatmul.mubr.msk.f32.gmra.mxu0 %vm939_vm14, %v3525_v10 }
0x170b   : > { %v7754_v23 = vpop.eup %7753  ;;  %7300 = vmatprep.mubr.msk.f32.mxu0 %vm7948_vm0, %v7947_v1 }
0x170c   : > { %v3526_v32 = vmul.f32 %v7754_v23, %v7748_v2 }
0x170e   : > { %7301 = vmatmul.mubr.msk.f32.gmra.mxu0 %vm939_vm14, %v3526_v32 }
0x170f   : > { %7313 = vmatpush3.msra.mxu0 %v3526_v32  ;;  %7318 = vmatprep.mubr.msk.f32.mxu0 %vm7948_vm0, %v7947_v1  ;;  %v3869_v32 = vld [vmem:[#allocation2 + $0x90] sm:$0xff] }
0x1710   : > { %7314 = vmatprep.subr.mxu0 %v7947_v1 }
0x1711   : > { %7315 = vmatpush3.msra.mxu0 %v3525_v10 }
0x1712   : > { %7316 = vmatprep.subr.mxu0 %v7947_v1 }
0x1713   : > { %7317 = vmatpush3.msra.mxu0 %v3524_v22 }
0x1714   : > { %7319 = vmatmul.mubr.msk.f32.vlgmr.msra.gmra.mxu0 %vm941_vm15, %v8735_v34  ;;  %7332 = vmatprep.subr.mxu0 %v7947_v1 }
0x1715   : > { %7340 = vmatprep.mubr.msk.f32.mxu0 %vm7948_vm0, %v7947_v1  ;;  %7333 = vmatpush3.msra.mxu0 %v3870_v16 }
0x1716   : > { %7334 = vmatprep.subr.mxu0 %v7947_v1 }
0x1717   : > { %7335 = vmatpush3.msra.mxu0 %v3869_v32 }
0x1718   : > { %7336 = vmatprep.subr.mxu0 %v7947_v1 }
0x1719   : > { %7337 = vmatpush3.msra.mxu0 %v3868_v29 }
0x171a   : > { %7338 = vmatprep.subr.mxu0 %v7947_v1 }
0x171b   : > { %7339 = vmatpush3.msra.mxu0 %v3867_v39 }
0x171c   : > { %7354 = vmatprep.subr.mxu0 %v7947_v1 }
0x1732   : > { %v2260_v15 = vpop.xlane.xlu0 %2259 }
0x1733   : > { %v2261_v36 = vmul.f32 0.03125, %v2260_v15 }
0x1735   : > { %v2262_v38 = vsub.f32 %v2257_v8, %v2261_v36 }
0x1737   : > { %v2263_v41 = vmul.f32 %v2262_v38, %v2262_v38 }
0x1739   : > { %v2264_v59 = vsel %vm719_vm1, %v2263_v41, 0.0 }
0x173a   : > { %2265 = vadd.xlane.f32.xlu0 %v2264_v59 }
0x1750   : > { %3963 = vrot.lane.b32.xlu0 %v3869_v32, %s7951_s26 }
0x17c3   : > { %v2266_v55 = vpop.xlane.xlu0 %2265 }
0x17c4   : > { %v2267_v46 = vmul.f32 0.03125, %v2266_v55 }
0x17c6   : > { %v2268_v37 = vadd.f32 1e-05, %v2267_v46  ;;  %v3602_v7 = vpop.f32.mrf.mxu0 }
0x17c7   : > { %v3616_v52 = vmul.f32 %v3602_v7, %v8668_v61  ;;  %v3964_v55 = vpop.permute.xlu0 %3963 }
0x17c8   : > { %7755 = vrsqrt.f32 %v2268_v37  ;;  %v7296_v57 = vpop.f32.mrf.mxu0 }
0x17ca   : > { %v3607_v45 = vpop.f32.mrf.mxu0 }
0x17cb   : > { %v3617_v51 = vmul.f32 %v3607_v45, %v8675_v60 }
0x17cc   : > { %v7299_v47 = vpop.f32.mrf.mxu0 }
0x17cd   : > { %v3858_v47 = vrot.slane %v8655_v9, %v8339_v30 }
0x17ce   : > { %v3612_v49 = vpop.f32.mrf.mxu0 }
0x17cf   : > { %v3618_v50 = vmul.f32 %v3612_v49, %v8685_v0 }
0x17d0   : > { %v7302_v48 = vpop.f32.mrf.mxu0 }
0x17d1   : > { %7304 = vmatpush3.msra.mxu1 %v3618_v50  ;;  %v3863_v48 = vrot.slane %v8655_v9, %v8342_v31 }
0x17d2   : > { %7305 = vmatprep.subr.mxu1 %v7947_v1 }
0x17d3   : > { %7306 = vmatpush3.msra.mxu1 %v3617_v51 }
0x17d4   : > { %v3758_v2 = vpop.f32.mrf.mxu0  ;;  %7307 = vmatprep.subr.mxu1 %v7947_v1 }
0x17d5   : > { %v7756_v54 = vpop.eup %7755  ;;  %v3762_v56 = vmul.f32 0.25, %v3758_v2  ;;  %7308 = vmatpush3.msra.mxu1 %v3616_v52 }
0x17d6   : > { %v2270_v6 = vmul.f32 %v7756_v54, %v2262_v38  ;;  %v7320_v18 = vpop.f32.mrf.mxu0  ;;  %7310 = vmatmul.mubr.msk.f32.vlgmr.msra.gmra.mxu1 %vm941_vm15, %v8735_v34  ;;  %7321 = vmatprep.subr.mxu1 %v7947_v1 }
0x17d7   : > { %6295 = vst.msk [vmem:[%s693_s29] sm:$0x3f] %vm6294_vm13, %v3762_v56  ;;  %7322 = vmatpush3.msra.mxu1 %v6641_v14  ;;  %7329 = vmatprep.mubr.msk.f32.mxu1 %vm7948_vm0, %v7947_v1  ;;  %v8824_v14 = vld [vmem:[#allocation4 + $0x20] sm:$0x3f] }
0x17d8   : > { %7323 = vmatprep.subr.mxu1 %v7947_v1  ;;  %v2275_v24 = vmul.f32 %v2274_v63, %v2270_v6  ;;  %v8817_v63 = vld [vmem:[%s8428_s30] sm:$0x3f]  ;;  %v4047_v54 = vrot.slane %v8824_v14, %v8165_v3  ;;  %v3881_v6 = vrot.slane %v8824_v14, %v8186_v13 }
0x17d9   : > { %7324 = vmatpush3.msra.mxu1 %v6640_v4 }
0x17da   : > { %7325 = vmatprep.subr.mxu1 %v7947_v1  ;;  %v8777_v8 = vadd.f32 %v2279_v58, %v2275_v24 }
0x17db   : > { %7326 = vmatpush3.msra.mxu1 %v6639_v35 }
0x17dc   : > { %7327 = vmatprep.subr.mxu1 %v7947_v1  ;;  %6282 = vst.msk [vmem:[%s685_s22] sm:$0xff] %vm719_vm1, %v8777_v8 }
0x17dd   : > { %7328 = vmatpush3.msra.mxu1 %v6638_v11 }
0x17de   : > { %7343 = vmatprep.subr.mxu1 %v7947_v1 }
0x1896   : > { %v3688_v25 = vpop.f32.mrf.mxu1 }
0x1897   : > { %7330 = vmatmul.mubr.msk.f32.vlgmr.msra.gmra.mxu1 %vm719_vm1, %v3688_v25 }
0x1898   : > { %v7311_v28 = vpop.f32.mrf.mxu1  ;;  %7351 = vmatprep.mubr.msk.f32.mxu1 %vm7948_vm0, %v7947_v1 }
0x1957   : > { %v3836_v22 = vpop.f32.mrf.mxu1 }
0x1958   : > { %v3837_v20 = vadd.f32 %v3836_v22, %v3766_v17 }
0x1959   : > { %v7331_v10 = vpop.f32.mrf.mxu1 }
0x195a   : > { %v3840_v23 = vadd.f32 %v3837_v20, %v8645_v43 }
0x195c   : > { %v3842_v26 = vsel %vm3841_vm5, %v3840_v23, 0.0 }
0x195d   : > { %3843 = vadd.xlane.f32.xlu1 %v3842_v26 }
0x196e   : > { %3965 = vrot.lane.b32.xlu1 %v3870_v16, %s7951_s26 }
0x19e6   : > { %v3844_v33 = vpop.xlane.xlu1 %3843 }
0x19e7   : > { %v3845_v15 = vmul.f32 0.03125, %v3844_v33 }
0x19e9   : > { %v3846_v36 = vsub.f32 %v3840_v23, %v3845_v15 }
0x19ea   : > { %v3966_v38 = vpop.permute.xlu1 %3965 }
0x19eb   : > { %v3847_v41 = vmul.f32 %v3846_v36, %v3846_v36  ;;  %7344 = vmatpush3.msra.mxu1 %v3966_v38 }
0x19ec   : > { %7345 = vmatprep.subr.mxu1 %v7947_v1 }
0x19ed   : > { %v3848_v59 = vsel %vm3841_vm5, %v3847_v41, 0.0  ;;  %7346 = vmatpush3.msra.mxu1 %v3964_v55 }
0x19ee   : > { %3849 = vadd.xlane.f32.xlu1 %v3848_v59  ;;  %7347 = vmatprep.subr.mxu1 %v7947_v1 }
0x19ff   : > { %3961 = vrot.lane.b32.xlu1 %v3868_v29, %s7951_s26 }
0x1a03   : > { %3959 = vrot.lane.b32.xlu1 %v3867_v39, %s7951_s26 }
0x1a77   : > { %v3850_v46 = vpop.xlane.xlu1 %3849 }
0x1a78   : > { %v3851_v37 = vmul.f32 0.03125, %v3850_v46  ;;  %v4052_v46 = vrot.slane %v8824_v14, %v8243_v5 }
0x1a7a   : > { %v3852_v7 = vadd.f32 1e-05, %v3851_v37 }
0x1a7b   : > { %v3962_v57 = vpop.permute.xlu1 %3961 }
0x1a7c   : > { %7757 = vrsqrt.f32 %v3852_v7  ;;  %7348 = vmatpush3.msra.mxu1 %v3962_v57 }
0x1a7d   : > { %7349 = vmatprep.subr.mxu1 %v7947_v1 }
0x1a7f   : > { %v3960_v45 = vpop.permute.xlu1 %3959 }
0x1a80   : > { %7350 = vmatpush3.msra.mxu1 %v3960_v45 }
0x1a81   : > { %7352 = vmatmul.mubr.msk.f32.vlgmr.msra.gmra.mxu1 %vm719_vm1, %v8777_v8  ;;  %7365 = vmatprep.subr.mxu1 %v7947_v1 }
0x1a82   : > { %7367 = vmatprep.mubr.msk.f32.mxu1 %vm7948_vm0, %v7947_v1 }
0x1a89   : > { %v7758_v49 = vpop.eup %7757 }
0x1a8a   : > { %v3854_v50 = vmul.f32 %v7758_v49, %v3846_v36 }
0x1a8c   : > { %v3859_v51 = vmul.f32 %v3858_v47, %v3854_v50 }
0x1a8e   : > { %v8814_v52 = vadd.f32 %v3863_v48, %v3859_v51 }
0x1a90   : > { %v3865_v2 = vadd.f32 %v8817_v63, %v8814_v52 }
0x1a92   : > { %7341 = vmatmul.mubr.msk.f32.vlgmr.msra.gmra.mxu0 %vm719_vm1, %v3865_v2 }
0x1a93   : > { %7356 = vmatprep.mubr.msk.f32.mxu0 %vm7948_vm0, %v7947_v1 }
0x1b41   : > { %v8828_v56 = vpop.f32.mrf.mxu1 }
0x1b42   : > { %v4048_v9 = vadd.f32 %v4047_v54, %v8828_v56 }
0x1b43   : > { %v7353_v58 = vpop.f32.mrf.mxu1 }
0x1b44   : > { %7355 = vmatpush3.xpose.msk.msra.mxu0 %vm719_vm1, %v4048_v9 }
0x1b45   : > { %7376 = vmatprep.subr.mxu0 %v7947_v1 }
0x1b52   : > { %v3951_v18 = vpop.f32.mrf.mxu0 }
0x1b53   : > { %v3952_v4 = vadd.f32 %v3951_v18, %v3881_v6 }
0x1b54   : > { %v7342_v35 = vpop.f32.mrf.mxu0 }
0x1b55   : > { %v4059_v24 = vrot.slane %v3952_v4, 2  ;;  %v4061_v11 = vrot.slane %v3952_v4, 4  ;;  %v4063_v16 = vrot.slane %v3952_v4, 6 }
0x1b57   : > { %v4065_v25 = vsel %vm2306_vm2, %v3952_v4, %v4059_v24  ;;  %v4066_v17 = vsel %vm2522_vm4, %v4059_v24, %v4061_v11  ;;  %v4067_v20 = vsel %vm3370_vm9, %v4061_v11, %v4063_v16  ;;  %v8863_v24 = vadd.f32 %v8617_v62, %v8535_v21 }
0x1b58   : > { %v4068_v28 = vmul.f32 %v4065_v25, %v8668_v61  ;;  %v4069_v22 = vmul.f32 %v4066_v17, %v8675_v60  ;;  %v4070_v10 = vmul.f32 %v4067_v20, %v8685_v0 }
0x1b59   : > { %v3057_v11 = vsel %vm3056_vm6, %v8863_v24, 0.0 }
0x1b5a   : > { %7357 = vmatmul.mubr.msk.f32.vlgmr.msra.gmra.mxu0 %vm719_vm1, %v4068_v28 }
0x1b5b   : > { %7359 = vmatprep.mubr.msk.f32.mxu0 %vm7948_vm0, %v7947_v1 }
0x1b5e   : > { %7360 = vmatmul.mubr.msk.f32.gmra.mxu0 %vm719_vm1, %v4069_v22 }
0x1b5f   : > { %7362 = vmatprep.mubr.msk.f32.mxu0 %vm7948_vm0, %v7947_v1 }
0x1b62   : > { %7363 = vmatmul.mubr.msk.f32.gmra.mxu0 %vm719_vm1, %v4070_v10 }
0x1b63   : > { %7382 = vmatprep.mubr.msk.f32.mxu0 %vm7948_vm0, %v7947_v1 }
0x1c1a   : > { %v4149_v23 = vpop.f32.mrf.mxu0 }
0x1c1b   : > { %v4163_v26 = vmul.f32 0.35355338, %v4149_v23  ;;  %v6661_v23 = vld [vmem:[%s9263_s8 + $0x98] sm:$0xff] }
0x1c1c   : > { %v7358_v32 = vpop.f32.mrf.mxu0 }
0x1c1d   : > { %v4166_v29 = vsel %vm937_vm12, %v4163_v26, -inf  ;;  %v6659_v32 = vld [vmem:[%s9263_s8 + $0x88] sm:$0xff] }
0x1c1e   : > { %4167 = vmax.xlane.f32.xlu0 %v4166_v29  ;;  %v4154_v39 = vpop.f32.mrf.mxu0 }
0x1c1f   : > { %v4164_v33 = vmul.f32 0.35355338, %v4154_v39 }
0x1c20   : > { %v7361_v15 = vpop.f32.mrf.mxu0 }
0x1c21   : > { %v4169_v36 = vsel %vm937_vm12, %v4164_v33, -inf }
0x1c22   : > { %4170 = vmax.xlane.f32.xlu1 %v4169_v36  ;;  %v4159_v38 = vpop.f32.mrf.mxu0 }
0x1c23   : > { %v4165_v41 = vmul.f32 0.35355338, %v4159_v38 }
0x1c24   : > { %v7364_v59 = vpop.f32.mrf.mxu0 }
0x1c25   : > { %v4172_v55 = vsel %vm937_vm12, %v4165_v41, -inf }
0x1c26   : > { %4173 = vmax.xlane.f32.xlu0 %v4172_v55 }
0x1c3c   : > { %4054 = vrot.lane.b32.xlu0 %v4052_v46, %s7949_s24  ;;  %v6658_v46 = vld [vmem:[%s9263_s8 + $0x80] sm:$0xff] }
0x1ca7   : > { %v4168_v37 = vpop.xlane.xlu0 %4167 }
0x1ca8   : > { %v4175_v7 = vsub.f32 %v4163_v26, %v4168_v37  ;;  %v6660_v26 = vld [vmem:[%s9263_s8 + $0x90] sm:$0xff] }
0x1caa   : > { %v4178_v57 = vmul.f32 1.442695, %v4175_v7 }
0x1cab   : > { %v4171_v45 = vpop.xlane.xlu1 %4170 }
0x1cac   : > { %7759 = vpow2.f32 %v4178_v57  ;;  %v4176_v47 = vsub.f32 %v4164_v33, %v4171_v45  ;;  %v4368_v57 = vrot.slane %v8824_v14, %v8303_v53 }
0x1cae   : > { %v4180_v49 = vmul.f32 1.442695, %v4176_v47 }
0x1caf   : > { %v4174_v50 = vpop.xlane.xlu0 %4173 }
0x1cb0   : > { %7761 = vpow2.f32 %v4180_v49  ;;  %v4177_v48 = vsub.f32 %v4165_v41, %v4174_v50 }
0x1cb2   : > { %v4182_v51 = vmul.f32 1.442695, %v4177_v48 }
0x1cb3   : > { %v4055_v4 = vpop.permute.xlu0 %4054 }
0x1cb4   : > { %7763 = vpow2.f32 %v4182_v51  ;;  %v4057_v35 = vadd.f32 %v4055_v4, %v8828_v56  ;;  %v8910_v51 = vld [vmem:[#allocation2 + $0xb0] sm:$0xff] }
0x1cb9   : > { %v7760_v2 = vpop.eup %7759 }
0x1cba   : > { %v4184_v54 = vsel %vm937_vm12, %v7760_v2, 0.0 }
0x1cbb   : > { %4185 = vadd.xlane.f32.xlu1 %v4184_v54 }
0x1cbd   : > { %v7762_v9 = vpop.eup %7761 }
0x1cbe   : > { %v4187_v58 = vsel %vm937_vm12, %v7762_v9, 0.0 }
0x1cbf   : > { %4188 = vadd.xlane.f32.xlu1 %v4187_v58 }
0x1cc1   : > { %v7764_v6 = vpop.eup %7763 }
0x1cc2   : > { %v4190_v18 = vsel %vm937_vm12, %v7764_v6, 0.0 }
0x1cc3   : > { %4191 = vadd.xlane.f32.xlu1 %v4190_v18 }
0x1cd4   : > { %4200 = vrot.lane.b32.xlu1 %v4057_v35, %s7951_s26 }
0x1cf8   : > { %3058 = vadd.xlane.f32.xlu1 %v3057_v11 }
0x1d09   : > { %4770 = vrot.lane.b32.xlu1 %v8910_v51, %s7951_s26 }
0x1d44   : > { %v4186_v25 = vpop.xlane.xlu1 %4185 }
0x1d45   : > { %7765 = vrcp.f32 %v4186_v25 }
0x1d48   : > { %v4189_v28 = vpop.xlane.xlu1 %4188 }
0x1d49   : > { %7767 = vrcp.f32 %v4189_v28  ;;  %v4669_v28 = vld [vmem:[#allocation2 + $0xb8] sm:$0xff] }
0x1d4c   : > { %v4192_v16 = vpop.xlane.xlu1 %4191 }
0x1d4d   : > { %7769 = vrcp.f32 %v4192_v16  ;;  %v4667_v16 = vld [vmem:[#allocation2 + $0xa8] sm:$0xff] }
0x1d50   : > { %v4201_v17 = vpop.permute.xlu1 %4200 }
0x1d51   : > { %7366 = vmatpush3.msra.mxu1 %v4201_v17  ;;  %v4470_v17 = vld [vmem:[#allocation6 + $0x38] sm:$0xff] }
0x1d52   : > { %v7766_v56 = vpop.eup %7765  ;;  %7385 = vmatprep.subr.mxu1 %v7947_v1 }
0x1d53   : > { %v4196_v22 = vmul.f32 %v7766_v56, %v7760_v2  ;;  %v8914_v2 = vld [vmem:[#allocation2 + $0xa0] sm:$0xff]  ;;  %v4469_v56 = vld [vmem:[#allocation6 + $0x30] sm:$0xff] }
0x1d54   : > { %4766 = vrot.lane.b32.xlu1 %v8914_v2, %s7951_s26 }
0x1d55   : > { %7368 = vmatmul.mubr.msk.f32.vlgmr.msra.gmra.mxu1 %vm937_vm12, %v4196_v22  ;;  %v4467_v22 = vld [vmem:[#allocation6 + $0x20] sm:$0xff] }
0x1d56   : > { %v7768_v21 = vpop.eup %7767  ;;  %7370 = vmatprep.mubr.msk.f32.mxu1 %vm7948_vm0, %v7947_v1  ;;  %7386 = vmatpush3.msra.mxu1 %v6661_v23  ;;  %v4475_v23 = vld [vmem:[#allocation7 + $0x58] sm:$0xff] }
0x1d57   : > { %v4197_v62 = vmul.f32 %v7768_v21, %v7762_v9  ;;  %7387 = vmatprep.subr.mxu1 %v7947_v1  ;;  %v4479_v21 = vld [vmem:[#allocation7 + $0x78] sm:$0xff] }
0x1d58   : > { %7388 = vmatpush3.msra.mxu1 %v6660_v26  ;;  %4861 = vrot.lane.b32.xlu1 %v8910_v51, %s7950_s27 }
0x1d59   : > { %7371 = vmatmul.mubr.msk.f32.gmra.mxu1 %vm937_vm12, %v4197_v62  ;;  %7389 = vmatprep.subr.mxu1 %v7947_v1  ;;  %v4478_v62 = vld [vmem:[#allocation7 + $0x70] sm:$0xff] }
0x1d5a   : > { %v7770_v20 = vpop.eup %7769  ;;  %7373 = vmatprep.mubr.msk.f32.mxu1 %vm7948_vm0, %v7947_v1  ;;  %7390 = vmatpush3.msra.mxu1 %v6659_v32 }
0x1d5b   : > { %v4198_v10 = vmul.f32 %v7770_v20, %v7764_v6  ;;  %7391 = vmatprep.subr.mxu1 %v7947_v1  ;;  %v4477_v20 = vld [vmem:[#allocation7 + $0x68] sm:$0xff] }
0x1d5c   : > { %7392 = vmatpush3.msra.mxu1 %v6658_v46  ;;  %4857 = vrot.lane.b32.xlu1 %v8914_v2, %s7950_s27 }
0x1d5d   : > { %7374 = vmatmul.mubr.msk.f32.gmra.mxu1 %vm937_vm12, %v4198_v10  ;;  %7407 = vmatprep.subr.mxu1 %v7947_v1  ;;  %v4476_v10 = vld [vmem:[#allocation7 + $0x60] sm:$0xff] }
0x1d5e   : > { %7393 = vmatprep.mubr.msk.f32.mxu1 %vm7948_vm0, %v7947_v1 }
0x1e15   : > { %v4278_v29 = vpop.f32.mrf.mxu1 }
0x1e16   : > { %v4292_v55 = vmul.f32 %v4278_v29, %v8668_v61 }
0x1e17   : > { %v7369_v39 = vpop.f32.mrf.mxu1 }
0x1e19   : > { %v4283_v33 = vpop.f32.mrf.mxu1 }
0x1e1a   : > { %v4293_v59 = vmul.f32 %v4283_v33, %v8675_v60 }
0x1e1b   : > { %v7372_v15 = vpop.f32.mrf.mxu1 }
0x1e1d   : > { %v4288_v36 = vpop.f32.mrf.mxu1 }
0x1e1e   : > { %v4294_v38 = vmul.f32 %v4288_v36, %v8685_v0  ;;  %v4459_v36 = vrot.slane %v8824_v14, %v8339_v30 }
0x1e1f   : > { %v7375_v41 = vpop.f32.mrf.mxu1 }
0x1e20   : > { %7377 = vmatpush3.msra.mxu0 %v4294_v38 }
0x1e21   : > { %7378 = vmatprep.subr.mxu0 %v7947_v1 }
0x1e22   : > { %7379 = vmatpush3.msra.mxu0 %v4293_v59  ;;  %v4464_v59 = vrot.slane %v8824_v14, %v8342_v31 }
0x1e23   : > { %7380 = vmatprep.subr.mxu0 %v7947_v1 }
0x1e24   : > { %7381 = vmatpush3.msra.mxu0 %v4292_v55 }
0x1e25   : > { %7383 = vmatmul.mubr.msk.f32.vlgmr.msra.gmra.mxu0 %vm941_vm15, %v8735_v34  ;;  %7396 = vmatprep.subr.mxu0 %v7947_v1 }
0x1e26   : > { %7404 = vmatprep.mubr.msk.f32.mxu0 %vm7948_vm0, %v7947_v1  ;;  %7397 = vmatpush3.msra.mxu0 %v4470_v17 }
0x1e27   : > { %7398 = vmatprep.subr.mxu0 %v7947_v1 }
0x1e28   : > { %7399 = vmatpush3.msra.mxu0 %v4469_v56 }
0x1e29   : > { %7400 = vmatprep.subr.mxu0 %v7947_v1 }
0x1ee5   : > { %v4361_v37 = vpop.f32.mrf.mxu0 }
0x1ee6   : > { %7394 = vmatmul.mubr.msk.f32.vlgmr.msra.gmra.mxu1 %vm719_vm1, %v4361_v37  ;;  %v8943_v37 = vrot.slane %v8817_v63, 2 }
0x1ee7   : > { %v7384_v7 = vpop.f32.mrf.mxu0  ;;  %7423 = vmatprep.mubr.msk.f32.mxu1 %vm7948_vm0, %v7947_v1  ;;  %7408 = vmatpush3.msra.mxu1 %v4479_v21 }
0x1ee8   : > { %7409 = vmatprep.subr.mxu1 %v7947_v1  ;;  %v4663_v63 = vadd.f32 %v8943_v37, %v8645_v43 }
0x1ee9   : > { %7410 = vmatpush3.msra.mxu1 %v4478_v62 }
0x1eea   : > { %7411 = vmatprep.subr.mxu1 %v7947_v1 }
0x1eeb   : > { %7412 = vmatpush3.msra.mxu1 %v4477_v20 }
0x1eec   : > { %7413 = vmatprep.subr.mxu1 %v7947_v1 }
0x1eed   : > { %7414 = vmatpush3.msra.mxu1 %v4476_v10 }
0x1eee   : > { %7415 = vmatprep.subr.mxu1 %v7947_v1 }
0x1eef   : > { %7416 = vmatpush3.msra.mxu1 %v4475_v23 }
0x1ef0   : > { %7417 = vmatprep.subr.mxu1 %v7947_v1 }
0x1fa6   : > { %v4438_v45 = vpop.f32.mrf.mxu1 }
0x1fa7   : > { %v4439_v47 = vadd.f32 %v4438_v45, %v4368_v57 }
0x1fa8   : > { %v7395_v49 = vpop.f32.mrf.mxu1 }
0x1fa9   : > { %v4442_v50 = vadd.f32 %v4439_v47, %v8814_v52  ;;  %v3059_v52 = vpop.xlane.xlu1 %3058 }
0x1faa   : > { %v3061_v54 = vmul.f32 0.03125, %v3059_v52 }
0x1fab   : > { %v4443_v48 = vsel %vm3841_vm5, %v4442_v50, 0.0 }
0x1fac   : > { %4444 = vadd.xlane.f32.xlu0 %v4443_v48  ;;  %v3063_v6 = vsub.f32 %v8863_v24, %v3061_v54  ;;  %v4468_v24 = vld [vmem:[#allocation6 + $0x28] sm:$0xff]  ;;  %v4472_v54 = vld [vmem:[#allocation7 + $0x40] sm:$0xff] }
0x1fad   : > { %7401 = vmatpush3.msra.mxu0 %v4468_v24  ;;  %v4771_v49 = vpop.permute.xlu1 %4770 }
0x1fae   : > { %v3065_v11 = vmul.f32 %v3063_v6, %v3063_v6  ;;  %7402 = vmatprep.subr.mxu0 %v7947_v1 }
0x1faf   : > { %7403 = vmatpush3.msra.mxu0 %v4467_v22 }
0x1fb0   : > { %v3069_v25 = vsel %vm3056_vm6, %v3065_v11, 0.0  ;;  %7426 = vmatprep.subr.mxu0 %v7947_v1 }
0x1fb1   : > { %v4767_v52 = vpop.permute.xlu1 %4766 }
0x2035   : > { %v4445_v9 = vpop.xlane.xlu0 %4444 }
0x2036   : > { %v4446_v58 = vmul.f32 0.03125, %v4445_v9  ;;  %v8978_v9 = vld [vmem:[%s9267_s12 + $0x4] sm:$0xf] }
0x2038   : > { %v4447_v18 = vsub.f32 %v4442_v50, %v4446_v58  ;;  %v4683_v50 = vrot.slane %v4663_v63, 6 }
0x203a   : > { %v4448_v4 = vmul.f32 %v4447_v18, %v4447_v18 }
0x203c   : > { %v4449_v35 = vsel %vm3841_vm5, %v4448_v4, 0.0 }
0x203d   : > { %4450 = vadd.xlane.f32.xlu0 %v4449_v35  ;;  %v8985_v35 = vld [vmem:[#allocation4 + $0x28] sm:$0x3f] }
0x203e   : > { %v4761_v17 = vrot.slane %v8985_v35, %v8165_v3 }
0x2041   : > { %3070 = vadd.xlane.f32.xlu0 %v3069_v25  ;;  %v4680_v25 = vrot.slane %v8985_v35, %v8186_v13 }
0x2057   : > { %4772 = vrot.lane.b32.xlu0 %v4669_v28, %s7951_s26 }
0x205b   : > { %4768 = vrot.lane.b32.xlu0 %v4667_v16, %s7951_s26 }
0x205f   : > { %4863 = vrot.lane.b32.xlu0 %v4669_v28, %s7950_s27 }
0x2063   : > { %4859 = vrot.lane.b32.xlu0 %v4667_v16, %s7950_s27 }
0x20c6   : > { %v4451_v26 = vpop.xlane.xlu0 %4450 }
0x20c7   : > { %v4452_v32 = vmul.f32 0.03125, %v4451_v26 }
0x20c9   : > { %v4453_v29 = vadd.f32 1e-05, %v4452_v32 }
0x20ca   : > { %v3071_v39 = vpop.xlane.xlu0 %3070 }
0x20cb   : > { %7771 = vrsqrt.f32 %v4453_v29  ;;  %v3073_v33 = vmul.f32 0.03125, %v3071_v39 }
0x20cd   : > { %v3075_v15 = vadd.f32 1e-05, %v3073_v33 }
0x20ce   : > { %v4773_v47 = vpop.permute.xlu0 %4772 }
0x20cf   : > { %7773 = vrsqrt.f32 %v3075_v15  ;;  %v4862_v15 = vpop.permute.xlu1 %4861 }
0x20d8   : > { %v7772_v38 = vpop.eup %7771 }
0x20d9   : > { %v4455_v41 = vmul.f32 %v7772_v38, %v4447_v18  ;;  %v4858_v38 = vpop.permute.xlu1 %4857 }
0x20db   : > { %v4460_v55 = vmul.f32 %v4459_v36, %v4455_v41 }
0x20dc   : > { %v7774_v46 = vpop.eup %7773 }
0x20dd   : > { %v3079_v7 = vmul.f32 %v7774_v46, %v3063_v6  ;;  %v8945_v57 = vadd.f32 %v4464_v59, %v4460_v55 }
0x20df   : > { %7405 = vmatmul.mubr.msk.f32.vlgmr.msra.gmra.mxu0 %vm719_vm1, %v8945_v57  ;;  %v3085_v45 = vmul.f32 %v8637_v40, %v3079_v7 }
0x20e0   : > { %7427 = vmatpush3.msra.mxu0 %v4669_v28  ;;  %7434 = vmatprep.mubr.msk.f32.mxu0 %vm7948_vm0, %v7947_v1 }
0x20e1   : > { %7428 = vmatprep.subr.mxu0 %v7947_v1  ;;  %v8954_v14 = vadd.f32 %v8641_v42, %v3085_v45 }
0x20e2   : > { %7429 = vmatpush3.msra.mxu0 %v8910_v51  ;;  %v4769_v51 = vpop.permute.xlu0 %4768 }
0x20e3   : > { %7430 = vmatprep.subr.mxu0 %v7947_v1  ;;  %v4664_v40 = vadd.f32 %v8943_v37, %v8954_v14 }
0x20e4   : > { %7431 = vmatpush3.msra.mxu0 %v4667_v16 }
0x20e5   : > { %7432 = vmatprep.subr.mxu0 %v7947_v1  ;;  %v4684_v48 = vrot.slane %v4664_v40, 6 }
0x20e6   : > { %7433 = vmatpush3.msra.mxu0 %v8914_v2  ;;  %v4474_v2 = vld [vmem:[#allocation7 + $0x50] sm:$0xff]  ;;  %v4864_v33 = vpop.permute.xlu0 %4863 }
0x20e7   : > { %7437 = vmatprep.subr.mxu0 %v4773_v47  ;;  %v4685_v42 = vsel %vm3370_vm9, %v4683_v50, %v4684_v48  ;;  %7418 = vmatpush3.msra.mxu1 %v4474_v2 }
0x20e8   : > { %7435 = vmatmul.mubr.msk.f32.vlgmr.msra.gmra.mxu0 %vm719_vm1, %v4685_v42  ;;  %7419 = vmatprep.subr.mxu1 %v7947_v1 }
0x20e9   : > { %7438 = vmatpush3.msra.mxu0 %v4773_v47  ;;  %7445 = vmatprep.mubr.msk.f32.mxu0 %vm719_vm1, %v8327_v19  ;;  %v4473_v19 = vld [vmem:[#allocation7 + $0x48] sm:$0xff] }
0x20ea   : > { %7439 = vmatprep.subr.mxu0 %v4771_v49  ;;  %7420 = vmatpush3.msra.mxu1 %v4473_v19  ;;  %v4860_v36 = vpop.permute.xlu0 %4859 }
0x20eb   : > { %7440 = vmatpush3.msra.mxu0 %v4771_v49  ;;  %7421 = vmatprep.subr.mxu1 %v7947_v1 }
0x20ec   : > { %7441 = vmatprep.subr.mxu0 %v4769_v51  ;;  %7422 = vmatpush3.msra.mxu1 %v4472_v54 }
0x20ed   : > { %7442 = vmatpush3.msra.mxu0 %v4769_v51  ;;  %7448 = vmatprep.subr.mxu1 %v4864_v33 }
0x20ee   : > { %7443 = vmatprep.subr.mxu0 %v4767_v52 }
0x20ef   : > { %7444 = vmatpush3.msra.mxu0 %v4767_v52 }
0x20f0   : > { %7446 = vmatmul.mubr.msk.f32.vlgmr.msra.gmra.mxu0 %vm719_vm1, %v8334_v27  ;;  %7459 = vmatprep.subr.mxu0 %v7947_v1  ;;  %v4485_v27 = vrot.slane %v8978_v9, %v8186_v13 }
0x20f1   : > { %7463 = vmatprep.mubr.msk.f32.mxu0 %vm7948_vm0, %v7947_v1 }
0x219f   : > { %v4555_v58 = vpop.f32.mrf.mxu0 }
0x21a0   : > { %v4556_v6 = vadd.f32 %v4555_v58, %v4485_v27 }
0x21a1   : > { %v7406_v18 = vpop.f32.mrf.mxu0 }
0x21a2   : > { %v4559_v4 = vmax.f32 %v4556_v6, 0.0 }
0x21a4   : > { %7424 = vmatmul.mubr.msk.f32.vlgmr.msra.gmra.mxu1 %vm2183_vm3, %v4559_v4 }
0x21a5   : > { %7456 = vmatprep.mubr.msk.f32.mxu1 %vm719_vm1, %v8651_v44  ;;  %7449 = vmatpush3.msra.mxu1 %v4864_v33 }
0x21a6   : > { %7450 = vmatprep.subr.mxu1 %v4862_v15 }
0x21a7   : > { %7451 = vmatpush3.msra.mxu1 %v4862_v15 }
0x21a8   : > { %v4754_v11 = vpop.f32.mrf.mxu0  ;;  %7452 = vmatprep.subr.mxu1 %v4860_v36 }
0x21a9   : > { %v4755_v16 = vadd.f32 %v4754_v11, %v4680_v25  ;;  %7453 = vmatpush3.msra.mxu1 %v4860_v36 }
0x21aa   : > { %v7436_v28 = vpop.f32.mrf.mxu0  ;;  %7454 = vmatprep.subr.mxu1 %v4858_v38 }
0x21ab   : > { %v4945_v24 = vrot.slane %v4755_v16, 2  ;;  %v4947_v44 = vrot.slane %v4755_v16, 4  ;;  %v4949_v23 = vrot.slane %v4755_v16, 6  ;;  %7455 = vmatpush3.msra.mxu1 %v4858_v38 }
0x21ac   : > { %7457 = vmatmul.mubr.msk.f32.vlgmr.msra.gmra.mxu1 %vm719_vm1, %v8696_v12  ;;  %7472 = vmatprep.subr.mxu1 %v7947_v1 }
0x21ad   : > { %v4951_v62 = vsel %vm2306_vm2, %v4755_v16, %v4945_v24  ;;  %v4952_v26 = vsel %vm2522_vm4, %v4945_v24, %v4947_v44  ;;  %v4953_v29 = vsel %vm3370_vm9, %v4947_v44, %v4949_v23  ;;  %7476 = vmatprep.mubr.msk.f32.mxu1 %vm7948_vm0, %v7947_v1 }
0x21ae   : > { %v4954_v10 = vmul.f32 %v4951_v62, %v8668_v61  ;;  %v4955_v32 = vmul.f32 %v4952_v26, %v8675_v60  ;;  %v4956_v39 = vmul.f32 %v4953_v29, %v8685_v0 }
0x21b0   : > { %v7447_v56 = vpop.f32.mrf.mxu0 }
0x21b1   : > { %v4850_v22 = vadd.f32 %v7447_v56, %v4761_v17  ;;  %v4856_v56 = vrot.slane %v8985_v35, %v8243_v5 }
0x21b2   : > { %v4844_v21 = vpop.f32.mrf.mxu0 }
0x21b3   : > { %7460 = vmatpush3.xpose.msk.msra.mxu0 %vm719_vm1, %v4850_v22  ;;  %v4845_v20 = vadd.f32 %v4844_v21, %v4761_v17 }
0x21b4   : > { %7461 = vmatprep.subr.mxu0 %v7947_v1 }
0x21b7   : > { %7462 = vmatpush3.xpose.msk.msra.mxu0 %vm719_vm1, %v4845_v20 }
0x21b8   : > { %7485 = vmatprep.subr.mxu0 %v7947_v1 }
0x21ba   : > { %7464 = vmatmul.mubr.msk.f32.vlgmr.msra.gmra.mxu0 %vm719_vm1, %v4954_v10 }
0x21bb   : > { %7466 = vmatprep.mubr.msk.f32.mxu0 %vm7948_vm0, %v7947_v1 }
0x21be   : > { %7467 = vmatmul.mubr.msk.f32.gmra.mxu0 %vm719_vm1, %v4955_v32 }
0x21bf   : > { %7469 = vmatprep.mubr.msk.f32.mxu0 %vm7948_vm0, %v7947_v1 }
0x21c2   : > { %7470 = vmatmul.mubr.msk.f32.gmra.mxu0 %vm719_vm1, %v4956_v39 }
0x21c3   : > { %7491 = vmatprep.mubr.msk.f32.mxu0 %vm7948_vm0, %v7947_v1 }
0x2264   : > { %v9015_v41 = vpop.f32.mrf.mxu1 }
0x2266   : > { %v7425_v59 = vpop.f32.mrf.mxu1 }
0x226c   : > { %v7458_v24 = vpop.f32.mrf.mxu1 }
0x226d   : > { %v4941_v22 = vadd.f32 %v7458_v24, %v4856_v56 }
0x226e   : > { %v4935_v21 = vpop.f32.mrf.mxu1 }
0x226f   : > { %v4936_v44 = vadd.f32 %v4935_v21, %v4856_v56  ;;  %7473 = vmatpush3.msra.mxu1 %v4941_v22 }
0x2270   : > { %7474 = vmatprep.subr.mxu1 %v7947_v1 }
0x2271   : > { %7475 = vmatpush3.msra.mxu1 %v4936_v44 }
0x2272   : > { %7494 = vmatprep.subr.mxu1 %v7947_v1 }
0x227a   : > { %v5038_v55 = vpop.f32.mrf.mxu0 }
0x227b   : > { %v5052_v46 = vmul.f32 0.35355338, %v5038_v55 }
0x227c   : > { %v7465_v7 = vpop.f32.mrf.mxu0 }
0x227d   : > { %v5055_v45 = vsel %vm939_vm14, %v5052_v46, -inf }
0x227e   : > { %5056 = vmax.xlane.f32.xlu0 %v5055_v45  ;;  %v5043_v63 = vpop.f32.mrf.mxu0 }
0x227f   : > { %v5053_v47 = vmul.f32 0.35355338, %v5043_v63 }
0x2280   : > { %v7468_v40 = vpop.f32.mrf.mxu0 }
0x2281   : > { %v5058_v49 = vsel %vm939_vm14, %v5053_v47, -inf  ;;  %v6679_v40 = vld [vmem:[%s9263_s8 + $0xb8] sm:$0xff] }
0x2282   : > { %5059 = vmax.xlane.f32.xlu1 %v5058_v49  ;;  %v5048_v12 = vpop.f32.mrf.mxu0 }
0x2283   : > { %v5054_v50 = vmul.f32 0.35355338, %v5048_v12 }
0x2284   : > { %v7471_v48 = vpop.f32.mrf.mxu0 }
0x2285   : > { %v5061_v42 = vsel %vm939_vm14, %v5054_v50, -inf  ;;  %v6677_v48 = vld [vmem:[%s9263_s8 + $0xa8] sm:$0xff] }
0x2286   : > { %5062 = vmax.xlane.f32.xlu0 %v5061_v42  ;;  %v6676_v42 = vld [vmem:[%s9263_s8 + $0xa0] sm:$0xff] }
0x2307   : > { %v5057_v51 = vpop.xlane.xlu0 %5056 }
0x2308   : > { %v5064_v52 = vsub.f32 %v5052_v46, %v5057_v51 }
0x230a   : > { %v5067_v2 = vmul.f32 1.442695, %v5064_v52 }
0x230b   : > { %v5060_v19 = vpop.xlane.xlu1 %5059 }
0x230c   : > { %7775 = vpow2.f32 %v5067_v2  ;;  %v5065_v54 = vsub.f32 %v5053_v47, %v5060_v19  ;;  %v5324_v2 = vrot.slane %v8985_v35, %v8303_v53 }
0x230e   : > { %v5069_v27 = vmul.f32 1.442695, %v5065_v54 }
0x230f   : > { %v5063_v58 = vpop.xlane.xlu0 %5062 }
0x2310   : > { %7777 = vpow2.f32 %v5069_v27  ;;  %v5066_v6 = vsub.f32 %v5054_v50, %v5063_v58  ;;  %v6678_v50 = vld [vmem:[%s9263_s8 + $0xb0] sm:$0xff] }
0x2312   : > { %v5071_v18 = vmul.f32 1.442695, %v5066_v6 }
0x2314   : > { %7779 = vpow2.f32 %v5071_v18 }
0x2319   : > { %v7776_v4 = vpop.eup %7775 }
0x231a   : > { %v5073_v11 = vsel %vm939_vm14, %v7776_v4, 0.0 }
0x231b   : > { %5074 = vadd.xlane.f32.xlu0 %v5073_v11 }
0x231d   : > { %v7778_v25 = vpop.eup %7777 }
0x231e   : > { %v5076_v28 = vsel %vm939_vm14, %v7778_v25, 0.0 }
0x231f   : > { %5077 = vadd.xlane.f32.xlu1 %v5076_v28  ;;  %v5447_v28 = vld [vmem:[#allocation2 + $0xd0] sm:$0xff] }
0x2321   : > { %v7780_v16 = vpop.eup %7779 }
0x2322   : > { %v5079_v17 = vsel %vm939_vm14, %v7780_v16, 0.0 }
0x2323   : > { %5080 = vadd.xlane.f32.xlu0 %v5079_v17  ;;  %v5445_v17 = vld [vmem:[#allocation2 + $0xc0] sm:$0xff] }
0x23a4   : > { %v5075_v62 = vpop.xlane.xlu0 %5074 }
0x23a5   : > { %7781 = vrcp.f32 %v5075_v62 }
0x23a8   : > { %v5078_v20 = vpop.xlane.xlu1 %5077 }
0x23a9   : > { %7783 = vrcp.f32 %v5078_v20 }
0x23ac   : > { %v5081_v10 = vpop.xlane.xlu0 %5080 }
0x23ad   : > { %7785 = vrcp.f32 %v5081_v10 }
0x23b2   : > { %v7782_v23 = vpop.eup %7781 }
0x23b3   : > { %v5085_v26 = vmul.f32 %v7782_v23, %v7776_v4 }
0x23b5   : > { %7477 = vmatmul.mubr.msk.f32.vlgmr.msra.gmra.mxu1 %vm939_vm14, %v5085_v26 }
0x23b6   : > { %v7784_v32 = vpop.eup %7783  ;;  %7479 = vmatprep.mubr.msk.f32.mxu1 %vm7948_vm0, %v7947_v1 }
0x23b7   : > { %v5086_v29 = vmul.f32 %v7784_v32, %v7778_v25  ;;  %v5448_v25 = vld [vmem:[#allocation2 + $0xd8] sm:$0xff] }
0x23b9   : > { %7480 = vmatmul.mubr.msk.f32.gmra.mxu1 %vm939_vm14, %v5086_v29 }
0x23ba   : > { %v7786_v39 = vpop.eup %7785  ;;  %7482 = vmatprep.mubr.msk.f32.mxu1 %vm7948_vm0, %v7947_v1 }
0x23bb   : > { %v5087_v33 = vmul.f32 %v7786_v39, %v7780_v16  ;;  %v5446_v16 = vld [vmem:[#allocation2 + $0xc8] sm:$0xff] }
0x23bd   : > { %7483 = vmatmul.mubr.msk.f32.gmra.mxu1 %vm939_vm14, %v5087_v33  ;;  %vm5403_vm14 = vcmask 261126  }
0x23be   : > { %7495 = vmatpush3.msra.mxu1 %v5087_v33  ;;  %7500 = vmatprep.mubr.msk.f32.mxu1 %vm7948_vm0, %v7947_v1 }
0x23bf   : > { %7496 = vmatprep.subr.mxu1 %v7947_v1 }
0x23c0   : > { %7497 = vmatpush3.msra.mxu1 %v5086_v29 }
0x23c1   : > { %7498 = vmatprep.subr.mxu1 %v7947_v1 }
0x23c2   : > { %7499 = vmatpush3.msra.mxu1 %v5085_v26 }
0x23c3   : > { %7501 = vmatmul.mubr.msk.f32.vlgmr.msra.gmra.mxu1 %vm941_vm15, %v8735_v34  ;;  %7514 = vmatprep.subr.mxu1 %v7947_v1 }
0x23c4   : > { %7522 = vmatprep.mubr.msk.f32.mxu1 %vm7948_vm0, %v7947_v1  ;;  %7515 = vmatpush3.msra.mxu1 %v5448_v25 }
0x23c5   : > { %7516 = vmatprep.subr.mxu1 %v7947_v1 }
0x23c6   : > { %7517 = vmatpush3.msra.mxu1 %v5447_v28 }
0x23c7   : > { %7518 = vmatprep.subr.mxu1 %v7947_v1 }
0x23c8   : > { %7519 = vmatpush3.msra.mxu1 %v5446_v16 }
0x23c9   : > { %7520 = vmatprep.subr.mxu1 %v7947_v1 }
0x23ca   : > { %7521 = vmatpush3.msra.mxu1 %v5445_v17 }
0x23cb   : > { %7536 = vmatprep.subr.mxu1 %v7947_v1 }
0x2475   : > { %v5163_v15 = vpop.f32.mrf.mxu1 }
0x2476   : > { %v5177_v63 = vmul.f32 %v5163_v15, %v8668_v61 }
0x2477   : > { %v7478_v36 = vpop.f32.mrf.mxu1 }
0x2479   : > { %v5168_v38 = vpop.f32.mrf.mxu1 }
0x247a   : > { %v5178_v45 = vmul.f32 %v5168_v38, %v8675_v60 }
0x247b   : > { %v7481_v59 = vpop.f32.mrf.mxu1 }
0x247d   : > { %v5173_v55 = vpop.f32.mrf.mxu1 }
0x247e   : > { %v5179_v46 = vmul.f32 %v5173_v55, %v8685_v0  ;;  %v5433_v55 = vrot.slane %v8985_v35, %v8339_v30 }
0x247f   : > { %v7484_v7 = vpop.f32.mrf.mxu1 }
0x2480   : > { %7486 = vmatpush3.msra.mxu0 %v5179_v46 }
0x2481   : > { %7487 = vmatprep.subr.mxu0 %v7947_v1 }
0x2482   : > { %7488 = vmatpush3.msra.mxu0 %v5178_v45 }
0x2483   : > { %v5316_v47 = vpop.f32.mrf.mxu1  ;;  %7489 = vmatprep.subr.mxu0 %v7947_v1 }
0x2484   : > { %v5320_v49 = vmul.f32 0.25, %v5316_v47  ;;  %7490 = vmatpush3.msra.mxu0 %v5177_v63  ;;  %v5439_v63 = vrot.slane %v8985_v35, %v8342_v31  ;;  %v9117_v35 = vld [vmem:[#allocation4 + $0x30] sm:$0x3f] }
0x2485   : > { %v7502_v12 = vpop.f32.mrf.mxu1  ;;  %7492 = vmatmul.mubr.msk.f32.vlgmr.msra.gmra.mxu0 %vm941_vm15, %v8735_v34  ;;  %7503 = vmatprep.subr.mxu0 %v7947_v1 }
0x2486   : > { %6296 = vst.msk [vmem:[%s697_s17] sm:$0x3f] %vm6294_vm13, %v5320_v49  ;;  %7504 = vmatpush3.msra.mxu0 %v6679_v40  ;;  %7511 = vmatprep.mubr.msk.f32.mxu0 %vm7948_vm0, %v7947_v1 }
0x2487   : > { %7505 = vmatprep.subr.mxu0 %v7947_v1 }
0x2488   : > { %7506 = vmatpush3.msra.mxu0 %v6678_v50 }
0x2489   : > { %7507 = vmatprep.subr.mxu0 %v7947_v1 }
0x248a   : > { %7508 = vmatpush3.msra.mxu0 %v6677_v48 }
0x248b   : > { %7509 = vmatprep.subr.mxu0 %v7947_v1 }
0x248c   : > { %7510 = vmatpush3.msra.mxu0 %v6676_v42 }
0x248d   : > { %7525 = vmatprep.subr.mxu0 %v7947_v1 }
0x2545   : > { %v5246_v51 = vpop.f32.mrf.mxu0 }
0x2546   : > { %7512 = vmatmul.mubr.msk.f32.vlgmr.msra.gmra.mxu0 %vm719_vm1, %v5246_v51 }
0x2547   : > { %v7493_v52 = vpop.f32.mrf.mxu0  ;;  %7533 = vmatprep.mubr.msk.f32.mxu0 %vm7948_vm0, %v7947_v1 }
0x2606   : > { %v5394_v19 = vpop.f32.mrf.mxu0 }
0x2607   : > { %v5395_v54 = vadd.f32 %v5394_v19, %v5324_v2  ;;  %v5626_v2 = vrot.slane %v9117_v35, %v8165_v3 }
0x2608   : > { %v7513_v27 = vpop.f32.mrf.mxu0 }
0x2609   : > { %v5399_v58 = vrot.slane %v5395_v54, 2 }
0x260b   : > { %v5401_v6 = vadd.f32 %v5399_v58, %v8645_v43  ;;  %v5402_v18 = vadd.f32 %v5399_v58, %v8954_v14 }
0x260d   : > { %v5407_v4 = vsel %vm3056_vm6, %v5402_v18, 0.0  ;;  %v5404_v11 = vsel %vm5403_vm14, %v5401_v6, 0.0 }
0x260e   : > { %5408 = vadd.xlane.f32.xlu0 %v5407_v4  ;;  %5405 = vadd.xlane.f32.xlu1 %v5404_v11 }
0x2697   : > { %v5409_v43 = vpop.xlane.xlu0 %5408  ;;  %v5406_v14 = vpop.xlane.xlu1 %5405 }
0x2698   : > { %v5411_v56 = vmul.f32 0.03125, %v5409_v43  ;;  %v5410_v24 = vmul.f32 0.03125, %v5406_v14 }
0x269a   : > { %v5413_v22 = vsub.f32 %v5402_v18, %v5411_v56  ;;  %v5412_v21 = vsub.f32 %v5401_v6, %v5410_v24 }
0x269c   : > { %v5415_v44 = vmul.f32 %v5413_v22, %v5413_v22  ;;  %v5414_v62 = vmul.f32 %v5412_v21, %v5412_v21 }
0x269e   : > { %v5419_v20 = vsel %vm3056_vm6, %v5415_v44, 0.0  ;;  %v5416_v10 = vsel %vm5403_vm14, %v5414_v62, 0.0 }
0x269f   : > { %5420 = vadd.xlane.f32.xlu0 %v5419_v20  ;;  %5417 = vadd.xlane.f32.xlu1 %v5416_v10 }
0x26b0   : > { %5547 = vrot.lane.b32.xlu1 %v5448_v25, %s7951_s26 }
0x26b4   : > { %5543 = vrot.lane.b32.xlu1 %v5446_v16, %s7951_s26 }
0x26b5   : > { %5545 = vrot.lane.b32.xlu0 %v5447_v28, %s7951_s26 }
0x26b8   : > { %5541 = vrot.lane.b32.xlu1 %v5445_v17, %s7951_s26 }
0x2728   : > { %v5421_v23 = vpop.xlane.xlu0 %5420  ;;  %v5418_v26 = vpop.xlane.xlu1 %5417 }
0x2729   : > { %v5423_v32 = vmul.f32 0.03125, %v5421_v23  ;;  %v5422_v29 = vmul.f32 0.03125, %v5418_v26 }
0x272b   : > { %v5425_v39 = vadd.f32 1e-05, %v5423_v32  ;;  %v5424_v33 = vadd.f32 1e-05, %v5422_v29 }
0x272c   : > { %v5548_v15 = vpop.permute.xlu1 %5547  ;;  %v5546_v36 = vpop.permute.xlu0 %5545 }
0x272d   : > { %7787 = vrsqrt.f32 %v5425_v39  ;;  %7526 = vmatpush3.msra.mxu0 %v5548_v15 }
0x272e   : > { %7789 = vrsqrt.f32 %v5424_v33  ;;  %7527 = vmatprep.subr.mxu0 %v7947_v1  ;;  %v5631_v33 = vrot.slane %v9117_v35, %v8243_v5 }
0x272f   : > { %7528 = vmatpush3.msra.mxu0 %v5546_v36 }
0x2730   : > { %v5544_v38 = vpop.permute.xlu1 %5543  ;;  %7529 = vmatprep.subr.mxu0 %v7947_v1 }
0x2731   : > { %7530 = vmatpush3.msra.mxu0 %v5544_v38 }
0x2732   : > { %7531 = vmatprep.subr.mxu0 %v7947_v1 }
0x2734   : > { %v5542_v59 = vpop.permute.xlu1 %5541 }
0x2735   : > { %7532 = vmatpush3.msra.mxu0 %v5542_v59 }
0x2736   : > { %7534 = vmatmul.mubr.msk.f32.vlgmr.msra.gmra.mxu0 %vm719_vm1, %v8777_v8  ;;  %7547 = vmatprep.subr.mxu0 %v7947_v1 }
0x2737   : > { %7549 = vmatprep.mubr.msk.f32.mxu0 %vm7948_vm0, %v7947_v1 }
0x273a   : > { %v7788_v46 = vpop.eup %7787 }
0x273b   : > { %v7790_v7 = vpop.eup %7789  ;;  %v5429_v45 = vmul.f32 %v7788_v46, %v5413_v22 }
0x273c   : > { %v5428_v47 = vmul.f32 %v7790_v7, %v5412_v21 }
0x273d   : > { %v5435_v40 = vmul.f32 %v5433_v55, %v5429_v45 }
0x273e   : > { %v5434_v49 = vmul.f32 %v5433_v55, %v5428_v47 }
0x273f   : > { %v9105_v12 = vadd.f32 %v5439_v63, %v5435_v40 }
0x2740   : > { %v9107_v8 = vadd.f32 %v5439_v63, %v5434_v49 }
0x2741   : > { %v5443_v50 = vadd.f32 %v9105_v12, %v8943_v37 }
0x2742   : > { %v5442_v48 = vadd.f32 %v9107_v8, %v8943_v37  ;;  %v5459_v37 = vrot.slane %v9117_v35, %v8186_v13 }
0x2743   : > { %v5463_v42 = vrot.slane %v5443_v50, 6 }
0x2744   : > { %v5462_v51 = vrot.slane %v5442_v48, 6 }
0x2746   : > { %v5464_v52 = vsel %vm3370_vm9, %v5462_v51, %v5463_v42 }
0x2747   : > { %7523 = vmatmul.mubr.msk.f32.vlgmr.msra.gmra.mxu1 %vm719_vm1, %v5464_v52 }
0x2748   : > { %7538 = vmatprep.mubr.msk.f32.mxu1 %vm7948_vm0, %v7947_v1 }
0x27f6   : > { %v9121_v19 = vpop.f32.mrf.mxu0 }
0x27f7   : > { %v5627_v54 = vadd.f32 %v5626_v2, %v9121_v19 }
0x27f8   : > { %v7535_v27 = vpop.f32.mrf.mxu0 }
0x27f9   : > { %7537 = vmatpush3.xpose.msk.msra.mxu1 %vm719_vm1, %v5627_v54 }
0x27fa   : > { %7558 = vmatprep.subr.mxu1 %v7947_v1 }
0x2807   : > { %v5533_v58 = vpop.f32.mrf.mxu1 }
0x2808   : > { %v5534_v6 = vadd.f32 %v5533_v58, %v5459_v37 }
0x2809   : > { %v7524_v18 = vpop.f32.mrf.mxu1 }
0x280a   : > { %v5638_v4 = vrot.slane %v5534_v6, 2  ;;  %v5640_v11 = vrot.slane %v5534_v6, 4  ;;  %v5642_v16 = vrot.slane %v5534_v6, 6 }
0x280c   : > { %v5644_v25 = vsel %vm2306_vm2, %v5534_v6, %v5638_v4  ;;  %v5645_v17 = vsel %vm2522_vm4, %v5638_v4, %v5640_v11  ;;  %v5646_v14 = vsel %vm3370_vm9, %v5640_v11, %v5642_v16  ;;  %v6697_v16 = vld [vmem:[%s9263_s8 + $0xc8] sm:$0xff] }
0x280d   : > { %v5647_v28 = vmul.f32 %v5644_v25, %v8668_v61  ;;  %v5648_v43 = vmul.f32 %v5645_v17, %v8675_v60  ;;  %v5649_v56 = vmul.f32 %v5646_v14, %v8685_v0  ;;  %v6699_v25 = vld [vmem:[%s9263_s8 + $0xd8] sm:$0xff] }
0x280f   : > { %7539 = vmatmul.mubr.msk.f32.vlgmr.msra.gmra.mxu1 %vm719_vm1, %v5647_v28  ;;  %v6698_v28 = vld [vmem:[%s9263_s8 + $0xd0] sm:$0xff] }
0x2810   : > { %7541 = vmatprep.mubr.msk.f32.mxu1 %vm7948_vm0, %v7947_v1 }
0x2813   : > { %7542 = vmatmul.mubr.msk.f32.gmra.mxu1 %vm719_vm1, %v5648_v43 }
0x2814   : > { %7544 = vmatprep.mubr.msk.f32.mxu1 %vm7948_vm0, %v7947_v1 }
0x2817   : > { %7545 = vmatmul.mubr.msk.f32.gmra.mxu1 %vm719_vm1, %v5649_v56 }
0x2818   : > { %7564 = vmatprep.mubr.msk.f32.mxu1 %vm7948_vm0, %v7947_v1 }
0x28cf   : > { %v5728_v24 = vpop.f32.mrf.mxu1 }
0x28d0   : > { %v5742_v22 = vmul.f32 0.35355338, %v5728_v24 }
0x28d1   : > { %v7540_v21 = vpop.f32.mrf.mxu1 }
0x28d2   : > { %v5745_v44 = vsel %vm937_vm12, %v5742_v22, -inf }
0x28d3   : > { %5746 = vmax.xlane.f32.xlu0 %v5745_v44  ;;  %v5733_v62 = vpop.f32.mrf.mxu1 }
0x28d4   : > { %v5743_v20 = vmul.f32 0.35355338, %v5733_v62 }
0x28d5   : > { %v7543_v10 = vpop.f32.mrf.mxu1 }
0x28d6   : > { %v5748_v23 = vsel %vm937_vm12, %v5743_v20, -inf }
0x28d7   : > { %5749 = vmax.xlane.f32.xlu1 %v5748_v23  ;;  %v5738_v26 = vpop.f32.mrf.mxu1 }
0x28d8   : > { %v5744_v32 = vmul.f32 0.35355338, %v5738_v26 }
0x28d9   : > { %v7546_v29 = vpop.f32.mrf.mxu1 }
0x28da   : > { %v5751_v39 = vsel %vm937_vm12, %v5744_v32, -inf }
0x28db   : > { %5752 = vmax.xlane.f32.xlu0 %v5751_v39 }
0x28f1   : > { %5633 = vrot.lane.b32.xlu0 %v5631_v33, %s7949_s24 }
0x295c   : > { %v5747_v15 = vpop.xlane.xlu0 %5746 }
0x295d   : > { %v5754_v36 = vsub.f32 %v5742_v22, %v5747_v15 }
0x295f   : > { %v5757_v38 = vmul.f32 1.442695, %v5754_v36 }
0x2960   : > { %v5750_v59 = vpop.xlane.xlu1 %5749 }
0x2961   : > { %7791 = vpow2.f32 %v5757_v38  ;;  %v5755_v55 = vsub.f32 %v5743_v20, %v5750_v59  ;;  %v4563_v20 = vrot.slane %v8978_v9, %v8165_v3 }
0x2963   : > { %v5759_v46 = vmul.f32 1.442695, %v5755_v55 }
0x2964   : > { %v5753_v7 = vpop.xlane.xlu0 %5752 }
0x2965   : > { %7793 = vpow2.f32 %v5759_v46  ;;  %v5756_v45 = vsub.f32 %v5744_v32, %v5753_v7  ;;  %v4634_v32 = vadd.f32 %v9015_v41, %v4563_v20 }
0x2967   : > { %v5761_v63 = vmul.f32 1.442695, %v5756_v45  ;;  %v9201_v15 = vadd.f32 %v4634_v32, %v8945_v57 }
0x2968   : > { %v5634_v51 = vpop.permute.xlu0 %5633 }
0x2969   : > { %7795 = vpow2.f32 %v5761_v63  ;;  %v5636_v52 = vadd.f32 %v5634_v51, %v9121_v19  ;;  %v4638_v59 = vsel %vm3841_vm5, %v9201_v15, 0.0  ;;  %v6076_v51 = vld [vmem:[#allocation7 + $0xb0] sm:$0xff] }
0x296e   : > { %v7792_v47 = vpop.eup %7791 }
0x296f   : > { %v5763_v40 = vsel %vm937_vm12, %v7792_v47, 0.0 }
0x2970   : > { %5764 = vadd.xlane.f32.xlu1 %v5763_v40  ;;  %v6068_v40 = vld [vmem:[#allocation6 + $0x58] sm:$0xff] }
0x2972   : > { %v7794_v49 = vpop.eup %7793 }
0x2973   : > { %v5766_v50 = vsel %vm937_vm12, %v7794_v49, 0.0 }
0x2974   : > { %5767 = vadd.xlane.f32.xlu1 %v5766_v50  ;;  %v6066_v50 = vld [vmem:[#allocation6 + $0x48] sm:$0xff] }
0x2976   : > { %v7796_v48 = vpop.eup %7795 }
0x2977   : > { %v5769_v42 = vsel %vm937_vm12, %v7796_v48, 0.0 }
0x2978   : > { %5770 = vadd.xlane.f32.xlu1 %v5769_v42  ;;  %v6077_v42 = vld [vmem:[#allocation7 + $0xb8] sm:$0xff] }
0x2989   : > { %5779 = vrot.lane.b32.xlu1 %v5636_v52, %s7951_s26  ;;  %v6075_v52 = vld [vmem:[#allocation7 + $0xa8] sm:$0xff] }
0x29f9   : > { %v5765_v2 = vpop.xlane.xlu1 %5764 }
0x29fa   : > { %7797 = vrcp.f32 %v5765_v2  ;;  %v6074_v2 = vld [vmem:[#allocation7 + $0xa0] sm:$0xff] }
0x29fd   : > { %v5768_v54 = vpop.xlane.xlu1 %5767 }
0x29fe   : > { %7799 = vrcp.f32 %v5768_v54  ;;  %v6073_v54 = vld [vmem:[#allocation7 + $0x98] sm:$0xff] }
0x2a01   : > { %v5771_v27 = vpop.xlane.xlu1 %5770 }
0x2a02   : > { %7801 = vrcp.f32 %v5771_v27 }
0x2a05   : > { %v5780_v37 = vpop.permute.xlu1 %5779 }
0x2a06   : > { %7548 = vmatpush3.msra.mxu0 %v5780_v37 }
0x2a07   : > { %v7798_v58 = vpop.eup %7797  ;;  %7567 = vmatprep.subr.mxu0 %v7947_v1 }
0x2a08   : > { %v5775_v6 = vmul.f32 %v7798_v58, %v7792_v47 }
0x2a0a   : > { %7550 = vmatmul.mubr.msk.f32.vlgmr.msra.gmra.mxu0 %vm937_vm12, %v5775_v6 }
0x2a0b   : > { %v7800_v18 = vpop.eup %7799  ;;  %7552 = vmatprep.mubr.msk.f32.mxu0 %vm7948_vm0, %v7947_v1  ;;  %7568 = vmatpush3.msra.mxu0 %v6699_v25 }
0x2a0c   : > { %v5776_v19 = vmul.f32 %v7800_v18, %v7794_v49  ;;  %7569 = vmatprep.subr.mxu0 %v7947_v1  ;;  %v6067_v49 = vld [vmem:[#allocation6 + $0x50] sm:$0xff] }
0x2a0d   : > { %7570 = vmatpush3.msra.mxu0 %v6698_v28 }
0x2a0e   : > { %7553 = vmatmul.mubr.msk.f32.gmra.mxu0 %vm937_vm12, %v5776_v19  ;;  %7571 = vmatprep.subr.mxu0 %v7947_v1 }
0x2a0f   : > { %v7802_v4 = vpop.eup %7801  ;;  %7555 = vmatprep.mubr.msk.f32.mxu0 %vm7948_vm0, %v7947_v1  ;;  %7572 = vmatpush3.msra.mxu0 %v6697_v16  ;;  %v6061_v16 = vrot.slane %v9117_v35, %v8342_v31  ;;  %v6070_v31 = vld [vmem:[#allocation7 + $0x80] sm:$0xff] }
0x2a10   : > { %v5777_v11 = vmul.f32 %v7802_v4, %v7796_v48  ;;  %7573 = vmatprep.subr.mxu0 %v7947_v1  ;;  %v6065_v48 = vld [vmem:[#allocation6 + $0x40] sm:$0xff]  ;;  %v6055_v4 = vrot.slane %v9117_v35, %v8339_v30  ;;  %v6071_v30 = vld [vmem:[#allocation7 + $0x88] sm:$0xff] }
0x2a12   : > { %7556 = vmatmul.mubr.msk.f32.gmra.mxu0 %vm937_vm12, %v5777_v11 }
0x2a13   : > { %7575 = vmatprep.mubr.msk.f32.mxu0 %vm7948_vm0, %v7947_v1 }
0x2aca   : > { %v5857_v17 = vpop.f32.mrf.mxu0 }
0x2acb   : > { %v5871_v62 = vmul.f32 %v5857_v17, %v8668_v61 }
0x2acc   : > { %v7551_v43 = vpop.f32.mrf.mxu0 }
0x2ace   : > { %v5862_v14 = vpop.f32.mrf.mxu0 }
0x2acf   : > { %v5872_v44 = vmul.f32 %v5862_v14, %v8675_v60  ;;  %v6696_v60 = vld [vmem:[%s9263_s8 + $0xc0] sm:$0xff] }
0x2ad0   : > { %v7554_v56 = vpop.f32.mrf.mxu0  ;;  %7574 = vmatpush3.msra.mxu0 %v6696_v60 }
0x2ad1   : > { %7589 = vmatprep.subr.mxu0 %v7947_v1 }
0x2ad2   : > { %v5867_v24 = vpop.f32.mrf.mxu0 }
0x2ad3   : > { %v5873_v22 = vmul.f32 %v5867_v24, %v8685_v0 }
0x2ad4   : > { %v7557_v21 = vpop.f32.mrf.mxu0 }
0x2ad5   : > { %7559 = vmatpush3.msra.mxu1 %v5873_v22 }
0x2ad6   : > { %7560 = vmatprep.subr.mxu1 %v7947_v1 }
0x2ad7   : > { %7561 = vmatpush3.msra.mxu1 %v5872_v44 }
0x2ad8   : > { %7562 = vmatprep.subr.mxu1 %v7947_v1 }
0x2ad9   : > { %7563 = vmatpush3.msra.mxu1 %v5871_v62  ;;  %v6072_v62 = vld [vmem:[#allocation7 + $0x90] sm:$0xff] }
0x2ada   : > { %7565 = vmatmul.mubr.msk.f32.vlgmr.msra.gmra.mxu1 %vm941_vm15, %v8735_v34  ;;  %7578 = vmatprep.subr.mxu1 %v7947_v1  ;;  %v5947_v34 = vrot.slane %v9117_v35, %v8303_v53  ;;  %v6711_v35 = vld [vmem:[%s9267_s12 + $0x8] sm:$0xf] }
0x2adb   : > { %7586 = vmatprep.mubr.msk.f32.mxu1 %vm7948_vm0, %v7947_v1  ;;  %7579 = vmatpush3.msra.mxu1 %v6068_v40  ;;  %v6083_v60 = vrot.slane %v6711_v35, %v8186_v13 }
0x2adc   : > { %7580 = vmatprep.subr.mxu1 %v7947_v1 }
0x2add   : > { %7581 = vmatpush3.msra.mxu1 %v6067_v49 }
0x2ade   : > { %7582 = vmatprep.subr.mxu1 %v7947_v1 }
0x2adf   : > { %7583 = vmatpush3.msra.mxu1 %v6066_v50 }
0x2ae0   : > { %7584 = vmatprep.subr.mxu1 %v7947_v1 }
0x2ae1   : > { %7585 = vmatpush3.msra.mxu1 %v6065_v48 }
0x2b9a   : > { %v5940_v61 = vpop.f32.mrf.mxu1 }
0x2b9b   : > { %7576 = vmatmul.mubr.msk.f32.vlgmr.msra.gmra.mxu0 %vm719_vm1, %v5940_v61 }
0x2b9c   : > { %v7566_v0 = vpop.f32.mrf.mxu1  ;;  %7605 = vmatprep.mubr.msk.f32.mxu0 %vm7948_vm0, %v7947_v1  ;;  %7590 = vmatpush3.msra.mxu0 %v6077_v42  ;;  %vm6292_vm0 = vcmask 521216  }
0x2b9d   : > { %7591 = vmatprep.subr.mxu0 %v7947_v1 }
0x2b9e   : > { %7592 = vmatpush3.msra.mxu0 %v6076_v51 }
0x2b9f   : > { %7593 = vmatprep.subr.mxu0 %v7947_v1 }
0x2ba0   : > { %7594 = vmatpush3.msra.mxu0 %v6075_v52  ;;  %v6273_v52 = vrot.slane %v6711_v35, %v8243_v5 }
0x2ba1   : > { %7595 = vmatprep.subr.mxu0 %v7947_v1 }
0x2ba2   : > { %7596 = vmatpush3.msra.mxu0 %v6074_v2 }
0x2ba3   : > { %7597 = vmatprep.subr.mxu0 %v7947_v1 }
0x2ba4   : > { %7598 = vmatpush3.msra.mxu0 %v6073_v54 }
0x2ba5   : > { %7599 = vmatprep.subr.mxu0 %v7947_v1 }
0x2ba6   : > { %7600 = vmatpush3.msra.mxu0 %v6072_v62 }
0x2ba7   : > { %7601 = vmatprep.subr.mxu0 %v7947_v1 }
0x2ba8   : > { %7602 = vmatpush3.msra.mxu0 %v6071_v30 }
0x2ba9   : > { %7603 = vmatprep.subr.mxu0 %v7947_v1 }
0x2baa   : > { %7604 = vmatpush3.msra.mxu0 %v6070_v31 }
0x2c5b   : > { %v6017_v10 = vpop.f32.mrf.mxu0 }
0x2c5c   : > { %v6018_v23 = vadd.f32 %v6017_v10, %v5947_v34  ;;  %v6165_v10 = vrot.slane %v6711_v35, %v8165_v3 }
0x2c5d   : > { %v7577_v26 = vpop.f32.mrf.mxu0 }
0x2c5e   : > { %v6022_v29 = vrot.slane %v6018_v23, 2 }
0x2c60   : > { %v6024_v39 = vadd.f32 %v6022_v29, %v9107_v8  ;;  %v6025_v33 = vadd.f32 %v6022_v29, %v9105_v12 }
0x2c62   : > { %v6029_v36 = vsel %vm3056_vm6, %v6025_v33, 0.0  ;;  %v6026_v38 = vsel %vm5403_vm14, %v6024_v39, 0.0 }
0x2c63   : > { %6030 = vadd.xlane.f32.xlu1 %v6029_v36  ;;  %6027 = vadd.xlane.f32.xlu0 %v6026_v38 }
0x2c67   : > { %4639 = vadd.xlane.f32.xlu1 %v4638_v59 }
0x2cec   : > { %v6031_v55 = vpop.xlane.xlu1 %6030  ;;  %v6028_v41 = vpop.xlane.xlu0 %6027 }
0x2ced   : > { %v6033_v46 = vmul.f32 0.03125, %v6031_v55  ;;  %v6032_v7 = vmul.f32 0.03125, %v6028_v41 }
0x2cef   : > { %v6035_v8 = vsub.f32 %v6025_v33, %v6033_v46  ;;  %v6034_v45 = vsub.f32 %v6024_v39, %v6032_v7 }
0x2cf0   : > { %v4640_v13 = vpop.xlane.xlu1 %4639 }
0x2cf1   : > { %v6036_v12 = vmul.f32 %v6034_v45, %v6034_v45  ;;  %v6037_v63 = vmul.f32 %v6035_v8, %v6035_v8  ;;  %v4641_v38 = vmul.f32 0.03125, %v4640_v13 }
0x2cf3   : > { %v6038_v57 = vsel %vm5403_vm14, %v6036_v12, 0.0  ;;  %v6041_v47 = vsel %vm3056_vm6, %v6037_v63, 0.0  ;;  %v4642_v41 = vsub.f32 %v9201_v15, %v4641_v38 }
0x2cf4   : > { %6039 = vadd.xlane.f32.xlu0 %v6038_v57 }
0x2cf5   : > { %v4643_v57 = vmul.f32 %v4642_v41, %v4642_v41 }
0x2cf8   : > { %6042 = vadd.xlane.f32.xlu0 %v6041_v47  ;;  %v4644_v47 = vsel %vm3841_vm5, %v4643_v57, 0.0 }
0x2d7d   : > { %v6040_v27 = vpop.xlane.xlu0 %6039 }
0x2d7e   : > { %v6044_v37 = vmul.f32 0.03125, %v6040_v27 }
0x2d80   : > { %v6046_v58 = vadd.f32 1e-05, %v6044_v37  ;;  %v6279_v37 = vrot.slane %v6711_v35, %v8303_v53 }
0x2d81   : > { %v6043_v6 = vpop.xlane.xlu0 %6042 }
0x2d82   : > { %7803 = vrsqrt.f32 %v6046_v58  ;;  %v6045_v18 = vmul.f32 0.03125, %v6043_v6 }
0x2d84   : > { %v6047_v19 = vadd.f32 1e-05, %v6045_v18 }
0x2d86   : > { %7805 = vrsqrt.f32 %v6047_v19 }
0x2d8f   : > { %v7804_v11 = vpop.eup %7803 }
0x2d90   : > { %v6050_v25 = vmul.f32 %v7804_v11, %v6034_v45 }
0x2d92   : > { %v6056_v28 = vmul.f32 %v6055_v4, %v6050_v25 }
0x2d93   : > { %v7806_v17 = vpop.eup %7805 }
0x2d94   : > { %v6051_v43 = vmul.f32 %v7806_v17, %v6035_v8  ;;  %v6062_v56 = vadd.f32 %v6061_v16, %v6056_v28 }
0x2d96   : > { %v6057_v14 = vmul.f32 %v6055_v4, %v6051_v43  ;;  %v6086_v22 = vrot.slane %v6062_v56, 6 }
0x2d98   : > { %v6063_v24 = vadd.f32 %v6061_v16, %v6057_v14 }
0x2d9a   : > { %v6087_v21 = vrot.slane %v6063_v24, 6 }
0x2d9c   : > { %v6088_v44 = vsel %vm3370_vm9, %v6086_v22, %v6087_v21  ;;  %v7816_v22 = vld [vmem:[%s9267_s12 + $0x4] sm:$0xf] }
0x2d9d   : > { %7587 = vmatmul.mubr.msk.f32.vlgmr.msra.gmra.mxu1 %vm719_vm1, %v6088_v44  ;;  %v4659_v21 = vrot.slane %v7816_v22, %v8303_v53 }
0x2e5d   : > { %v6157_v61 = vpop.f32.mrf.mxu1 }
0x2e5e   : > { %v6158_v0 = vadd.f32 %v6157_v61, %v6083_v60 }
0x2e5f   : > { %v7588_v34 = vpop.f32.mrf.mxu1 }
0x2e60   : > { %v6161_v20 = vmax.f32 %v6158_v0, 0.0 }
0x2e62   : > { %7606 = vmatmul.mubr.msk.f32.vlgmr.msra.gmra.mxu0 %vm2183_vm3, %v6161_v20 }
0x2f22   : > { %v6235_v23 = vpop.f32.mrf.mxu0 }
0x2f23   : > { %v6236_v26 = vadd.f32 %v6235_v23, %v6165_v10 }
0x2f24   : > { %v7607_v32 = vpop.f32.mrf.mxu0 }
0x2f25   : > { %v6240_v1 = vrot.slane %v6236_v26, 2 }
0x2f27   : > { %v6242_v29 = vadd.f32 %v6240_v1, %v6062_v56  ;;  %v6243_v39 = vadd.f32 %v6240_v1, %v6063_v24  ;;  %v4654_v56 = vrot.slane %v8978_v9, %v8243_v5 }
0x2f29   : > { %v6244_v33 = vsel %vm5403_vm14, %v6242_v29, 0.0  ;;  %v6247_v36 = vsel %vm3056_vm6, %v6243_v39, 0.0 }
0x2f2a   : > { %6245 = vadd.xlane.f32.xlu0 %v6244_v33 }
0x2f2e   : > { %6248 = vadd.xlane.f32.xlu0 %v6247_v36 }
0x2fb3   : > { %v6246_v59 = vpop.xlane.xlu0 %6245 }
0x2fb4   : > { %v6250_v55 = vmul.f32 0.03125, %v6246_v59 }
0x2fb6   : > { %v6252_v46 = vsub.f32 %v6242_v29, %v6250_v55 }
0x2fb7   : > { %v6249_v3 = vpop.xlane.xlu0 %6248 }
0x2fb8   : > { %v6251_v7 = vmul.f32 0.03125, %v6249_v3  ;;  %v6254_v8 = vmul.f32 %v6252_v46, %v6252_v46 }
0x2fba   : > { %v6253_v45 = vsub.f32 %v6243_v39, %v6251_v7  ;;  %v6256_v12 = vsel %vm5403_vm14, %v6254_v8, 0.0 }
0x2fbb   : > { %6257 = vadd.xlane.f32.xlu0 %v6256_v12 }
0x2fbc   : > { %v6255_v63 = vmul.f32 %v6253_v45, %v6253_v45 }
0x2fbe   : > { %v6259_v40 = vsel %vm3056_vm6, %v6255_v63, 0.0 }
0x2fbf   : > { %4645 = vadd.xlane.f32.xlu0 %v4644_v47  ;;  %6260 = vadd.xlane.f32.xlu1 %v6259_v40 }
0x3044   : > { %v6258_v49 = vpop.xlane.xlu0 %6257 }
0x3045   : > { %v6262_v50 = vmul.f32 0.03125, %v6258_v49 }
0x3047   : > { %v6264_v48 = vadd.f32 1e-05, %v6262_v50 }
0x3048   : > { %v6261_v15 = vpop.xlane.xlu1 %6260  ;;  %v4646_v16 = vpop.xlane.xlu0 %4645 }
0x3049   : > { %7807 = vrsqrt.f32 %v6264_v48  ;;  %v6263_v42 = vmul.f32 0.03125, %v6261_v15  ;;  %v4647_v17 = vmul.f32 0.03125, %v4646_v16 }
0x304b   : > { %v6265_v51 = vadd.f32 1e-05, %v6263_v42  ;;  %v4648_v43 = vadd.f32 1e-05, %v4647_v17 }
0x304d   : > { %7809 = vrsqrt.f32 %v6265_v51 }
0x304e   : > { %7811 = vrsqrt.f32 %v4648_v43 }
0x3056   : > { %v7808_v2 = vpop.eup %7807 }
0x3057   : > { %v6268_v54 = vmul.f32 %v7808_v2, %v6252_v46 }
0x3059   : > { %v6274_v27 = vmul.f32 %v6273_v52, %v6268_v54 }
0x305a   : > { %v7810_v58 = vpop.eup %7809 }
0x305b   : > { %v6269_v6 = vmul.f32 %v7810_v58, %v6253_v45  ;;  %v6280_v19 = vadd.f32 %v6279_v37, %v6274_v27  ;;  %v7812_v14 = vpop.eup %7811 }
0x305c   : > { %v4650_v24 = vmul.f32 %v7812_v14, %v4642_v41 }
0x305d   : > { %v6275_v18 = vmul.f32 %v6273_v52, %v6269_v6  ;;  %v6285_v11 = vrot.slane %v6280_v19, 6 }
0x305e   : > { %v4655_v44 = vmul.f32 %v4654_v56, %v4650_v24 }
0x305f   : > { %v6281_v4 = vadd.f32 %v6279_v37, %v6275_v18 }
0x3060   : > { %v4660_v62 = vadd.f32 %v4659_v21, %v4655_v44 }
0x3061   : > { %v6286_v25 = vrot.slane %v6281_v4, 6 }
0x3063   : > { %v6287_v28 = vsel %vm3370_vm9, %v6285_v11, %v6286_v25 }
0x3064   : > { %6288 = vrot.lane.b32.xlu1 %v6287_v28, %s7949_s24  ;;  %s689_s24 = scalar_lea.vmem %s9269_s14, %s8154_s23 }
0x30d6   : > { %v6289_v30 = vpop.permute.xlu1 %6288 }
0x30d7   : > { %v6291_v31 = vsel %vm719_vm1, %v4660_v62, %v6289_v30 }
0x30d8   : > { %6293 = vst.msk [vmem:[%s689_s24] sm:$0x3f] %vm6292_vm0, %v6291_v31 }
0x30d9 PF: > { %s30_s21 = sadd.s32 1, %s7939_s21  }
0x30da   : > { %p27_p2 = scmp.ge.s32.totalorder %s30_s21, 4  }
0x30dc   :  { %29 = sbr.rel (!%p27_p2) target bundleno = 5 (0x5), region = 194 }
0x30e1   :  { %6358 = vsyncpa [#allocation3], 1 }
0x30e2   :  { %6360 = vsyncpa [#allocation3 + $0x1], 1 }
0x30e3   :  { %6361 = vsyncpa [#allocation5], 1 }
0x30e4   :  { %6362 = vsyncpa [#allocation8], 1 }

</bundles_post_ra>
